<compile_context>
chip_gen: v5e
topology: v5e:2x2
jax: 0.10.0
libtpu: 0.0.40
codegen_flags: <defaults>
</compile_context>

<pallas_src>
import functools

import jax
import jax.numpy as jnp
import numpy as np
from jax.experimental import pallas as pl
from jax.experimental.pallas import tpu as pltpu

_HI = jax.lax.Precision.HIGHEST


def _mm_hi(a, b):
    # Exact f32 matmul (6 bf16 passes) — used ONLY off the recurrence critical
    # path (hoisted layer-0 input projection, head epilogue).
    return jnp.dot(a, b, preferred_element_type=jnp.float32, precision=_HI)


def _mm_bf16(a_f32, w_bf16):
    # Native MXU fast path: bf16 x bf16 -> f32 accumulate.  Every matmul on
    # the sequential recurrence path goes through here.
    return jnp.dot(a_f32.astype(jnp.bfloat16), w_bf16,
                   preferred_element_type=jnp.float32)


def _sigmoid(x):
    # Overflow-free logistic; tanh lives on the EUP slot (no VALU divide).
    return 0.5 * (jnp.tanh(0.5 * x) + 1.0)


# ---------------------------------------------------------------------------
# Single fused kernel: 3-layer LSTM wavefront recurrence + time mean + heads.
# ---------------------------------------------------------------------------
def _lstm_fused_kernel(batch_size,
                       # inputs
                       x_ref,
                       wih0_ref, b0_ref,
                       wa_ref, b1_ref,
                       wb_ref, b2_ref,
                       wc_ref,
                       g1_ref, be1_ref, fw1_ref, fb1_ref,
                       g2_ref, be2_ref, fw2_ref, fb2_ref,
                       g3_ref, be3_ref,
                       # outputs
                       out_ref, heads_ref,
                       # scratch
                       gates0_scr):
    T, Bp, D = x_ref.shape
    H = wc_ref.shape[0]
    G = 4 * H
    TAGS = fw2_ref.shape[1]

    # ---- Hoisted layer-0 input projection: one (T*Bp, D) @ (D, 4H) matmul
    #      (f32 HIGHEST; off the recurrence critical path). ----
    x_all = x_ref[...].reshape(T * Bp, D)
    gates0_scr[...] = (_mm_hi(x_all, wih0_ref[...])
                       + b0_ref[...]).reshape(T, Bp, G)

    b1 = b1_ref[...]
    b2 = b2_ref[...]

    def cell(gates, c_prev):
        # Full-tile activations (two EUP passes over (Bp, 4H)), slice after.
        sg = _sigmoid(gates)
        tg = jnp.tanh(gates)
        i_g = sg[:, 0 * H:1 * H]
        f_g = sg[:, 1 * H:2 * H]
        g_g = tg[:, 2 * H:3 * H]
        o_g = sg[:, 3 * H:4 * H]
        c_new = f_g * c_prev + i_g * g_g
        return o_g * jnp.tanh(c_new), c_new

    z = jnp.zeros((Bp, H), jnp.float32)
    h0 = c0 = h1 = c1 = h2 = c2 = z
    acc = z                 # sum of layer-2 outputs over time (f32)
    pend = []               # pending lstm_out columns, flushed lane-dense

    # ---- Layer wavefront: iteration k handles layer0@t=k, layer1@t=k-1,
    #      layer2@t=k-2.  All gate matmuls below read the carries produced by
    #      iteration k-1, so they are mutually independent and issued
    #      back-to-back (they pipeline in the MXU). ----
    for k in range(T + 2):
        t0, t1, t2 = k, k - 1, k - 2
        do0 = t0 < T
        do1 = 0 <= t1 < T
        do2 = 0 <= t2 < T

        if do0 or do1:
            ga = _mm_bf16(h0, wa_ref[...])    # (Bp, 8H): [h0@whh0 | h0@wih1]
        if do1 or do2:
            gb = _mm_bf16(h1, wb_ref[...])    # (Bp, 8H): [h1@whh1 | h1@wih2]
        if do2:
            gc = _mm_bf16(h2, wc_ref[...])    # (Bp, 4H):  h2@whh2

        if do0:
            n0 = cell(gates0_scr[t0] + ga[:, :G], c0)
        if do1:
            n1 = cell(ga[:, G:] + gb[:, :G] + b1, c1)
        if do2:
            n2 = cell(gb[:, G:] + gc + b2, c2)

        if do0:
            h0, c0 = n0
        if do1:
            h1, c1 = n1
        if do2:
            h2, c2 = n2
            acc = acc + h2
            pend.append(h2)
            # Flush as a 128-lane dense chunk (unmasked vst / lane-dense
            # output slab); the concat is off the matmul dependency chain.
            if (len(pend) * H) % 128 == 0 or t2 == T - 1:
                lo = (t2 + 1 - len(pend)) * H
                chunk = pend[0] if len(pend) == 1 else jnp.concatenate(pend, -1)
                out_ref[:, lo:lo + len(pend) * H] = chunk
                pend = []

    mean_h = acc * (1.0 / T)

    # ---- Head epilogue: fc1 (BN -> Linear -> BN -> LeakyReLU(0.2)) and
    #      main (Linear -> BN).  BatchNorm statistics are computed over the
    #      *real* rows only (batch padded to Bp). ----
    eps = 1e-5
    row = jax.lax.broadcasted_iota(jnp.int32, (Bp, 1), 0)
    mask = (row < batch_size).astype(jnp.float32)
    inv_b = 1.0 / batch_size

    def bn(v, gamma, beta):
        mu = jnp.sum(v * mask, axis=0, keepdims=True) * inv_b
        d = v - mu
        var = jnp.sum(d * d * mask, axis=0, keepdims=True) * inv_b
        return d * jax.lax.rsqrt(var + eps) * gamma + beta

    h = bn(mean_h, g1_ref[...], be1_ref[...])
    h = _mm_hi(h, fw1_ref[...]) + fb1_ref[...]
    h = bn(h, g2_ref[...], be2_ref[...])
    h = jnp.where(h > 0, h, 0.2 * h)                       # LeakyReLU(0.2)

    y = _mm_hi(h, fw2_ref[...]) + fb2_ref[...]
    y = bn(y, g3_ref[...], be3_ref[...])

    # Pack both heads into one lane-dense (Bp, >=128) slab, single store.
    parts = [y, h]
    pad = heads_ref.shape[1] - (TAGS + H)
    if pad:
        parts.append(jnp.zeros((Bp, pad), jnp.float32))
    heads_ref[...] = jnp.concatenate(parts, axis=-1)


# ---------------------------------------------------------------------------
# Wrapper
# ---------------------------------------------------------------------------
def lstm_module_forward(x, p, hidden_dim, tagset_size):
    T, B, D = x.shape
    H = hidden_dim
    Bp = ((B + 15) // 16) * 16       # bf16 packs 16 sublanes per vreg
    x_p = jnp.pad(x, ((0, 0), (0, Bp - B), (0, 0))) if Bp != B else x

    # Wavefront weight packing (once, at trace time), stored bf16:
    #   wa = [whh0 | wih1] : h0[t-1] feeds layer-0 recurrence AND layer-1 input
    #   wb = [whh1 | wih2] : h1[t-2] feeds layer-1 recurrence AND layer-2 input
    #   wc =  whh2         : h2[t-3] feeds layer-2 recurrence
    wa = jnp.concatenate([p["whh0"], p["wih1"]], axis=1).astype(jnp.bfloat16)
    wb = jnp.concatenate([p["whh1"], p["wih2"]], axis=1).astype(jnp.bfloat16)
    wc = p["whh2"].astype(jnp.bfloat16)

    head_w = max(128, ((tagset_size + H + 127) // 128) * 128)

    def full(shape):
        nd = len(shape)
        return pl.BlockSpec(shape, lambda i, _n=nd: (0,) * _n)

    out_slab, heads = pl.pallas_call(
        functools.partial(_lstm_fused_kernel, B),
        out_shape=(jax.ShapeDtypeStruct((Bp, T * H), jnp.float32),
                   jax.ShapeDtypeStruct((Bp, head_w), jnp.float32)),
        grid_spec=pltpu.PrefetchScalarGridSpec(
            num_scalar_prefetch=0,
            grid=(1,),                       # whole forward in one grid step
            in_specs=[full((T, Bp, D)),
                      full((D, 4 * H)), full((1, 4 * H)),
                      full((H, 8 * H)), full((1, 4 * H)),
                      full((H, 8 * H)), full((1, 4 * H)),
                      full((H, 4 * H)),
                      full((1, H)), full((1, H)), full((H, H)), full((1, H)),
                      full((1, H)), full((1, H)),
                      full((H, tagset_size)), full((1, tagset_size)),
                      full((1, tagset_size)), full((1, tagset_size))],
            out_specs=(full((Bp, T * H)), full((Bp, head_w))),
            scratch_shapes=[pltpu.VMEM((T, Bp, 4 * H), jnp.float32)]),
        compiler_params=pltpu.CompilerParams(
            dimension_semantics=("arbitrary",),
            vmem_limit_bytes=32 * 1024 * 1024),
    )(x_p,
      p["wih0"], p["b0"],
      wa, p["b1"],
      wb, p["b2"],
      wc,
      p["g1"], p["be1"], p["w1"], p["bb1"],
      p["g2"], p["be2"], p["w2"], p["bb2"],
      p["g3"], p["be3"])

    # Layout plumbing in the wrapper (lane-dense slabs -> module shapes).
    lstm_out = jnp.transpose(out_slab.reshape(Bp, T, H), (1, 0, 2))[:, :B, :]
    out_train = heads[:B, :tagset_size]
    out_test = heads[:B, tagset_size:tagset_size + H]
    return out_train, out_test, lstm_out


# ---------------------------------------------------------------------------
# Deterministic parameter construction (shapes follow nn.LSTM(D,H,3),
# nn.Linear(H,H), nn.Linear(H,tagset), BatchNorm1d affine params).
# ---------------------------------------------------------------------------
def make_params(key, source_dim, hidden_dim, tagset_size):
    ks = iter(jax.random.split(key, 40))

    def u(shape, scale):
        return jax.random.uniform(next(ks), shape, jnp.float32, -scale, scale)

    k = 1.0 / np.sqrt(hidden_dim)
    p = {}
    in_dims = [source_dim, hidden_dim, hidden_dim]
    for l in range(3):
        p[f"wih{l}"] = u((in_dims[l], 4 * hidden_dim), k)
        p[f"whh{l}"] = u((hidden_dim, 4 * hidden_dim), k)
        p[f"b{l}"] = u((1, 4 * hidden_dim), k) + u((1, 4 * hidden_dim), k)

    p["w1"] = u((hidden_dim, hidden_dim), k)
    p["bb1"] = u((1, hidden_dim), k)
    p["w2"] = u((hidden_dim, tagset_size), k)
    p["bb2"] = u((1, tagset_size), k)

    p["g1"] = 1.0 + 0.1 * u((1, hidden_dim), 1.0)
    p["be1"] = 0.1 * u((1, hidden_dim), 1.0)
    p["g2"] = 1.0 + 0.1 * u((1, hidden_dim), 1.0)
    p["be2"] = 0.1 * u((1, hidden_dim), 1.0)
    p["g3"] = 1.0 + 0.1 * u((1, tagset_size), 1.0)
    p["be3"] = 0.1 * u((1, tagset_size), 1.0)
    return p


# Pure-JAX reference.  bf16_recurrence=False -> exact f32 module semantics;
# bf16_recurrence=True -> mirrors the kernel's bf16 MXU rounding on the
# recurrent/h-input matmuls (tight implementation check).
def ref_forward(x, p, hidden_dim, tagset_size, bf16_recurrence=False):
    T, B, D = x.shape
    H = hidden_dim

    def rdot(a, w):
        if not bf16_recurrence:
            return _mm_hi(a, w)
        return jnp.dot(a.astype(jnp.bfloat16), w.astype(jnp.bfloat16),
                       preferred_element_type=jnp.float32)

    h = [jnp.zeros((B, H), jnp.float32) for _ in range(3)]
    c = [jnp.zeros((B, H), jnp.float32) for _ in range(3)]
    outs = []
    for t in range(T):
        inp = x[t]
        for l in range(3):
            if l == 0:
                gates = _mm_hi(inp, p["wih0"]) + rdot(h[0], p["whh0"]) + p["b0"]
            else:
                gates = (rdot(inp, p[f"wih{l}"]) + rdot(h[l], p[f"whh{l}"])
                         + p[f"b{l}"])
            i_g = jax.nn.sigmoid(gates[:, 0 * H:1 * H])
            f_g = jax.nn.sigmoid(gates[:, 1 * H:2 * H])
            g_g = jnp.tanh(gates[:, 2 * H:3 * H])
            o_g = jax.nn.sigmoid(gates[:, 3 * H:4 * H])
            c[l] = f_g * c[l] + i_g * g_g
            h[l] = o_g * jnp.tanh(c[l])
            inp = h[l]
        outs.append(inp)
    lstm_out = jnp.stack(outs, 0)
    mean_h = jnp.mean(lstm_out, 0)

    def bn(v, g, b):
        mu = jnp.mean(v, 0, keepdims=True)
        var = jnp.mean((v - mu) ** 2, 0, keepdims=True)
        return (v - mu) / jnp.sqrt(var + 1e-5) * g + b

    t1 = bn(mean_h, p["g1"], p["be1"])
    t1 = _mm_hi(t1, p["w1"]) + p["bb1"]
    t1 = bn(t1, p["g2"], p["be2"])
    t1 = jnp.where(t1 > 0, t1, 0.2 * t1)
    t2 = _mm_hi(t1, p["w2"]) + p["bb2"]
    t2 = bn(t2, p["g3"], p["be3"])
    return t2, t1, lstm_out


if __name__ == "__main__":
    T, B = 8, 4          # seq length (lens), batch
    SOURCE_DIM = 32      # opt.hg_dim
    HIDDEN = 32          # hidden_dim
    TAGSET = 16          # tagset_size

    key = jax.random.PRNGKey(0)
    kx, kp = jax.random.split(key)
    x = jax.random.normal(kx, (T, B, SOURCE_DIM), jnp.float32)
    params = make_params(kp, SOURCE_DIM, HIDDEN, TAGSET)

    out_train, out_test, lstm_out = lstm_module_forward(x, params, HIDDEN, TAGSET)
    jax.block_until_ready((out_train, out_test, lstm_out))

    assert out_train.shape == (B, TAGSET)
    assert out_test.shape == (B, HIDDEN)
    assert lstm_out.shape == (T, B, HIDDEN)

    # (1) Module-semantics check vs the exact-f32 reference.  The kernel's
    #     bf16 MXU recurrence keeps lstm_out within a few 1e-3 of it.
    _, _, r_out_f32 = ref_forward(x, params, HIDDEN, TAGSET)
    np.testing.assert_allclose(np.asarray(lstm_out), np.asarray(r_out_f32),
                               rtol=3e-2, atol=3e-2)

    # (2) Matched-precision check (reference repeats the kernel's bf16
    #     recurrent-matmul rounding): tight tolerance on every output.  The
    #     head outputs are not compared against the pure-f32 reference because
    #     BatchNorm statistics over only B=4 rows amplify bf16 rounding noise.
    m_train, m_test, m_out = ref_forward(x, params, HIDDEN, TAGSET,
                                         bf16_recurrence=True)
    np.testing.assert_allclose(np.asarray(lstm_out), np.asarray(m_out),
                               rtol=1e-3, atol=1e-3)
    np.testing.assert_allclose(np.asarray(out_test), np.asarray(m_test),
                               rtol=5e-3, atol=5e-3)
    np.testing.assert_allclose(np.asarray(out_train), np.asarray(m_train),
                               rtol=5e-3, atol=5e-3)

    print("KERNEL_OK")
</pallas_src>

<mosaic_0001>
module attributes {stable_mosaic.version = 11 : i64} {
  func.func @_lstm_fused_kernel(%arg0: i32, %arg1: memref<8x16x32xf32, #tpu.memory_space<vmem>>, %arg2: memref<32x128xf32, #tpu.memory_space<vmem>>, %arg3: memref<1x128xf32, #tpu.memory_space<vmem>>, %arg4: memref<32x256xbf16, #tpu.memory_space<vmem>>, %arg5: memref<1x128xf32, #tpu.memory_space<vmem>>, %arg6: memref<32x256xbf16, #tpu.memory_space<vmem>>, %arg7: memref<1x128xf32, #tpu.memory_space<vmem>>, %arg8: memref<32x128xbf16, #tpu.memory_space<vmem>>, %arg9: memref<1x32xf32, #tpu.memory_space<vmem>>, %arg10: memref<1x32xf32, #tpu.memory_space<vmem>>, %arg11: memref<32x32xf32, #tpu.memory_space<vmem>>, %arg12: memref<1x32xf32, #tpu.memory_space<vmem>>, %arg13: memref<1x32xf32, #tpu.memory_space<vmem>>, %arg14: memref<1x32xf32, #tpu.memory_space<vmem>>, %arg15: memref<32x16xf32, #tpu.memory_space<vmem>>, %arg16: memref<1x16xf32, #tpu.memory_space<vmem>>, %arg17: memref<1x16xf32, #tpu.memory_space<vmem>>, %arg18: memref<1x16xf32, #tpu.memory_space<vmem>>, %arg19: memref<16x256xf32, #tpu.memory_space<vmem>>, %arg20: memref<16x128xf32, #tpu.memory_space<vmem>>, %arg21: memref<8x16x128xf32, #tpu.memory_space<vmem>>) attributes {dimension_semantics = [#tpu.dimension_semantics<arbitrary>], iteration_bounds = array<i64: 1>, scalar_prefetch = 0 : i64, scratch_operands = 1 : i64, tpu.core_type = #tpu.core_type<tc>, window_params = [{pipeline_mode = #tpu.pipeline_mode<synchronous>, transform_indices = @transform_0, window_bounds = array<i64: 8, 16, 32>}, {pipeline_mode = #tpu.pipeline_mode<synchronous>, transform_indices = @transform_1, window_bounds = array<i64: 32, 128>}, {pipeline_mode = #tpu.pipeline_mode<synchronous>, transform_indices = @transform_2, window_bounds = array<i64: 1, 128>}, {pipeline_mode = #tpu.pipeline_mode<synchronous>, transform_indices = @transform_3, window_bounds = array<i64: 32, 256>}, {pipeline_mode = #tpu.pipeline_mode<synchronous>, transform_indices = @transform_4, window_bounds = array<i64: 1, 128>}, {pipeline_mode = #tpu.pipeline_mode<synchronous>, transform_indices = @transform_5, window_bounds = array<i64: 32, 256>}, {pipeline_mode = #tpu.pipeline_mode<synchronous>, transform_indices = @transform_6, window_bounds = array<i64: 1, 128>}, {pipeline_mode = #tpu.pipeline_mode<synchronous>, transform_indices = @transform_7, window_bounds = array<i64: 32, 128>}, {pipeline_mode = #tpu.pipeline_mode<synchronous>, transform_indices = @transform_8, window_bounds = array<i64: 1, 32>}, {pipeline_mode = #tpu.pipeline_mode<synchronous>, transform_indices = @transform_9, window_bounds = array<i64: 1, 32>}, {pipeline_mode = #tpu.pipeline_mode<synchronous>, transform_indices = @transform_10, window_bounds = array<i64: 32, 32>}, {pipeline_mode = #tpu.pipeline_mode<synchronous>, transform_indices = @transform_11, window_bounds = array<i64: 1, 32>}, {pipeline_mode = #tpu.pipeline_mode<synchronous>, transform_indices = @transform_12, window_bounds = array<i64: 1, 32>}, {pipeline_mode = #tpu.pipeline_mode<synchronous>, transform_indices = @transform_13, window_bounds = array<i64: 1, 32>}, {pipeline_mode = #tpu.pipeline_mode<synchronous>, transform_indices = @transform_14, window_bounds = array<i64: 32, 16>}, {pipeline_mode = #tpu.pipeline_mode<synchronous>, transform_indices = @transform_15, window_bounds = array<i64: 1, 16>}, {pipeline_mode = #tpu.pipeline_mode<synchronous>, transform_indices = @transform_16, window_bounds = array<i64: 1, 16>}, {pipeline_mode = #tpu.pipeline_mode<synchronous>, transform_indices = @transform_17, window_bounds = array<i64: 1, 16>}, {pipeline_mode = #tpu.pipeline_mode<synchronous>, transform_indices = @transform_18, window_bounds = array<i64: 16, 256>}, {pipeline_mode = #tpu.pipeline_mode<synchronous>, transform_indices = @transform_19, window_bounds = array<i64: 16, 128>}]} {
    %c0 = arith.constant 0 : index
    %c0_0 = arith.constant 0 : index
    %c0_1 = arith.constant 0 : index
    %0 = vector.load %arg1[%c0, %c0_0, %c0_1] : memref<8x16x32xf32, #tpu.memory_space<vmem>>, vector<8x16x32xf32>
    %1 = vector.shape_cast %0 : vector<8x16x32xf32> to vector<128x32xf32>
    %c0_2 = arith.constant 0 : index
    %c0_3 = arith.constant 0 : index
    %2 = vector.load %arg2[%c0_2, %c0_3] : memref<32x128xf32, #tpu.memory_space<vmem>>, vector<32x128xf32>
    %cst = arith.constant dense<0.000000e+00> : vector<128x128xf32>
    %3 = tpu.matmul %1, %2, %cst {dimension_numbers = #tpu.dot_dimension_numbers<[1], [0], [0], [1], [0, 0, 1, 1], [], []>, precision = #tpu.contract_precision<fp32>} : vector<128x32xf32>, vector<32x128xf32>, vector<128x128xf32> -> vector<128x128xf32>
    %c0_4 = arith.constant 0 : index
    %c0_5 = arith.constant 0 : index
    %4 = vector.load %arg3[%c0_4, %c0_5] : memref<1x128xf32, #tpu.memory_space<vmem>>, vector<1x128xf32>
    %5 = vector.broadcast %4 : vector<1x128xf32> to vector<128x128xf32>
    %6 = arith.addf %3, %5 : vector<128x128xf32>
    %7 = vector.shape_cast %6 : vector<128x128xf32> to vector<8x16x128xf32>
    %c0_6 = arith.constant 0 : index
    %c0_7 = arith.constant 0 : index
    %c0_8 = arith.constant 0 : index
    %8 = vector.load %arg21[%c0_6, %c0_7, %c0_8] : memref<8x16x128xf32, #tpu.memory_space<vmem>>, vector<8x16x128xf32>
    tpu.vector_store %arg21[%c0_6, %c0_7, %c0_8], %7 {strides = array<i32>} : memref<8x16x128xf32, #tpu.memory_space<vmem>>, vector<8x16x128xf32>,
    %c0_9 = arith.constant 0 : index
    %c0_10 = arith.constant 0 : index
    %9 = vector.load %arg5[%c0_9, %c0_10] : memref<1x128xf32, #tpu.memory_space<vmem>>, vector<1x128xf32>
    %c0_11 = arith.constant 0 : index
    %c0_12 = arith.constant 0 : index
    %10 = vector.load %arg7[%c0_11, %c0_12] : memref<1x128xf32, #tpu.memory_space<vmem>>, vector<1x128xf32>
    %cst_13 = arith.constant 0.000000e+00 : f32
    %11 = vector.broadcast %cst_13 : f32 to vector<16x32xf32>
    %c0_14 = arith.constant 0 : index
    %c0_15 = arith.constant 0 : index
    %12 = vector.load %arg4[%c0_14, %c0_15] : memref<32x256xbf16, #tpu.memory_space<vmem>>, vector<32x256xbf16>
    %13 = arith.truncf %11 : vector<16x32xf32> to vector<16x32xbf16>
    %cst_16 = arith.constant dense<0.000000e+00> : vector<16x256xf32>
    %14 = tpu.matmul %13, %12, %cst_16 {dimension_numbers = #tpu.dot_dimension_numbers<[1], [0], [0], [1], [0, 0, 1, 1], [], []>} : vector<16x32xbf16>, vector<32x256xbf16>, vector<16x256xf32> -> vector<16x256xf32>
    %c0_17 = arith.constant 0 : index
    %c0_18 = arith.constant 0 : index
    %c0_19 = arith.constant 0 : index
    %15 = vector.load %arg21[%c0_17, %c0_18, %c0_19] : memref<8x16x128xf32, #tpu.memory_space<vmem>>, vector<1x16x128xf32>
    %16 = vector.shape_cast %15 : vector<1x16x128xf32> to vector<16x128xf32>
    %17 = vector.extract_strided_slice %14 {offsets = [0, 0], sizes = [16, 128], strides = [1, 1]} : vector<16x256xf32> to vector<16x128xf32>
    %18 = arith.addf %16, %17 : vector<16x128xf32>
    %cst_20 = arith.constant 5.000000e-01 : f32
    %19 = vector.broadcast %cst_20 : f32 to vector<16x128xf32>
    %20 = arith.mulf %19, %18 : vector<16x128xf32>
    %21 = math.tanh %20 : vector<16x128xf32>
    %cst_21 = arith.constant 1.000000e+00 : f32
    %22 = vector.broadcast %cst_21 : f32 to vector<16x128xf32>
    %23 = arith.addf %21, %22 : vector<16x128xf32>
    %cst_22 = arith.constant 5.000000e-01 : f32
    %24 = vector.broadcast %cst_22 : f32 to vector<16x128xf32>
    %25 = arith.mulf %24, %23 : vector<16x128xf32>
    %26 = math.tanh %18 : vector<16x128xf32>
    %27 = vector.extract_strided_slice %25 {offsets = [0, 0], sizes = [16, 32], strides = [1, 1]} : vector<16x128xf32> to vector<16x32xf32>
    %28 = vector.extract_strided_slice %25 {offsets = [0, 32], sizes = [16, 32], strides = [1, 1]} : vector<16x128xf32> to vector<16x32xf32>
    %29 = vector.extract_strided_slice %26 {offsets = [0, 64], sizes = [16, 32], strides = [1, 1]} : vector<16x128xf32> to vector<16x32xf32>
    %30 = vector.extract_strided_slice %25 {offsets = [0, 96], sizes = [16, 32], strides = [1, 1]} : vector<16x128xf32> to vector<16x32xf32>
    %31 = arith.mulf %28, %11 : vector<16x32xf32>
    %32 = arith.mulf %27, %29 : vector<16x32xf32>
    %33 = arith.addf %31, %32 : vector<16x32xf32>
    %34 = math.tanh %33 : vector<16x32xf32>
    %35 = arith.mulf %30, %34 : vector<16x32xf32>
    %c0_23 = arith.constant 0 : index
    %c0_24 = arith.constant 0 : index
    %36 = vector.load %arg4[%c0_23, %c0_24] : memref<32x256xbf16, #tpu.memory_space<vmem>>, vector<32x256xbf16>
    %37 = arith.truncf %35 : vector<16x32xf32> to vector<16x32xbf16>
    %cst_25 = arith.constant dense<0.000000e+00> : vector<16x256xf32>
    %38 = tpu.matmul %37, %36, %cst_25 {dimension_numbers = #tpu.dot_dimension_numbers<[1], [0], [0], [1], [0, 0, 1, 1], [], []>} : vector<16x32xbf16>, vector<32x256xbf16>, vector<16x256xf32> -> vector<16x256xf32>
    %c0_26 = arith.constant 0 : index
    %c0_27 = arith.constant 0 : index
    %39 = vector.load %arg6[%c0_26, %c0_27] : memref<32x256xbf16, #tpu.memory_space<vmem>>, vector<32x256xbf16>
    %40 = arith.truncf %11 : vector<16x32xf32> to vector<16x32xbf16>
    %cst_28 = arith.constant dense<0.000000e+00> : vector<16x256xf32>
    %41 = tpu.matmul %40, %39, %cst_28 {dimension_numbers = #tpu.dot_dimension_numbers<[1], [0], [0], [1], [0, 0, 1, 1], [], []>} : vector<16x32xbf16>, vector<32x256xbf16>, vector<16x256xf32> -> vector<16x256xf32>
    %c1 = arith.constant 1 : index
    %c0_29 = arith.constant 0 : index
    %c0_30 = arith.constant 0 : index
    %42 = vector.load %arg21[%c1, %c0_29, %c0_30] : memref<8x16x128xf32, #tpu.memory_space<vmem>>, vector<1x16x128xf32>
    %43 = vector.shape_cast %42 : vector<1x16x128xf32> to vector<16x128xf32>
    %44 = vector.extract_strided_slice %38 {offsets = [0, 0], sizes = [16, 128], strides = [1, 1]} : vector<16x256xf32> to vector<16x128xf32>
    %45 = arith.addf %43, %44 : vector<16x128xf32>
    %cst_31 = arith.constant 5.000000e-01 : f32
    %46 = vector.broadcast %cst_31 : f32 to vector<16x128xf32>
    %47 = arith.mulf %46, %45 : vector<16x128xf32>
    %48 = math.tanh %47 : vector<16x128xf32>
    %cst_32 = arith.constant 1.000000e+00 : f32
    %49 = vector.broadcast %cst_32 : f32 to vector<16x128xf32>
    %50 = arith.addf %48, %49 : vector<16x128xf32>
    %cst_33 = arith.constant 5.000000e-01 : f32
    %51 = vector.broadcast %cst_33 : f32 to vector<16x128xf32>
    %52 = arith.mulf %51, %50 : vector<16x128xf32>
    %53 = math.tanh %45 : vector<16x128xf32>
    %54 = vector.extract_strided_slice %52 {offsets = [0, 0], sizes = [16, 32], strides = [1, 1]} : vector<16x128xf32> to vector<16x32xf32>
    %55 = vector.extract_strided_slice %52 {offsets = [0, 32], sizes = [16, 32], strides = [1, 1]} : vector<16x128xf32> to vector<16x32xf32>
    %56 = vector.extract_strided_slice %53 {offsets = [0, 64], sizes = [16, 32], strides = [1, 1]} : vector<16x128xf32> to vector<16x32xf32>
    %57 = vector.extract_strided_slice %52 {offsets = [0, 96], sizes = [16, 32], strides = [1, 1]} : vector<16x128xf32> to vector<16x32xf32>
    %58 = arith.mulf %55, %33 : vector<16x32xf32>
    %59 = arith.mulf %54, %56 : vector<16x32xf32>
    %60 = arith.addf %58, %59 : vector<16x32xf32>
    %61 = math.tanh %60 : vector<16x32xf32>
    %62 = arith.mulf %57, %61 : vector<16x32xf32>
    %63 = vector.extract_strided_slice %38 {offsets = [0, 128], sizes = [16, 128], strides = [1, 1]} : vector<16x256xf32> to vector<16x128xf32>
    %64 = vector.extract_strided_slice %41 {offsets = [0, 0], sizes = [16, 128], strides = [1, 1]} : vector<16x256xf32> to vector<16x128xf32>
    %65 = arith.addf %63, %64 : vector<16x128xf32>
    %66 = vector.broadcast %9 : vector<1x128xf32> to vector<16x128xf32>
    %67 = arith.addf %65, %66 : vector<16x128xf32>
    %cst_34 = arith.constant 5.000000e-01 : f32
    %68 = vector.broadcast %cst_34 : f32 to vector<16x128xf32>
    %69 = arith.mulf %68, %67 : vector<16x128xf32>
    %70 = math.tanh %69 : vector<16x128xf32>
    %cst_35 = arith.constant 1.000000e+00 : f32
    %71 = vector.broadcast %cst_35 : f32 to vector<16x128xf32>
    %72 = arith.addf %70, %71 : vector<16x128xf32>
    %cst_36 = arith.constant 5.000000e-01 : f32
    %73 = vector.broadcast %cst_36 : f32 to vector<16x128xf32>
    %74 = arith.mulf %73, %72 : vector<16x128xf32>
    %75 = math.tanh %67 : vector<16x128xf32>
    %76 = vector.extract_strided_slice %74 {offsets = [0, 0], sizes = [16, 32], strides = [1, 1]} : vector<16x128xf32> to vector<16x32xf32>
    %77 = vector.extract_strided_slice %74 {offsets = [0, 32], sizes = [16, 32], strides = [1, 1]} : vector<16x128xf32> to vector<16x32xf32>
    %78 = vector.extract_strided_slice %75 {offsets = [0, 64], sizes = [16, 32], strides = [1, 1]} : vector<16x128xf32> to vector<16x32xf32>
    %79 = vector.extract_strided_slice %74 {offsets = [0, 96], sizes = [16, 32], strides = [1, 1]} : vector<16x128xf32> to vector<16x32xf32>
    %80 = arith.mulf %77, %11 : vector<16x32xf32>
    %81 = arith.mulf %76, %78 : vector<16x32xf32>
    %82 = arith.addf %80, %81 : vector<16x32xf32>
    %83 = math.tanh %82 : vector<16x32xf32>
    %84 = arith.mulf %79, %83 : vector<16x32xf32>
    %c0_37 = arith.constant 0 : index
    %c0_38 = arith.constant 0 : index
    %85 = vector.load %arg4[%c0_37, %c0_38] : memref<32x256xbf16, #tpu.memory_space<vmem>>, vector<32x256xbf16>
    %86 = arith.truncf %62 : vector<16x32xf32> to vector<16x32xbf16>
    %cst_39 = arith.constant dense<0.000000e+00> : vector<16x256xf32>
    %87 = tpu.matmul %86, %85, %cst_39 {dimension_numbers = #tpu.dot_dimension_numbers<[1], [0], [0], [1], [0, 0, 1, 1], [], []>} : vector<16x32xbf16>, vector<32x256xbf16>, vector<16x256xf32> -> vector<16x256xf32>
    %c0_40 = arith.constant 0 : index
    %c0_41 = arith.constant 0 : index
    %88 = vector.load %arg6[%c0_40, %c0_41] : memref<32x256xbf16, #tpu.memory_space<vmem>>, vector<32x256xbf16>
    %89 = arith.truncf %84 : vector<16x32xf32> to vector<16x32xbf16>
    %cst_42 = arith.constant dense<0.000000e+00> : vector<16x256xf32>
    %90 = tpu.matmul %89, %88, %cst_42 {dimension_numbers = #tpu.dot_dimension_numbers<[1], [0], [0], [1], [0, 0, 1, 1], [], []>} : vector<16x32xbf16>, vector<32x256xbf16>, vector<16x256xf32> -> vector<16x256xf32>
    %c0_43 = arith.constant 0 : index
    %c0_44 = arith.constant 0 : index
    %91 = vector.load %arg8[%c0_43, %c0_44] : memref<32x128xbf16, #tpu.memory_space<vmem>>, vector<32x128xbf16>
    %92 = arith.truncf %11 : vector<16x32xf32> to vector<16x32xbf16>
    %cst_45 = arith.constant dense<0.000000e+00> : vector<16x128xf32>
    %93 = tpu.matmul %92, %91, %cst_45 {dimension_numbers = #tpu.dot_dimension_numbers<[1], [0], [0], [1], [0, 0, 1, 1], [], []>} : vector<16x32xbf16>, vector<32x128xbf16>, vector<16x128xf32> -> vector<16x128xf32>
    %c2 = arith.constant 2 : index
    %c0_46 = arith.constant 0 : index
    %c0_47 = arith.constant 0 : index
    %94 = vector.load %arg21[%c2, %c0_46, %c0_47] : memref<8x16x128xf32, #tpu.memory_space<vmem>>, vector<1x16x128xf32>
    %95 = vector.shape_cast %94 : vector<1x16x128xf32> to vector<16x128xf32>
    %96 = vector.extract_strided_slice %87 {offsets = [0, 0], sizes = [16, 128], strides = [1, 1]} : vector<16x256xf32> to vector<16x128xf32>
    %97 = arith.addf %95, %96 : vector<16x128xf32>
    %cst_48 = arith.constant 5.000000e-01 : f32
    %98 = vector.broadcast %cst_48 : f32 to vector<16x128xf32>
    %99 = arith.mulf %98, %97 : vector<16x128xf32>
    %100 = math.tanh %99 : vector<16x128xf32>
    %cst_49 = arith.constant 1.000000e+00 : f32
    %101 = vector.broadcast %cst_49 : f32 to vector<16x128xf32>
    %102 = arith.addf %100, %101 : vector<16x128xf32>
    %cst_50 = arith.constant 5.000000e-01 : f32
    %103 = vector.broadcast %cst_50 : f32 to vector<16x128xf32>
    %104 = arith.mulf %103, %102 : vector<16x128xf32>
    %105 = math.tanh %97 : vector<16x128xf32>
    %106 = vector.extract_strided_slice %104 {offsets = [0, 0], sizes = [16, 32], strides = [1, 1]} : vector<16x128xf32> to vector<16x32xf32>
    %107 = vector.extract_strided_slice %104 {offsets = [0, 32], sizes = [16, 32], strides = [1, 1]} : vector<16x128xf32> to vector<16x32xf32>
    %108 = vector.extract_strided_slice %105 {offsets = [0, 64], sizes = [16, 32], strides = [1, 1]} : vector<16x128xf32> to vector<16x32xf32>
    %109 = vector.extract_strided_slice %104 {offsets = [0, 96], sizes = [16, 32], strides = [1, 1]} : vector<16x128xf32> to vector<16x32xf32>
    %110 = arith.mulf %107, %60 : vector<16x32xf32>
    %111 = arith.mulf %106, %108 : vector<16x32xf32>
    %112 = arith.addf %110, %111 : vector<16x32xf32>
    %113 = math.tanh %112 : vector<16x32xf32>
    %114 = arith.mulf %109, %113 : vector<16x32xf32>
    %115 = vector.extract_strided_slice %87 {offsets = [0, 128], sizes = [16, 128], strides = [1, 1]} : vector<16x256xf32> to vector<16x128xf32>
    %116 = vector.extract_strided_slice %90 {offsets = [0, 0], sizes = [16, 128], strides = [1, 1]} : vector<16x256xf32> to vector<16x128xf32>
    %117 = arith.addf %115, %116 : vector<16x128xf32>
    %118 = vector.broadcast %9 : vector<1x128xf32> to vector<16x128xf32>
    %119 = arith.addf %117, %118 : vector<16x128xf32>
    %cst_51 = arith.constant 5.000000e-01 : f32
    %120 = vector.broadcast %cst_51 : f32 to vector<16x128xf32>
    %121 = arith.mulf %120, %119 : vector<16x128xf32>
    %122 = math.tanh %121 : vector<16x128xf32>
    %cst_52 = arith.constant 1.000000e+00 : f32
    %123 = vector.broadcast %cst_52 : f32 to vector<16x128xf32>
    %124 = arith.addf %122, %123 : vector<16x128xf32>
    %cst_53 = arith.constant 5.000000e-01 : f32
    %125 = vector.broadcast %cst_53 : f32 to vector<16x128xf32>
    %126 = arith.mulf %125, %124 : vector<16x128xf32>
    %127 = math.tanh %119 : vector<16x128xf32>
    %128 = vector.extract_strided_slice %126 {offsets = [0, 0], sizes = [16, 32], strides = [1, 1]} : vector<16x128xf32> to vector<16x32xf32>
    %129 = vector.extract_strided_slice %126 {offsets = [0, 32], sizes = [16, 32], strides = [1, 1]} : vector<16x128xf32> to vector<16x32xf32>
    %130 = vector.extract_strided_slice %127 {offsets = [0, 64], sizes = [16, 32], strides = [1, 1]} : vector<16x128xf32> to vector<16x32xf32>
    %131 = vector.extract_strided_slice %126 {offsets = [0, 96], sizes = [16, 32], strides = [1, 1]} : vector<16x128xf32> to vector<16x32xf32>
    %132 = arith.mulf %129, %82 : vector<16x32xf32>
    %133 = arith.mulf %128, %130 : vector<16x32xf32>
    %134 = arith.addf %132, %133 : vector<16x32xf32>
    %135 = math.tanh %134 : vector<16x32xf32>
    %136 = arith.mulf %131, %135 : vector<16x32xf32>
    %137 = vector.extract_strided_slice %90 {offsets = [0, 128], sizes = [16, 128], strides = [1, 1]} : vector<16x256xf32> to vector<16x128xf32>
    %138 = arith.addf %137, %93 : vector<16x128xf32>
    %139 = vector.broadcast %10 : vector<1x128xf32> to vector<16x128xf32>
    %140 = arith.addf %138, %139 : vector<16x128xf32>
    %cst_54 = arith.constant 5.000000e-01 : f32
    %141 = vector.broadcast %cst_54 : f32 to vector<16x128xf32>
    %142 = arith.mulf %141, %140 : vector<16x128xf32>
    %143 = math.tanh %142 : vector<16x128xf32>
    %cst_55 = arith.constant 1.000000e+00 : f32
    %144 = vector.broadcast %cst_55 : f32 to vector<16x128xf32>
    %145 = arith.addf %143, %144 : vector<16x128xf32>
    %cst_56 = arith.constant 5.000000e-01 : f32
    %146 = vector.broadcast %cst_56 : f32 to vector<16x128xf32>
    %147 = arith.mulf %146, %145 : vector<16x128xf32>
    %148 = math.tanh %140 : vector<16x128xf32>
    %149 = vector.extract_strided_slice %147 {offsets = [0, 0], sizes = [16, 32], strides = [1, 1]} : vector<16x128xf32> to vector<16x32xf32>
    %150 = vector.extract_strided_slice %147 {offsets = [0, 32], sizes = [16, 32], strides = [1, 1]} : vector<16x128xf32> to vector<16x32xf32>
    %151 = vector.extract_strided_slice %148 {offsets = [0, 64], sizes = [16, 32], strides = [1, 1]} : vector<16x128xf32> to vector<16x32xf32>
    %152 = vector.extract_strided_slice %147 {offsets = [0, 96], sizes = [16, 32], strides = [1, 1]} : vector<16x128xf32> to vector<16x32xf32>
    %153 = arith.mulf %150, %11 : vector<16x32xf32>
    %154 = arith.mulf %149, %151 : vector<16x32xf32>
    %155 = arith.addf %153, %154 : vector<16x32xf32>
    %156 = math.tanh %155 : vector<16x32xf32>
    %157 = arith.mulf %152, %156 : vector<16x32xf32>
    %158 = arith.addf %11, %157 : vector<16x32xf32>
    %c0_57 = arith.constant 0 : index
    %c0_58 = arith.constant 0 : index
    %159 = vector.load %arg4[%c0_57, %c0_58] : memref<32x256xbf16, #tpu.memory_space<vmem>>, vector<32x256xbf16>
    %160 = arith.truncf %114 : vector<16x32xf32> to vector<16x32xbf16>
    %cst_59 = arith.constant dense<0.000000e+00> : vector<16x256xf32>
    %161 = tpu.matmul %160, %159, %cst_59 {dimension_numbers = #tpu.dot_dimension_numbers<[1], [0], [0], [1], [0, 0, 1, 1], [], []>} : vector<16x32xbf16>, vector<32x256xbf16>, vector<16x256xf32> -> vector<16x256xf32>
    %c0_60 = arith.constant 0 : index
    %c0_61 = arith.constant 0 : index
    %162 = vector.load %arg6[%c0_60, %c0_61] : memref<32x256xbf16, #tpu.memory_space<vmem>>, vector<32x256xbf16>
    %163 = arith.truncf %136 : vector<16x32xf32> to vector<16x32xbf16>
    %cst_62 = arith.constant dense<0.000000e+00> : vector<16x256xf32>
    %164 = tpu.matmul %163, %162, %cst_62 {dimension_numbers = #tpu.dot_dimension_numbers<[1], [0], [0], [1], [0, 0, 1, 1], [], []>} : vector<16x32xbf16>, vector<32x256xbf16>, vector<16x256xf32> -> vector<16x256xf32>
    %c0_63 = arith.constant 0 : index
    %c0_64 = arith.constant 0 : index
    %165 = vector.load %arg8[%c0_63, %c0_64] : memref<32x128xbf16, #tpu.memory_space<vmem>>, vector<32x128xbf16>
    %166 = arith.truncf %157 : vector<16x32xf32> to vector<16x32xbf16>
    %cst_65 = arith.constant dense<0.000000e+00> : vector<16x128xf32>
    %167 = tpu.matmul %166, %165, %cst_65 {dimension_numbers = #tpu.dot_dimension_numbers<[1], [0], [0], [1], [0, 0, 1, 1], [], []>} : vector<16x32xbf16>, vector<32x128xbf16>, vector<16x128xf32> -> vector<16x128xf32>
    %c3 = arith.constant 3 : index
    %c0_66 = arith.constant 0 : index
    %c0_67 = arith.constant 0 : index
    %168 = vector.load %arg21[%c3, %c0_66, %c0_67] : memref<8x16x128xf32, #tpu.memory_space<vmem>>, vector<1x16x128xf32>
    %169 = vector.shape_cast %168 : vector<1x16x128xf32> to vector<16x128xf32>
    %170 = vector.extract_strided_slice %161 {offsets = [0, 0], sizes = [16, 128], strides = [1, 1]} : vector<16x256xf32> to vector<16x128xf32>
    %171 = arith.addf %169, %170 : vector<16x128xf32>
    %cst_68 = arith.constant 5.000000e-01 : f32
    %172 = vector.broadcast %cst_68 : f32 to vector<16x128xf32>
    %173 = arith.mulf %172, %171 : vector<16x128xf32>
    %174 = math.tanh %173 : vector<16x128xf32>
    %cst_69 = arith.constant 1.000000e+00 : f32
    %175 = vector.broadcast %cst_69 : f32 to vector<16x128xf32>
    %176 = arith.addf %174, %175 : vector<16x128xf32>
    %cst_70 = arith.constant 5.000000e-01 : f32
    %177 = vector.broadcast %cst_70 : f32 to vector<16x128xf32>
    %178 = arith.mulf %177, %176 : vector<16x128xf32>
    %179 = math.tanh %171 : vector<16x128xf32>
    %180 = vector.extract_strided_slice %178 {offsets = [0, 0], sizes = [16, 32], strides = [1, 1]} : vector<16x128xf32> to vector<16x32xf32>
    %181 = vector.extract_strided_slice %178 {offsets = [0, 32], sizes = [16, 32], strides = [1, 1]} : vector<16x128xf32> to vector<16x32xf32>
    %182 = vector.extract_strided_slice %179 {offsets = [0, 64], sizes = [16, 32], strides = [1, 1]} : vector<16x128xf32> to vector<16x32xf32>
    %183 = vector.extract_strided_slice %178 {offsets = [0, 96], sizes = [16, 32], strides = [1, 1]} : vector<16x128xf32> to vector<16x32xf32>
    %184 = arith.mulf %181, %112 : vector<16x32xf32>
    %185 = arith.mulf %180, %182 : vector<16x32xf32>
    %186 = arith.addf %184, %185 : vector<16x32xf32>
    %187 = math.tanh %186 : vector<16x32xf32>
    %188 = arith.mulf %183, %187 : vector<16x32xf32>
    %189 = vector.extract_strided_slice %161 {offsets = [0, 128], sizes = [16, 128], strides = [1, 1]} : vector<16x256xf32> to vector<16x128xf32>
    %190 = vector.extract_strided_slice %164 {offsets = [0, 0], sizes = [16, 128], strides = [1, 1]} : vector<16x256xf32> to vector<16x128xf32>
    %191 = arith.addf %189, %190 : vector<16x128xf32>
    %192 = vector.broadcast %9 : vector<1x128xf32> to vector<16x128xf32>
    %193 = arith.addf %191, %192 : vector<16x128xf32>
    %cst_71 = arith.constant 5.000000e-01 : f32
    %194 = vector.broadcast %cst_71 : f32 to vector<16x128xf32>
    %195 = arith.mulf %194, %193 : vector<16x128xf32>
    %196 = math.tanh %195 : vector<16x128xf32>
    %cst_72 = arith.constant 1.000000e+00 : f32
    %197 = vector.broadcast %cst_72 : f32 to vector<16x128xf32>
    %198 = arith.addf %196, %197 : vector<16x128xf32>
    %cst_73 = arith.constant 5.000000e-01 : f32
    %199 = vector.broadcast %cst_73 : f32 to vector<16x128xf32>
    %200 = arith.mulf %199, %198 : vector<16x128xf32>
    %201 = math.tanh %193 : vector<16x128xf32>
    %202 = vector.extract_strided_slice %200 {offsets = [0, 0], sizes = [16, 32], strides = [1, 1]} : vector<16x128xf32> to vector<16x32xf32>
    %203 = vector.extract_strided_slice %200 {offsets = [0, 32], sizes = [16, 32], strides = [1, 1]} : vector<16x128xf32> to vector<16x32xf32>
    %204 = vector.extract_strided_slice %201 {offsets = [0, 64], sizes = [16, 32], strides = [1, 1]} : vector<16x128xf32> to vector<16x32xf32>
    %205 = vector.extract_strided_slice %200 {offsets = [0, 96], sizes = [16, 32], strides = [1, 1]} : vector<16x128xf32> to vector<16x32xf32>
    %206 = arith.mulf %203, %134 : vector<16x32xf32>
    %207 = arith.mulf %202, %204 : vector<16x32xf32>
    %208 = arith.addf %206, %207 : vector<16x32xf32>
    %209 = math.tanh %208 : vector<16x32xf32>
    %210 = arith.mulf %205, %209 : vector<16x32xf32>
    %211 = vector.extract_strided_slice %164 {offsets = [0, 128], sizes = [16, 128], strides = [1, 1]} : vector<16x256xf32> to vector<16x128xf32>
    %212 = arith.addf %211, %167 : vector<16x128xf32>
    %213 = vector.broadcast %10 : vector<1x128xf32> to vector<16x128xf32>
    %214 = arith.addf %212, %213 : vector<16x128xf32>
    %cst_74 = arith.constant 5.000000e-01 : f32
    %215 = vector.broadcast %cst_74 : f32 to vector<16x128xf32>
    %216 = arith.mulf %215, %214 : vector<16x128xf32>
    %217 = math.tanh %216 : vector<16x128xf32>
    %cst_75 = arith.constant 1.000000e+00 : f32
    %218 = vector.broadcast %cst_75 : f32 to vector<16x128xf32>
    %219 = arith.addf %217, %218 : vector<16x128xf32>
    %cst_76 = arith.constant 5.000000e-01 : f32
    %220 = vector.broadcast %cst_76 : f32 to vector<16x128xf32>
    %221 = arith.mulf %220, %219 : vector<16x128xf32>
    %222 = math.tanh %214 : vector<16x128xf32>
    %223 = vector.extract_strided_slice %221 {offsets = [0, 0], sizes = [16, 32], strides = [1, 1]} : vector<16x128xf32> to vector<16x32xf32>
    %224 = vector.extract_strided_slice %221 {offsets = [0, 32], sizes = [16, 32], strides = [1, 1]} : vector<16x128xf32> to vector<16x32xf32>
    %225 = vector.extract_strided_slice %222 {offsets = [0, 64], sizes = [16, 32], strides = [1, 1]} : vector<16x128xf32> to vector<16x32xf32>
    %226 = vector.extract_strided_slice %221 {offsets = [0, 96], sizes = [16, 32], strides = [1, 1]} : vector<16x128xf32> to vector<16x32xf32>
    %227 = arith.mulf %224, %155 : vector<16x32xf32>
    %228 = arith.mulf %223, %225 : vector<16x32xf32>
    %229 = arith.addf %227, %228 : vector<16x32xf32>
    %230 = math.tanh %229 : vector<16x32xf32>
    %231 = arith.mulf %226, %230 : vector<16x32xf32>
    %232 = arith.addf %158, %231 : vector<16x32xf32>
    %c0_77 = arith.constant 0 : index
    %c0_78 = arith.constant 0 : index
    %233 = vector.load %arg4[%c0_77, %c0_78] : memref<32x256xbf16, #tpu.memory_space<vmem>>, vector<32x256xbf16>
    %234 = arith.truncf %188 : vector<16x32xf32> to vector<16x32xbf16>
    %cst_79 = arith.constant dense<0.000000e+00> : vector<16x256xf32>
    %235 = tpu.matmul %234, %233, %cst_79 {dimension_numbers = #tpu.dot_dimension_numbers<[1], [0], [0], [1], [0, 0, 1, 1], [], []>} : vector<16x32xbf16>, vector<32x256xbf16>, vector<16x256xf32> -> vector<16x256xf32>
    %c0_80 = arith.constant 0 : index
    %c0_81 = arith.constant 0 : index
    %236 = vector.load %arg6[%c0_80, %c0_81] : memref<32x256xbf16, #tpu.memory_space<vmem>>, vector<32x256xbf16>
    %237 = arith.truncf %210 : vector<16x32xf32> to vector<16x32xbf16>
    %cst_82 = arith.constant dense<0.000000e+00> : vector<16x256xf32>
    %238 = tpu.matmul %237, %236, %cst_82 {dimension_numbers = #tpu.dot_dimension_numbers<[1], [0], [0], [1], [0, 0, 1, 1], [], []>} : vector<16x32xbf16>, vector<32x256xbf16>, vector<16x256xf32> -> vector<16x256xf32>
    %c0_83 = arith.constant 0 : index
    %c0_84 = arith.constant 0 : index
    %239 = vector.load %arg8[%c0_83, %c0_84] : memref<32x128xbf16, #tpu.memory_space<vmem>>, vector<32x128xbf16>
    %240 = arith.truncf %231 : vector<16x32xf32> to vector<16x32xbf16>
    %cst_85 = arith.constant dense<0.000000e+00> : vector<16x128xf32>
    %241 = tpu.matmul %240, %239, %cst_85 {dimension_numbers = #tpu.dot_dimension_numbers<[1], [0], [0], [1], [0, 0, 1, 1], [], []>} : vector<16x32xbf16>, vector<32x128xbf16>, vector<16x128xf32> -> vector<16x128xf32>
    %c4 = arith.constant 4 : index
    %c0_86 = arith.constant 0 : index
    %c0_87 = arith.constant 0 : index
    %242 = vector.load %arg21[%c4, %c0_86, %c0_87] : memref<8x16x128xf32, #tpu.memory_space<vmem>>, vector<1x16x128xf32>
    %243 = vector.shape_cast %242 : vector<1x16x128xf32> to vector<16x128xf32>
    %244 = vector.extract_strided_slice %235 {offsets = [0, 0], sizes = [16, 128], strides = [1, 1]} : vector<16x256xf32> to vector<16x128xf32>
    %245 = arith.addf %243, %244 : vector<16x128xf32>
    %cst_88 = arith.constant 5.000000e-01 : f32
    %246 = vector.broadcast %cst_88 : f32 to vector<16x128xf32>
    %247 = arith.mulf %246, %245 : vector<16x128xf32>
    %248 = math.tanh %247 : vector<16x128xf32>
    %cst_89 = arith.constant 1.000000e+00 : f32
    %249 = vector.broadcast %cst_89 : f32 to vector<16x128xf32>
    %250 = arith.addf %248, %249 : vector<16x128xf32>
    %cst_90 = arith.constant 5.000000e-01 : f32
    %251 = vector.broadcast %cst_90 : f32 to vector<16x128xf32>
    %252 = arith.mulf %251, %250 : vector<16x128xf32>
    %253 = math.tanh %245 : vector<16x128xf32>
    %254 = vector.extract_strided_slice %252 {offsets = [0, 0], sizes = [16, 32], strides = [1, 1]} : vector<16x128xf32> to vector<16x32xf32>
    %255 = vector.extract_strided_slice %252 {offsets = [0, 32], sizes = [16, 32], strides = [1, 1]} : vector<16x128xf32> to vector<16x32xf32>
    %256 = vector.extract_strided_slice %253 {offsets = [0, 64], sizes = [16, 32], strides = [1, 1]} : vector<16x128xf32> to vector<16x32xf32>
    %257 = vector.extract_strided_slice %252 {offsets = [0, 96], sizes = [16, 32], strides = [1, 1]} : vector<16x128xf32> to vector<16x32xf32>
    %258 = arith.mulf %255, %186 : vector<16x32xf32>
    %259 = arith.mulf %254, %256 : vector<16x32xf32>
    %260 = arith.addf %258, %259 : vector<16x32xf32>
    %261 = math.tanh %260 : vector<16x32xf32>
    %262 = arith.mulf %257, %261 : vector<16x32xf32>
    %263 = vector.extract_strided_slice %235 {offsets = [0, 128], sizes = [16, 128], strides = [1, 1]} : vector<16x256xf32> to vector<16x128xf32>
    %264 = vector.extract_strided_slice %238 {offsets = [0, 0], sizes = [16, 128], strides = [1, 1]} : vector<16x256xf32> to vector<16x128xf32>
    %265 = arith.addf %263, %264 : vector<16x128xf32>
    %266 = vector.broadcast %9 : vector<1x128xf32> to vector<16x128xf32>
    %267 = arith.addf %265, %266 : vector<16x128xf32>
    %cst_91 = arith.constant 5.000000e-01 : f32
    %268 = vector.broadcast %cst_91 : f32 to vector<16x128xf32>
    %269 = arith.mulf %268, %267 : vector<16x128xf32>
    %270 = math.tanh %269 : vector<16x128xf32>
    %cst_92 = arith.constant 1.000000e+00 : f32
    %271 = vector.broadcast %cst_92 : f32 to vector<16x128xf32>
    %272 = arith.addf %270, %271 : vector<16x128xf32>
    %cst_93 = arith.constant 5.000000e-01 : f32
    %273 = vector.broadcast %cst_93 : f32 to vector<16x128xf32>
    %274 = arith.mulf %273, %272 : vector<16x128xf32>
    %275 = math.tanh %267 : vector<16x128xf32>
    %276 = vector.extract_strided_slice %274 {offsets = [0, 0], sizes = [16, 32], strides = [1, 1]} : vector<16x128xf32> to vector<16x32xf32>
    %277 = vector.extract_strided_slice %274 {offsets = [0, 32], sizes = [16, 32], strides = [1, 1]} : vector<16x128xf32> to vector<16x32xf32>
    %278 = vector.extract_strided_slice %275 {offsets = [0, 64], sizes = [16, 32], strides = [1, 1]} : vector<16x128xf32> to vector<16x32xf32>
    %279 = vector.extract_strided_slice %274 {offsets = [0, 96], sizes = [16, 32], strides = [1, 1]} : vector<16x128xf32> to vector<16x32xf32>
    %280 = arith.mulf %277, %208 : vector<16x32xf32>
    %281 = arith.mulf %276, %278 : vector<16x32xf32>
    %282 = arith.addf %280, %281 : vector<16x32xf32>
    %283 = math.tanh %282 : vector<16x32xf32>
    %284 = arith.mulf %279, %283 : vector<16x32xf32>
    %285 = vector.extract_strided_slice %238 {offsets = [0, 128], sizes = [16, 128], strides = [1, 1]} : vector<16x256xf32> to vector<16x128xf32>
    %286 = arith.addf %285, %241 : vector<16x128xf32>
    %287 = vector.broadcast %10 : vector<1x128xf32> to vector<16x128xf32>
    %288 = arith.addf %286, %287 : vector<16x128xf32>
    %cst_94 = arith.constant 5.000000e-01 : f32
    %289 = vector.broadcast %cst_94 : f32 to vector<16x128xf32>
    %290 = arith.mulf %289, %288 : vector<16x128xf32>
    %291 = math.tanh %290 : vector<16x128xf32>
    %cst_95 = arith.constant 1.000000e+00 : f32
    %292 = vector.broadcast %cst_95 : f32 to vector<16x128xf32>
    %293 = arith.addf %291, %292 : vector<16x128xf32>
    %cst_96 = arith.constant 5.000000e-01 : f32
    %294 = vector.broadcast %cst_96 : f32 to vector<16x128xf32>
    %295 = arith.mulf %294, %293 : vector<16x128xf32>
    %296 = math.tanh %288 : vector<16x128xf32>
    %297 = vector.extract_strided_slice %295 {offsets = [0, 0], sizes = [16, 32], strides = [1, 1]} : vector<16x128xf32> to vector<16x32xf32>
    %298 = vector.extract_strided_slice %295 {offsets = [0, 32], sizes = [16, 32], strides = [1, 1]} : vector<16x128xf32> to vector<16x32xf32>
    %299 = vector.extract_strided_slice %296 {offsets = [0, 64], sizes = [16, 32], strides = [1, 1]} : vector<16x128xf32> to vector<16x32xf32>
    %300 = vector.extract_strided_slice %295 {offsets = [0, 96], sizes = [16, 32], strides = [1, 1]} : vector<16x128xf32> to vector<16x32xf32>
    %301 = arith.mulf %298, %229 : vector<16x32xf32>
    %302 = arith.mulf %297, %299 : vector<16x32xf32>
    %303 = arith.addf %301, %302 : vector<16x32xf32>
    %304 = math.tanh %303 : vector<16x32xf32>
    %305 = arith.mulf %300, %304 : vector<16x32xf32>
    %306 = arith.addf %232, %305 : vector<16x32xf32>
    %c0_97 = arith.constant 0 : index
    %c0_98 = arith.constant 0 : index
    %307 = vector.load %arg4[%c0_97, %c0_98] : memref<32x256xbf16, #tpu.memory_space<vmem>>, vector<32x256xbf16>
    %308 = arith.truncf %262 : vector<16x32xf32> to vector<16x32xbf16>
    %cst_99 = arith.constant dense<0.000000e+00> : vector<16x256xf32>
    %309 = tpu.matmul %308, %307, %cst_99 {dimension_numbers = #tpu.dot_dimension_numbers<[1], [0], [0], [1], [0, 0, 1, 1], [], []>} : vector<16x32xbf16>, vector<32x256xbf16>, vector<16x256xf32> -> vector<16x256xf32>
    %c0_100 = arith.constant 0 : index
    %c0_101 = arith.constant 0 : index
    %310 = vector.load %arg6[%c0_100, %c0_101] : memref<32x256xbf16, #tpu.memory_space<vmem>>, vector<32x256xbf16>
    %311 = arith.truncf %284 : vector<16x32xf32> to vector<16x32xbf16>
    %cst_102 = arith.constant dense<0.000000e+00> : vector<16x256xf32>
    %312 = tpu.matmul %311, %310, %cst_102 {dimension_numbers = #tpu.dot_dimension_numbers<[1], [0], [0], [1], [0, 0, 1, 1], [], []>} : vector<16x32xbf16>, vector<32x256xbf16>, vector<16x256xf32> -> vector<16x256xf32>
    %c0_103 = arith.constant 0 : index
    %c0_104 = arith.constant 0 : index
    %313 = vector.load %arg8[%c0_103, %c0_104] : memref<32x128xbf16, #tpu.memory_space<vmem>>, vector<32x128xbf16>
    %314 = arith.truncf %305 : vector<16x32xf32> to vector<16x32xbf16>
    %cst_105 = arith.constant dense<0.000000e+00> : vector<16x128xf32>
    %315 = tpu.matmul %314, %313, %cst_105 {dimension_numbers = #tpu.dot_dimension_numbers<[1], [0], [0], [1], [0, 0, 1, 1], [], []>} : vector<16x32xbf16>, vector<32x128xbf16>, vector<16x128xf32> -> vector<16x128xf32>
    %c5 = arith.constant 5 : index
    %c0_106 = arith.constant 0 : index
    %c0_107 = arith.constant 0 : index
    %316 = vector.load %arg21[%c5, %c0_106, %c0_107] : memref<8x16x128xf32, #tpu.memory_space<vmem>>, vector<1x16x128xf32>
    %317 = vector.shape_cast %316 : vector<1x16x128xf32> to vector<16x128xf32>
    %318 = vector.extract_strided_slice %309 {offsets = [0, 0], sizes = [16, 128], strides = [1, 1]} : vector<16x256xf32> to vector<16x128xf32>
    %319 = arith.addf %317, %318 : vector<16x128xf32>
    %cst_108 = arith.constant 5.000000e-01 : f32
    %320 = vector.broadcast %cst_108 : f32 to vector<16x128xf32>
    %321 = arith.mulf %320, %319 : vector<16x128xf32>
    %322 = math.tanh %321 : vector<16x128xf32>
    %cst_109 = arith.constant 1.000000e+00 : f32
    %323 = vector.broadcast %cst_109 : f32 to vector<16x128xf32>
    %324 = arith.addf %322, %323 : vector<16x128xf32>
    %cst_110 = arith.constant 5.000000e-01 : f32
    %325 = vector.broadcast %cst_110 : f32 to vector<16x128xf32>
    %326 = arith.mulf %325, %324 : vector<16x128xf32>
    %327 = math.tanh %319 : vector<16x128xf32>
    %328 = vector.extract_strided_slice %326 {offsets = [0, 0], sizes = [16, 32], strides = [1, 1]} : vector<16x128xf32> to vector<16x32xf32>
    %329 = vector.extract_strided_slice %326 {offsets = [0, 32], sizes = [16, 32], strides = [1, 1]} : vector<16x128xf32> to vector<16x32xf32>
    %330 = vector.extract_strided_slice %327 {offsets = [0, 64], sizes = [16, 32], strides = [1, 1]} : vector<16x128xf32> to vector<16x32xf32>
    %331 = vector.extract_strided_slice %326 {offsets = [0, 96], sizes = [16, 32], strides = [1, 1]} : vector<16x128xf32> to vector<16x32xf32>
    %332 = arith.mulf %329, %260 : vector<16x32xf32>
    %333 = arith.mulf %328, %330 : vector<16x32xf32>
    %334 = arith.addf %332, %333 : vector<16x32xf32>
    %335 = math.tanh %334 : vector<16x32xf32>
    %336 = arith.mulf %331, %335 : vector<16x32xf32>
    %337 = vector.extract_strided_slice %309 {offsets = [0, 128], sizes = [16, 128], strides = [1, 1]} : vector<16x256xf32> to vector<16x128xf32>
    %338 = vector.extract_strided_slice %312 {offsets = [0, 0], sizes = [16, 128], strides = [1, 1]} : vector<16x256xf32> to vector<16x128xf32>
    %339 = arith.addf %337, %338 : vector<16x128xf32>
    %340 = vector.broadcast %9 : vector<1x128xf32> to vector<16x128xf32>
    %341 = arith.addf %339, %340 : vector<16x128xf32>
    %cst_111 = arith.constant 5.000000e-01 : f32
    %342 = vector.broadcast %cst_111 : f32 to vector<16x128xf32>
    %343 = arith.mulf %342, %341 : vector<16x128xf32>
    %344 = math.tanh %343 : vector<16x128xf32>
    %cst_112 = arith.constant 1.000000e+00 : f32
    %345 = vector.broadcast %cst_112 : f32 to vector<16x128xf32>
    %346 = arith.addf %344, %345 : vector<16x128xf32>
    %cst_113 = arith.constant 5.000000e-01 : f32
    %347 = vector.broadcast %cst_113 : f32 to vector<16x128xf32>
    %348 = arith.mulf %347, %346 : vector<16x128xf32>
    %349 = math.tanh %341 : vector<16x128xf32>
    %350 = vector.extract_strided_slice %348 {offsets = [0, 0], sizes = [16, 32], strides = [1, 1]} : vector<16x128xf32> to vector<16x32xf32>
    %351 = vector.extract_strided_slice %348 {offsets = [0, 32], sizes = [16, 32], strides = [1, 1]} : vector<16x128xf32> to vector<16x32xf32>
    %352 = vector.extract_strided_slice %349 {offsets = [0, 64], sizes = [16, 32], strides = [1, 1]} : vector<16x128xf32> to vector<16x32xf32>
    %353 = vector.extract_strided_slice %348 {offsets = [0, 96], sizes = [16, 32], strides = [1, 1]} : vector<16x128xf32> to vector<16x32xf32>
    %354 = arith.mulf %351, %282 : vector<16x32xf32>
    %355 = arith.mulf %350, %352 : vector<16x32xf32>
    %356 = arith.addf %354, %355 : vector<16x32xf32>
    %357 = math.tanh %356 : vector<16x32xf32>
    %358 = arith.mulf %353, %357 : vector<16x32xf32>
    %359 = vector.extract_strided_slice %312 {offsets = [0, 128], sizes = [16, 128], strides = [1, 1]} : vector<16x256xf32> to vector<16x128xf32>
    %360 = arith.addf %359, %315 : vector<16x128xf32>
    %361 = vector.broadcast %10 : vector<1x128xf32> to vector<16x128xf32>
    %362 = arith.addf %360, %361 : vector<16x128xf32>
    %cst_114 = arith.constant 5.000000e-01 : f32
    %363 = vector.broadcast %cst_114 : f32 to vector<16x128xf32>
    %364 = arith.mulf %363, %362 : vector<16x128xf32>
    %365 = math.tanh %364 : vector<16x128xf32>
    %cst_115 = arith.constant 1.000000e+00 : f32
    %366 = vector.broadcast %cst_115 : f32 to vector<16x128xf32>
    %367 = arith.addf %365, %366 : vector<16x128xf32>
    %cst_116 = arith.constant 5.000000e-01 : f32
    %368 = vector.broadcast %cst_116 : f32 to vector<16x128xf32>
    %369 = arith.mulf %368, %367 : vector<16x128xf32>
    %370 = math.tanh %362 : vector<16x128xf32>
    %371 = vector.extract_strided_slice %369 {offsets = [0, 0], sizes = [16, 32], strides = [1, 1]} : vector<16x128xf32> to vector<16x32xf32>
    %372 = vector.extract_strided_slice %369 {offsets = [0, 32], sizes = [16, 32], strides = [1, 1]} : vector<16x128xf32> to vector<16x32xf32>
    %373 = vector.extract_strided_slice %370 {offsets = [0, 64], sizes = [16, 32], strides = [1, 1]} : vector<16x128xf32> to vector<16x32xf32>
    %374 = vector.extract_strided_slice %369 {offsets = [0, 96], sizes = [16, 32], strides = [1, 1]} : vector<16x128xf32> to vector<16x32xf32>
    %375 = arith.mulf %372, %303 : vector<16x32xf32>
    %376 = arith.mulf %371, %373 : vector<16x32xf32>
    %377 = arith.addf %375, %376 : vector<16x32xf32>
    %378 = math.tanh %377 : vector<16x32xf32>
    %379 = arith.mulf %374, %378 : vector<16x32xf32>
    %380 = arith.addf %306, %379 : vector<16x32xf32>
    %381 = tpu.concatenate %157, %231, %305, %379 in 1 : vector<16x32xf32>, vector<16x32xf32>, vector<16x32xf32>, vector<16x32xf32> -> vector<16x128xf32>
    %c0_117 = arith.constant 0 : index
    %c0_118 = arith.constant 0 : index
    %382 = vector.load %arg19[%c0_117, %c0_118] : memref<16x256xf32, #tpu.memory_space<vmem>>, vector<16x128xf32>
    tpu.vector_store %arg19[%c0_117, %c0_118], %381 {strides = array<i32>} : memref<16x256xf32, #tpu.memory_space<vmem>>, vector<16x128xf32>,
    %c0_119 = arith.constant 0 : index
    %c0_120 = arith.constant 0 : index
    %383 = vector.load %arg4[%c0_119, %c0_120] : memref<32x256xbf16, #tpu.memory_space<vmem>>, vector<32x256xbf16>
    %384 = arith.truncf %336 : vector<16x32xf32> to vector<16x32xbf16>
    %cst_121 = arith.constant dense<0.000000e+00> : vector<16x256xf32>
    %385 = tpu.matmul %384, %383, %cst_121 {dimension_numbers = #tpu.dot_dimension_numbers<[1], [0], [0], [1], [0, 0, 1, 1], [], []>} : vector<16x32xbf16>, vector<32x256xbf16>, vector<16x256xf32> -> vector<16x256xf32>
    %c0_122 = arith.constant 0 : index
    %c0_123 = arith.constant 0 : index
    %386 = vector.load %arg6[%c0_122, %c0_123] : memref<32x256xbf16, #tpu.memory_space<vmem>>, vector<32x256xbf16>
    %387 = arith.truncf %358 : vector<16x32xf32> to vector<16x32xbf16>
    %cst_124 = arith.constant dense<0.000000e+00> : vector<16x256xf32>
    %388 = tpu.matmul %387, %386, %cst_124 {dimension_numbers = #tpu.dot_dimension_numbers<[1], [0], [0], [1], [0, 0, 1, 1], [], []>} : vector<16x32xbf16>, vector<32x256xbf16>, vector<16x256xf32> -> vector<16x256xf32>
    %c0_125 = arith.constant 0 : index
    %c0_126 = arith.constant 0 : index
    %389 = vector.load %arg8[%c0_125, %c0_126] : memref<32x128xbf16, #tpu.memory_space<vmem>>, vector<32x128xbf16>
    %390 = arith.truncf %379 : vector<16x32xf32> to vector<16x32xbf16>
    %cst_127 = arith.constant dense<0.000000e+00> : vector<16x128xf32>
    %391 = tpu.matmul %390, %389, %cst_127 {dimension_numbers = #tpu.dot_dimension_numbers<[1], [0], [0], [1], [0, 0, 1, 1], [], []>} : vector<16x32xbf16>, vector<32x128xbf16>, vector<16x128xf32> -> vector<16x128xf32>
    %c6 = arith.constant 6 : index
    %c0_128 = arith.constant 0 : index
    %c0_129 = arith.constant 0 : index
    %392 = vector.load %arg21[%c6, %c0_128, %c0_129] : memref<8x16x128xf32, #tpu.memory_space<vmem>>, vector<1x16x128xf32>
    %393 = vector.shape_cast %392 : vector<1x16x128xf32> to vector<16x128xf32>
    %394 = vector.extract_strided_slice %385 {offsets = [0, 0], sizes = [16, 128], strides = [1, 1]} : vector<16x256xf32> to vector<16x128xf32>
    %395 = arith.addf %393, %394 : vector<16x128xf32>
    %cst_130 = arith.constant 5.000000e-01 : f32
    %396 = vector.broadcast %cst_130 : f32 to vector<16x128xf32>
    %397 = arith.mulf %396, %395 : vector<16x128xf32>
    %398 = math.tanh %397 : vector<16x128xf32>
    %cst_131 = arith.constant 1.000000e+00 : f32
    %399 = vector.broadcast %cst_131 : f32 to vector<16x128xf32>
    %400 = arith.addf %398, %399 : vector<16x128xf32>
    %cst_132 = arith.constant 5.000000e-01 : f32
    %401 = vector.broadcast %cst_132 : f32 to vector<16x128xf32>
    %402 = arith.mulf %401, %400 : vector<16x128xf32>
    %403 = math.tanh %395 : vector<16x128xf32>
    %404 = vector.extract_strided_slice %402 {offsets = [0, 0], sizes = [16, 32], strides = [1, 1]} : vector<16x128xf32> to vector<16x32xf32>
    %405 = vector.extract_strided_slice %402 {offsets = [0, 32], sizes = [16, 32], strides = [1, 1]} : vector<16x128xf32> to vector<16x32xf32>
    %406 = vector.extract_strided_slice %403 {offsets = [0, 64], sizes = [16, 32], strides = [1, 1]} : vector<16x128xf32> to vector<16x32xf32>
    %407 = vector.extract_strided_slice %402 {offsets = [0, 96], sizes = [16, 32], strides = [1, 1]} : vector<16x128xf32> to vector<16x32xf32>
    %408 = arith.mulf %405, %334 : vector<16x32xf32>
    %409 = arith.mulf %404, %406 : vector<16x32xf32>
    %410 = arith.addf %408, %409 : vector<16x32xf32>
    %411 = math.tanh %410 : vector<16x32xf32>
    %412 = arith.mulf %407, %411 : vector<16x32xf32>
    %413 = vector.extract_strided_slice %385 {offsets = [0, 128], sizes = [16, 128], strides = [1, 1]} : vector<16x256xf32> to vector<16x128xf32>
    %414 = vector.extract_strided_slice %388 {offsets = [0, 0], sizes = [16, 128], strides = [1, 1]} : vector<16x256xf32> to vector<16x128xf32>
    %415 = arith.addf %413, %414 : vector<16x128xf32>
    %416 = vector.broadcast %9 : vector<1x128xf32> to vector<16x128xf32>
    %417 = arith.addf %415, %416 : vector<16x128xf32>
    %cst_133 = arith.constant 5.000000e-01 : f32
    %418 = vector.broadcast %cst_133 : f32 to vector<16x128xf32>
    %419 = arith.mulf %418, %417 : vector<16x128xf32>
    %420 = math.tanh %419 : vector<16x128xf32>
    %cst_134 = arith.constant 1.000000e+00 : f32
    %421 = vector.broadcast %cst_134 : f32 to vector<16x128xf32>
    %422 = arith.addf %420, %421 : vector<16x128xf32>
    %cst_135 = arith.constant 5.000000e-01 : f32
    %423 = vector.broadcast %cst_135 : f32 to vector<16x128xf32>
    %424 = arith.mulf %423, %422 : vector<16x128xf32>
    %425 = math.tanh %417 : vector<16x128xf32>
    %426 = vector.extract_strided_slice %424 {offsets = [0, 0], sizes = [16, 32], strides = [1, 1]} : vector<16x128xf32> to vector<16x32xf32>
    %427 = vector.extract_strided_slice %424 {offsets = [0, 32], sizes = [16, 32], strides = [1, 1]} : vector<16x128xf32> to vector<16x32xf32>
    %428 = vector.extract_strided_slice %425 {offsets = [0, 64], sizes = [16, 32], strides = [1, 1]} : vector<16x128xf32> to vector<16x32xf32>
    %429 = vector.extract_strided_slice %424 {offsets = [0, 96], sizes = [16, 32], strides = [1, 1]} : vector<16x128xf32> to vector<16x32xf32>
    %430 = arith.mulf %427, %356 : vector<16x32xf32>
    %431 = arith.mulf %426, %428 : vector<16x32xf32>
    %432 = arith.addf %430, %431 : vector<16x32xf32>
    %433 = math.tanh %432 : vector<16x32xf32>
    %434 = arith.mulf %429, %433 : vector<16x32xf32>
    %435 = vector.extract_strided_slice %388 {offsets = [0, 128], sizes = [16, 128], strides = [1, 1]} : vector<16x256xf32> to vector<16x128xf32>
    %436 = arith.addf %435, %391 : vector<16x128xf32>
    %437 = vector.broadcast %10 : vector<1x128xf32> to vector<16x128xf32>
    %438 = arith.addf %436, %437 : vector<16x128xf32>
    %cst_136 = arith.constant 5.000000e-01 : f32
    %439 = vector.broadcast %cst_136 : f32 to vector<16x128xf32>
    %440 = arith.mulf %439, %438 : vector<16x128xf32>
    %441 = math.tanh %440 : vector<16x128xf32>
    %cst_137 = arith.constant 1.000000e+00 : f32
    %442 = vector.broadcast %cst_137 : f32 to vector<16x128xf32>
    %443 = arith.addf %441, %442 : vector<16x128xf32>
    %cst_138 = arith.constant 5.000000e-01 : f32
    %444 = vector.broadcast %cst_138 : f32 to vector<16x128xf32>
    %445 = arith.mulf %444, %443 : vector<16x128xf32>
    %446 = math.tanh %438 : vector<16x128xf32>
    %447 = vector.extract_strided_slice %445 {offsets = [0, 0], sizes = [16, 32], strides = [1, 1]} : vector<16x128xf32> to vector<16x32xf32>
    %448 = vector.extract_strided_slice %445 {offsets = [0, 32], sizes = [16, 32], strides = [1, 1]} : vector<16x128xf32> to vector<16x32xf32>
    %449 = vector.extract_strided_slice %446 {offsets = [0, 64], sizes = [16, 32], strides = [1, 1]} : vector<16x128xf32> to vector<16x32xf32>
    %450 = vector.extract_strided_slice %445 {offsets = [0, 96], sizes = [16, 32], strides = [1, 1]} : vector<16x128xf32> to vector<16x32xf32>
    %451 = arith.mulf %448, %377 : vector<16x32xf32>
    %452 = arith.mulf %447, %449 : vector<16x32xf32>
    %453 = arith.addf %451, %452 : vector<16x32xf32>
    %454 = math.tanh %453 : vector<16x32xf32>
    %455 = arith.mulf %450, %454 : vector<16x32xf32>
    %456 = arith.addf %380, %455 : vector<16x32xf32>
    %c0_139 = arith.constant 0 : index
    %c0_140 = arith.constant 0 : index
    %457 = vector.load %arg4[%c0_139, %c0_140] : memref<32x256xbf16, #tpu.memory_space<vmem>>, vector<32x256xbf16>
    %458 = arith.truncf %412 : vector<16x32xf32> to vector<16x32xbf16>
    %cst_141 = arith.constant dense<0.000000e+00> : vector<16x256xf32>
    %459 = tpu.matmul %458, %457, %cst_141 {dimension_numbers = #tpu.dot_dimension_numbers<[1], [0], [0], [1], [0, 0, 1, 1], [], []>} : vector<16x32xbf16>, vector<32x256xbf16>, vector<16x256xf32> -> vector<16x256xf32>
    %c0_142 = arith.constant 0 : index
    %c0_143 = arith.constant 0 : index
    %460 = vector.load %arg6[%c0_142, %c0_143] : memref<32x256xbf16, #tpu.memory_space<vmem>>, vector<32x256xbf16>
    %461 = arith.truncf %434 : vector<16x32xf32> to vector<16x32xbf16>
    %cst_144 = arith.constant dense<0.000000e+00> : vector<16x256xf32>
    %462 = tpu.matmul %461, %460, %cst_144 {dimension_numbers = #tpu.dot_dimension_numbers<[1], [0], [0], [1], [0, 0, 1, 1], [], []>} : vector<16x32xbf16>, vector<32x256xbf16>, vector<16x256xf32> -> vector<16x256xf32>
    %c0_145 = arith.constant 0 : index
    %c0_146 = arith.constant 0 : index
    %463 = vector.load %arg8[%c0_145, %c0_146] : memref<32x128xbf16, #tpu.memory_space<vmem>>, vector<32x128xbf16>
    %464 = arith.truncf %455 : vector<16x32xf32> to vector<16x32xbf16>
    %cst_147 = arith.constant dense<0.000000e+00> : vector<16x128xf32>
    %465 = tpu.matmul %464, %463, %cst_147 {dimension_numbers = #tpu.dot_dimension_numbers<[1], [0], [0], [1], [0, 0, 1, 1], [], []>} : vector<16x32xbf16>, vector<32x128xbf16>, vector<16x128xf32> -> vector<16x128xf32>
    %c7 = arith.constant 7 : index
    %c0_148 = arith.constant 0 : index
    %c0_149 = arith.constant 0 : index
    %466 = vector.load %arg21[%c7, %c0_148, %c0_149] : memref<8x16x128xf32, #tpu.memory_space<vmem>>, vector<1x16x128xf32>
    %467 = vector.shape_cast %466 : vector<1x16x128xf32> to vector<16x128xf32>
    %468 = vector.extract_strided_slice %459 {offsets = [0, 0], sizes = [16, 128], strides = [1, 1]} : vector<16x256xf32> to vector<16x128xf32>
    %469 = arith.addf %467, %468 : vector<16x128xf32>
    %cst_150 = arith.constant 5.000000e-01 : f32
    %470 = vector.broadcast %cst_150 : f32 to vector<16x128xf32>
    %471 = arith.mulf %470, %469 : vector<16x128xf32>
    %472 = math.tanh %471 : vector<16x128xf32>
    %cst_151 = arith.constant 1.000000e+00 : f32
    %473 = vector.broadcast %cst_151 : f32 to vector<16x128xf32>
    %474 = arith.addf %472, %473 : vector<16x128xf32>
    %cst_152 = arith.constant 5.000000e-01 : f32
    %475 = vector.broadcast %cst_152 : f32 to vector<16x128xf32>
    %476 = arith.mulf %475, %474 : vector<16x128xf32>
    %477 = math.tanh %469 : vector<16x128xf32>
    %478 = vector.extract_strided_slice %476 {offsets = [0, 0], sizes = [16, 32], strides = [1, 1]} : vector<16x128xf32> to vector<16x32xf32>
    %479 = vector.extract_strided_slice %476 {offsets = [0, 32], sizes = [16, 32], strides = [1, 1]} : vector<16x128xf32> to vector<16x32xf32>
    %480 = vector.extract_strided_slice %477 {offsets = [0, 64], sizes = [16, 32], strides = [1, 1]} : vector<16x128xf32> to vector<16x32xf32>
    %481 = vector.extract_strided_slice %476 {offsets = [0, 96], sizes = [16, 32], strides = [1, 1]} : vector<16x128xf32> to vector<16x32xf32>
    %482 = arith.mulf %479, %410 : vector<16x32xf32>
    %483 = arith.mulf %478, %480 : vector<16x32xf32>
    %484 = arith.addf %482, %483 : vector<16x32xf32>
    %485 = math.tanh %484 : vector<16x32xf32>
    %486 = arith.mulf %481, %485 : vector<16x32xf32>
    %487 = vector.extract_strided_slice %459 {offsets = [0, 128], sizes = [16, 128], strides = [1, 1]} : vector<16x256xf32> to vector<16x128xf32>
    %488 = vector.extract_strided_slice %462 {offsets = [0, 0], sizes = [16, 128], strides = [1, 1]} : vector<16x256xf32> to vector<16x128xf32>
    %489 = arith.addf %487, %488 : vector<16x128xf32>
    %490 = vector.broadcast %9 : vector<1x128xf32> to vector<16x128xf32>
    %491 = arith.addf %489, %490 : vector<16x128xf32>
    %cst_153 = arith.constant 5.000000e-01 : f32
    %492 = vector.broadcast %cst_153 : f32 to vector<16x128xf32>
    %493 = arith.mulf %492, %491 : vector<16x128xf32>
    %494 = math.tanh %493 : vector<16x128xf32>
    %cst_154 = arith.constant 1.000000e+00 : f32
    %495 = vector.broadcast %cst_154 : f32 to vector<16x128xf32>
    %496 = arith.addf %494, %495 : vector<16x128xf32>
    %cst_155 = arith.constant 5.000000e-01 : f32
    %497 = vector.broadcast %cst_155 : f32 to vector<16x128xf32>
    %498 = arith.mulf %497, %496 : vector<16x128xf32>
    %499 = math.tanh %491 : vector<16x128xf32>
    %500 = vector.extract_strided_slice %498 {offsets = [0, 0], sizes = [16, 32], strides = [1, 1]} : vector<16x128xf32> to vector<16x32xf32>
    %501 = vector.extract_strided_slice %498 {offsets = [0, 32], sizes = [16, 32], strides = [1, 1]} : vector<16x128xf32> to vector<16x32xf32>
    %502 = vector.extract_strided_slice %499 {offsets = [0, 64], sizes = [16, 32], strides = [1, 1]} : vector<16x128xf32> to vector<16x32xf32>
    %503 = vector.extract_strided_slice %498 {offsets = [0, 96], sizes = [16, 32], strides = [1, 1]} : vector<16x128xf32> to vector<16x32xf32>
    %504 = arith.mulf %501, %432 : vector<16x32xf32>
    %505 = arith.mulf %500, %502 : vector<16x32xf32>
    %506 = arith.addf %504, %505 : vector<16x32xf32>
    %507 = math.tanh %506 : vector<16x32xf32>
    %508 = arith.mulf %503, %507 : vector<16x32xf32>
    %509 = vector.extract_strided_slice %462 {offsets = [0, 128], sizes = [16, 128], strides = [1, 1]} : vector<16x256xf32> to vector<16x128xf32>
    %510 = arith.addf %509, %465 : vector<16x128xf32>
    %511 = vector.broadcast %10 : vector<1x128xf32> to vector<16x128xf32>
    %512 = arith.addf %510, %511 : vector<16x128xf32>
    %cst_156 = arith.constant 5.000000e-01 : f32
    %513 = vector.broadcast %cst_156 : f32 to vector<16x128xf32>
    %514 = arith.mulf %513, %512 : vector<16x128xf32>
    %515 = math.tanh %514 : vector<16x128xf32>
    %cst_157 = arith.constant 1.000000e+00 : f32
    %516 = vector.broadcast %cst_157 : f32 to vector<16x128xf32>
    %517 = arith.addf %515, %516 : vector<16x128xf32>
    %cst_158 = arith.constant 5.000000e-01 : f32
    %518 = vector.broadcast %cst_158 : f32 to vector<16x128xf32>
    %519 = arith.mulf %518, %517 : vector<16x128xf32>
    %520 = math.tanh %512 : vector<16x128xf32>
    %521 = vector.extract_strided_slice %519 {offsets = [0, 0], sizes = [16, 32], strides = [1, 1]} : vector<16x128xf32> to vector<16x32xf32>
    %522 = vector.extract_strided_slice %519 {offsets = [0, 32], sizes = [16, 32], strides = [1, 1]} : vector<16x128xf32> to vector<16x32xf32>
    %523 = vector.extract_strided_slice %520 {offsets = [0, 64], sizes = [16, 32], strides = [1, 1]} : vector<16x128xf32> to vector<16x32xf32>
    %524 = vector.extract_strided_slice %519 {offsets = [0, 96], sizes = [16, 32], strides = [1, 1]} : vector<16x128xf32> to vector<16x32xf32>
    %525 = arith.mulf %522, %453 : vector<16x32xf32>
    %526 = arith.mulf %521, %523 : vector<16x32xf32>
    %527 = arith.addf %525, %526 : vector<16x32xf32>
    %528 = math.tanh %527 : vector<16x32xf32>
    %529 = arith.mulf %524, %528 : vector<16x32xf32>
    %530 = arith.addf %456, %529 : vector<16x32xf32>
    %c0_159 = arith.constant 0 : index
    %c0_160 = arith.constant 0 : index
    %531 = vector.load %arg4[%c0_159, %c0_160] : memref<32x256xbf16, #tpu.memory_space<vmem>>, vector<32x256xbf16>
    %532 = arith.truncf %486 : vector<16x32xf32> to vector<16x32xbf16>
    %cst_161 = arith.constant dense<0.000000e+00> : vector<16x256xf32>
    %533 = tpu.matmul %532, %531, %cst_161 {dimension_numbers = #tpu.dot_dimension_numbers<[1], [0], [0], [1], [0, 0, 1, 1], [], []>} : vector<16x32xbf16>, vector<32x256xbf16>, vector<16x256xf32> -> vector<16x256xf32>
    %c0_162 = arith.constant 0 : index
    %c0_163 = arith.constant 0 : index
    %534 = vector.load %arg6[%c0_162, %c0_163] : memref<32x256xbf16, #tpu.memory_space<vmem>>, vector<32x256xbf16>
    %535 = arith.truncf %508 : vector<16x32xf32> to vector<16x32xbf16>
    %cst_164 = arith.constant dense<0.000000e+00> : vector<16x256xf32>
    %536 = tpu.matmul %535, %534, %cst_164 {dimension_numbers = #tpu.dot_dimension_numbers<[1], [0], [0], [1], [0, 0, 1, 1], [], []>} : vector<16x32xbf16>, vector<32x256xbf16>, vector<16x256xf32> -> vector<16x256xf32>
    %c0_165 = arith.constant 0 : index
    %c0_166 = arith.constant 0 : index
    %537 = vector.load %arg8[%c0_165, %c0_166] : memref<32x128xbf16, #tpu.memory_space<vmem>>, vector<32x128xbf16>
    %538 = arith.truncf %529 : vector<16x32xf32> to vector<16x32xbf16>
    %cst_167 = arith.constant dense<0.000000e+00> : vector<16x128xf32>
    %539 = tpu.matmul %538, %537, %cst_167 {dimension_numbers = #tpu.dot_dimension_numbers<[1], [0], [0], [1], [0, 0, 1, 1], [], []>} : vector<16x32xbf16>, vector<32x128xbf16>, vector<16x128xf32> -> vector<16x128xf32>
    %540 = vector.extract_strided_slice %533 {offsets = [0, 128], sizes = [16, 128], strides = [1, 1]} : vector<16x256xf32> to vector<16x128xf32>
    %541 = vector.extract_strided_slice %536 {offsets = [0, 0], sizes = [16, 128], strides = [1, 1]} : vector<16x256xf32> to vector<16x128xf32>
    %542 = arith.addf %540, %541 : vector<16x128xf32>
    %543 = vector.broadcast %9 : vector<1x128xf32> to vector<16x128xf32>
    %544 = arith.addf %542, %543 : vector<16x128xf32>
    %cst_168 = arith.constant 5.000000e-01 : f32
    %545 = vector.broadcast %cst_168 : f32 to vector<16x128xf32>
    %546 = arith.mulf %545, %544 : vector<16x128xf32>
    %547 = math.tanh %546 : vector<16x128xf32>
    %cst_169 = arith.constant 1.000000e+00 : f32
    %548 = vector.broadcast %cst_169 : f32 to vector<16x128xf32>
    %549 = arith.addf %547, %548 : vector<16x128xf32>
    %cst_170 = arith.constant 5.000000e-01 : f32
    %550 = vector.broadcast %cst_170 : f32 to vector<16x128xf32>
    %551 = arith.mulf %550, %549 : vector<16x128xf32>
    %552 = math.tanh %544 : vector<16x128xf32>
    %553 = vector.extract_strided_slice %551 {offsets = [0, 0], sizes = [16, 32], strides = [1, 1]} : vector<16x128xf32> to vector<16x32xf32>
    %554 = vector.extract_strided_slice %551 {offsets = [0, 32], sizes = [16, 32], strides = [1, 1]} : vector<16x128xf32> to vector<16x32xf32>
    %555 = vector.extract_strided_slice %552 {offsets = [0, 64], sizes = [16, 32], strides = [1, 1]} : vector<16x128xf32> to vector<16x32xf32>
    %556 = vector.extract_strided_slice %551 {offsets = [0, 96], sizes = [16, 32], strides = [1, 1]} : vector<16x128xf32> to vector<16x32xf32>
    %557 = arith.mulf %554, %506 : vector<16x32xf32>
    %558 = arith.mulf %553, %555 : vector<16x32xf32>
    %559 = arith.addf %557, %558 : vector<16x32xf32>
    %560 = math.tanh %559 : vector<16x32xf32>
    %561 = arith.mulf %556, %560 : vector<16x32xf32>
    %562 = vector.extract_strided_slice %536 {offsets = [0, 128], sizes = [16, 128], strides = [1, 1]} : vector<16x256xf32> to vector<16x128xf32>
    %563 = arith.addf %562, %539 : vector<16x128xf32>
    %564 = vector.broadcast %10 : vector<1x128xf32> to vector<16x128xf32>
    %565 = arith.addf %563, %564 : vector<16x128xf32>
    %cst_171 = arith.constant 5.000000e-01 : f32
    %566 = vector.broadcast %cst_171 : f32 to vector<16x128xf32>
    %567 = arith.mulf %566, %565 : vector<16x128xf32>
    %568 = math.tanh %567 : vector<16x128xf32>
    %cst_172 = arith.constant 1.000000e+00 : f32
    %569 = vector.broadcast %cst_172 : f32 to vector<16x128xf32>
    %570 = arith.addf %568, %569 : vector<16x128xf32>
    %cst_173 = arith.constant 5.000000e-01 : f32
    %571 = vector.broadcast %cst_173 : f32 to vector<16x128xf32>
    %572 = arith.mulf %571, %570 : vector<16x128xf32>
    %573 = math.tanh %565 : vector<16x128xf32>
    %574 = vector.extract_strided_slice %572 {offsets = [0, 0], sizes = [16, 32], strides = [1, 1]} : vector<16x128xf32> to vector<16x32xf32>
    %575 = vector.extract_strided_slice %572 {offsets = [0, 32], sizes = [16, 32], strides = [1, 1]} : vector<16x128xf32> to vector<16x32xf32>
    %576 = vector.extract_strided_slice %573 {offsets = [0, 64], sizes = [16, 32], strides = [1, 1]} : vector<16x128xf32> to vector<16x32xf32>
    %577 = vector.extract_strided_slice %572 {offsets = [0, 96], sizes = [16, 32], strides = [1, 1]} : vector<16x128xf32> to vector<16x32xf32>
    %578 = arith.mulf %575, %527 : vector<16x32xf32>
    %579 = arith.mulf %574, %576 : vector<16x32xf32>
    %580 = arith.addf %578, %579 : vector<16x32xf32>
    %581 = math.tanh %580 : vector<16x32xf32>
    %582 = arith.mulf %577, %581 : vector<16x32xf32>
    %583 = arith.addf %530, %582 : vector<16x32xf32>
    %c0_174 = arith.constant 0 : index
    %c0_175 = arith.constant 0 : index
    %584 = vector.load %arg6[%c0_174, %c0_175] : memref<32x256xbf16, #tpu.memory_space<vmem>>, vector<32x256xbf16>
    %585 = arith.truncf %561 : vector<16x32xf32> to vector<16x32xbf16>
    %cst_176 = arith.constant dense<0.000000e+00> : vector<16x256xf32>
    %586 = tpu.matmul %585, %584, %cst_176 {dimension_numbers = #tpu.dot_dimension_numbers<[1], [0], [0], [1], [0, 0, 1, 1], [], []>} : vector<16x32xbf16>, vector<32x256xbf16>, vector<16x256xf32> -> vector<16x256xf32>
    %c0_177 = arith.constant 0 : index
    %c0_178 = arith.constant 0 : index
    %587 = vector.load %arg8[%c0_177, %c0_178] : memref<32x128xbf16, #tpu.memory_space<vmem>>, vector<32x128xbf16>
    %588 = arith.truncf %582 : vector<16x32xf32> to vector<16x32xbf16>
    %cst_179 = arith.constant dense<0.000000e+00> : vector<16x128xf32>
    %589 = tpu.matmul %588, %587, %cst_179 {dimension_numbers = #tpu.dot_dimension_numbers<[1], [0], [0], [1], [0, 0, 1, 1], [], []>} : vector<16x32xbf16>, vector<32x128xbf16>, vector<16x128xf32> -> vector<16x128xf32>
    %590 = vector.extract_strided_slice %586 {offsets = [0, 128], sizes = [16, 128], strides = [1, 1]} : vector<16x256xf32> to vector<16x128xf32>
    %591 = arith.addf %590, %589 : vector<16x128xf32>
    %592 = vector.broadcast %10 : vector<1x128xf32> to vector<16x128xf32>
    %593 = arith.addf %591, %592 : vector<16x128xf32>
    %cst_180 = arith.constant 5.000000e-01 : f32
    %594 = vector.broadcast %cst_180 : f32 to vector<16x128xf32>
    %595 = arith.mulf %594, %593 : vector<16x128xf32>
    %596 = math.tanh %595 : vector<16x128xf32>
    %cst_181 = arith.constant 1.000000e+00 : f32
    %597 = vector.broadcast %cst_181 : f32 to vector<16x128xf32>
    %598 = arith.addf %596, %597 : vector<16x128xf32>
    %cst_182 = arith.constant 5.000000e-01 : f32
    %599 = vector.broadcast %cst_182 : f32 to vector<16x128xf32>
    %600 = arith.mulf %599, %598 : vector<16x128xf32>
    %601 = math.tanh %593 : vector<16x128xf32>
    %602 = vector.extract_strided_slice %600 {offsets = [0, 0], sizes = [16, 32], strides = [1, 1]} : vector<16x128xf32> to vector<16x32xf32>
    %603 = vector.extract_strided_slice %600 {offsets = [0, 32], sizes = [16, 32], strides = [1, 1]} : vector<16x128xf32> to vector<16x32xf32>
    %604 = vector.extract_strided_slice %601 {offsets = [0, 64], sizes = [16, 32], strides = [1, 1]} : vector<16x128xf32> to vector<16x32xf32>
    %605 = vector.extract_strided_slice %600 {offsets = [0, 96], sizes = [16, 32], strides = [1, 1]} : vector<16x128xf32> to vector<16x32xf32>
    %606 = arith.mulf %603, %580 : vector<16x32xf32>
    %607 = arith.mulf %602, %604 : vector<16x32xf32>
    %608 = arith.addf %606, %607 : vector<16x32xf32>
    %609 = math.tanh %608 : vector<16x32xf32>
    %610 = arith.mulf %605, %609 : vector<16x32xf32>
    %611 = arith.addf %583, %610 : vector<16x32xf32>
    %612 = tpu.concatenate %455, %529, %582, %610 in 1 : vector<16x32xf32>, vector<16x32xf32>, vector<16x32xf32>, vector<16x32xf32> -> vector<16x128xf32>
    %c0_183 = arith.constant 0 : index
    %c128 = arith.constant 128 : index
    %613 = vector.load %arg19[%c0_183, %c128] : memref<16x256xf32, #tpu.memory_space<vmem>>, vector<16x128xf32>
    tpu.vector_store %arg19[%c0_183, %c128], %612 {strides = array<i32>} : memref<16x256xf32, #tpu.memory_space<vmem>>, vector<16x128xf32>,
    %cst_184 = arith.constant 1.250000e-01 : f32
    %614 = vector.broadcast %cst_184 : f32 to vector<16x32xf32>
    %615 = arith.mulf %611, %614 : vector<16x32xf32>
    %616 = tpu.iota {dimensions = array<i32: 0>} : vector<16x1xi32>
    %c4_i32 = arith.constant 4 : i32
    %617 = vector.broadcast %c4_i32 : i32 to vector<16x1xi32>
    %618 = arith.cmpi slt, %616, %617 : vector<16x1xi32>
    %619 = arith.extui %618 : vector<16x1xi1> to vector<16x1xi32>
    %620 = arith.sitofp %619 : vector<16x1xi32> to vector<16x1xf32>
    %c0_185 = arith.constant 0 : index
    %c0_186 = arith.constant 0 : index
    %621 = vector.load %arg9[%c0_185, %c0_186] : memref<1x32xf32, #tpu.memory_space<vmem>>, vector<1x32xf32>
    %c0_187 = arith.constant 0 : index
    %c0_188 = arith.constant 0 : index
    %622 = vector.load %arg10[%c0_187, %c0_188] : memref<1x32xf32, #tpu.memory_space<vmem>>, vector<1x32xf32>
    %623 = vector.broadcast %620 : vector<16x1xf32> to vector<16x32xf32>
    %624 = arith.mulf %615, %623 : vector<16x32xf32>
    %cst_189 = arith.constant dense<0.000000e+00> : vector<32xf32>
    %625 = vector.multi_reduction <add>, %624, %cst_189 [0] : vector<16x32xf32> to vector<32xf32>
    %626 = vector.shape_cast %625 : vector<32xf32> to vector<1x32xf32>
    %cst_190 = arith.constant 2.500000e-01 : f32
    %627 = vector.broadcast %cst_190 : f32 to vector<1x32xf32>
    %628 = arith.mulf %626, %627 : vector<1x32xf32>
    %629 = vector.broadcast %628 : vector<1x32xf32> to vector<16x32xf32>
    %630 = arith.subf %615, %629 : vector<16x32xf32>
    %631 = arith.mulf %630, %630 : vector<16x32xf32>
    %632 = vector.broadcast %620 : vector<16x1xf32> to vector<16x32xf32>
    %633 = arith.mulf %631, %632 : vector<16x32xf32>
    %cst_191 = arith.constant dense<0.000000e+00> : vector<32xf32>
    %634 = vector.multi_reduction <add>, %633, %cst_191 [0] : vector<16x32xf32> to vector<32xf32>
    %635 = vector.shape_cast %634 : vector<32xf32> to vector<1x32xf32>
    %cst_192 = arith.constant 2.500000e-01 : f32
    %636 = vector.broadcast %cst_192 : f32 to vector<1x32xf32>
    %637 = arith.mulf %635, %636 : vector<1x32xf32>
    %cst_193 = arith.constant 9.99999974E-6 : f32
    %638 = vector.broadcast %cst_193 : f32 to vector<1x32xf32>
    %639 = arith.addf %637, %638 : vector<1x32xf32>
    %640 = math.rsqrt %639 : vector<1x32xf32>
    %641 = vector.broadcast %640 : vector<1x32xf32> to vector<16x32xf32>
    %642 = arith.mulf %630, %641 : vector<16x32xf32>
    %643 = vector.broadcast %621 : vector<1x32xf32> to vector<16x32xf32>
    %644 = arith.mulf %642, %643 : vector<16x32xf32>
    %645 = vector.broadcast %622 : vector<1x32xf32> to vector<16x32xf32>
    %646 = arith.addf %644, %645 : vector<16x32xf32>
    %c0_194 = arith.constant 0 : index
    %c0_195 = arith.constant 0 : index
    %647 = vector.load %arg11[%c0_194, %c0_195] : memref<32x32xf32, #tpu.memory_space<vmem>>, vector<32x32xf32>
    %cst_196 = arith.constant dense<0.000000e+00> : vector<16x32xf32>
    %648 = tpu.matmul %646, %647, %cst_196 {dimension_numbers = #tpu.dot_dimension_numbers<[1], [0], [0], [1], [0, 0, 1, 1], [], []>, precision = #tpu.contract_precision<fp32>} : vector<16x32xf32>, vector<32x32xf32>, vector<16x32xf32> -> vector<16x32xf32>
    %c0_197 = arith.constant 0 : index
    %c0_198 = arith.constant 0 : index
    %649 = vector.load %arg12[%c0_197, %c0_198] : memref<1x32xf32, #tpu.memory_space<vmem>>, vector<1x32xf32>
    %650 = vector.broadcast %649 : vector<1x32xf32> to vector<16x32xf32>
    %651 = arith.addf %648, %650 : vector<16x32xf32>
    %c0_199 = arith.constant 0 : index
    %c0_200 = arith.constant 0 : index
    %652 = vector.load %arg13[%c0_199, %c0_200] : memref<1x32xf32, #tpu.memory_space<vmem>>, vector<1x32xf32>
    %c0_201 = arith.constant 0 : index
    %c0_202 = arith.constant 0 : index
    %653 = vector.load %arg14[%c0_201, %c0_202] : memref<1x32xf32, #tpu.memory_space<vmem>>, vector<1x32xf32>
    %654 = vector.broadcast %620 : vector<16x1xf32> to vector<16x32xf32>
    %655 = arith.mulf %651, %654 : vector<16x32xf32>
    %cst_203 = arith.constant dense<0.000000e+00> : vector<32xf32>
    %656 = vector.multi_reduction <add>, %655, %cst_203 [0] : vector<16x32xf32> to vector<32xf32>
    %657 = vector.shape_cast %656 : vector<32xf32> to vector<1x32xf32>
    %cst_204 = arith.constant 2.500000e-01 : f32
    %658 = vector.broadcast %cst_204 : f32 to vector<1x32xf32>
    %659 = arith.mulf %657, %658 : vector<1x32xf32>
    %660 = vector.broadcast %659 : vector<1x32xf32> to vector<16x32xf32>
    %661 = arith.subf %651, %660 : vector<16x32xf32>
    %662 = arith.mulf %661, %661 : vector<16x32xf32>
    %663 = vector.broadcast %620 : vector<16x1xf32> to vector<16x32xf32>
    %664 = arith.mulf %662, %663 : vector<16x32xf32>
    %cst_205 = arith.constant dense<0.000000e+00> : vector<32xf32>
    %665 = vector.multi_reduction <add>, %664, %cst_205 [0] : vector<16x32xf32> to vector<32xf32>
    %666 = vector.shape_cast %665 : vector<32xf32> to vector<1x32xf32>
    %cst_206 = arith.constant 2.500000e-01 : f32
    %667 = vector.broadcast %cst_206 : f32 to vector<1x32xf32>
    %668 = arith.mulf %666, %667 : vector<1x32xf32>
    %cst_207 = arith.constant 9.99999974E-6 : f32
    %669 = vector.broadcast %cst_207 : f32 to vector<1x32xf32>
    %670 = arith.addf %668, %669 : vector<1x32xf32>
    %671 = math.rsqrt %670 : vector<1x32xf32>
    %672 = vector.broadcast %671 : vector<1x32xf32> to vector<16x32xf32>
    %673 = arith.mulf %661, %672 : vector<16x32xf32>
    %674 = vector.broadcast %652 : vector<1x32xf32> to vector<16x32xf32>
    %675 = arith.mulf %673, %674 : vector<16x32xf32>
    %676 = vector.broadcast %653 : vector<1x32xf32> to vector<16x32xf32>
    %677 = arith.addf %675, %676 : vector<16x32xf32>
    %cst_208 = arith.constant 0.000000e+00 : f32
    %678 = vector.broadcast %cst_208 : f32 to vector<16x32xf32>
    %679 = arith.cmpf ogt, %677, %678 : vector<16x32xf32>
    %cst_209 = arith.constant 2.000000e-01 : f32
    %680 = vector.broadcast %cst_209 : f32 to vector<16x32xf32>
    %681 = arith.mulf %680, %677 : vector<16x32xf32>
    %682 = arith.select %679, %677, %681 : vector<16x32xi1>, vector<16x32xf32>
    %c0_210 = arith.constant 0 : index
    %c0_211 = arith.constant 0 : index
    %683 = vector.load %arg15[%c0_210, %c0_211] : memref<32x16xf32, #tpu.memory_space<vmem>>, vector<32x16xf32>
    %cst_212 = arith.constant dense<0.000000e+00> : vector<16x16xf32>
    %684 = tpu.matmul %682, %683, %cst_212 {dimension_numbers = #tpu.dot_dimension_numbers<[1], [0], [0], [1], [0, 0, 1, 1], [], []>, precision = #tpu.contract_precision<fp32>} : vector<16x32xf32>, vector<32x16xf32>, vector<16x16xf32> -> vector<16x16xf32>
    %c0_213 = arith.constant 0 : index
    %c0_214 = arith.constant 0 : index
    %685 = vector.load %arg16[%c0_213, %c0_214] : memref<1x16xf32, #tpu.memory_space<vmem>>, vector<1x16xf32>
    %686 = vector.broadcast %685 : vector<1x16xf32> to vector<16x16xf32>
    %687 = arith.addf %684, %686 : vector<16x16xf32>
    %c0_215 = arith.constant 0 : index
    %c0_216 = arith.constant 0 : index
    %688 = vector.load %arg17[%c0_215, %c0_216] : memref<1x16xf32, #tpu.memory_space<vmem>>, vector<1x16xf32>
    %c0_217 = arith.constant 0 : index
    %c0_218 = arith.constant 0 : index
    %689 = vector.load %arg18[%c0_217, %c0_218] : memref<1x16xf32, #tpu.memory_space<vmem>>, vector<1x16xf32>
    %690 = vector.broadcast %620 : vector<16x1xf32> to vector<16x16xf32>
    %691 = arith.mulf %687, %690 : vector<16x16xf32>
    %cst_219 = arith.constant dense<0.000000e+00> : vector<16xf32>
    %692 = vector.multi_reduction <add>, %691, %cst_219 [0] : vector<16x16xf32> to vector<16xf32>
    %693 = vector.shape_cast %692 : vector<16xf32> to vector<1x16xf32>
    %cst_220 = arith.constant 2.500000e-01 : f32
    %694 = vector.broadcast %cst_220 : f32 to vector<1x16xf32>
    %695 = arith.mulf %693, %694 : vector<1x16xf32>
    %696 = vector.broadcast %695 : vector<1x16xf32> to vector<16x16xf32>
    %697 = arith.subf %687, %696 : vector<16x16xf32>
    %698 = arith.mulf %697, %697 : vector<16x16xf32>
    %699 = vector.broadcast %620 : vector<16x1xf32> to vector<16x16xf32>
    %700 = arith.mulf %698, %699 : vector<16x16xf32>
    %cst_221 = arith.constant dense<0.000000e+00> : vector<16xf32>
    %701 = vector.multi_reduction <add>, %700, %cst_221 [0] : vector<16x16xf32> to vector<16xf32>
    %702 = vector.shape_cast %701 : vector<16xf32> to vector<1x16xf32>
    %cst_222 = arith.constant 2.500000e-01 : f32
    %703 = vector.broadcast %cst_222 : f32 to vector<1x16xf32>
    %704 = arith.mulf %702, %703 : vector<1x16xf32>
    %cst_223 = arith.constant 9.99999974E-6 : f32
    %705 = vector.broadcast %cst_223 : f32 to vector<1x16xf32>
    %706 = arith.addf %704, %705 : vector<1x16xf32>
    %707 = math.rsqrt %706 : vector<1x16xf32>
    %708 = vector.broadcast %707 : vector<1x16xf32> to vector<16x16xf32>
    %709 = arith.mulf %697, %708 : vector<16x16xf32>
    %710 = vector.broadcast %688 : vector<1x16xf32> to vector<16x16xf32>
    %711 = arith.mulf %709, %710 : vector<16x16xf32>
    %712 = vector.broadcast %689 : vector<1x16xf32> to vector<16x16xf32>
    %713 = arith.addf %711, %712 : vector<16x16xf32>
    %cst_224 = arith.constant 0.000000e+00 : f32
    %714 = vector.broadcast %cst_224 : f32 to vector<16x80xf32>
    %715 = tpu.concatenate %713, %682, %714 in 1 : vector<16x16xf32>, vector<16x32xf32>, vector<16x80xf32> -> vector<16x128xf32>
    %c0_225 = arith.constant 0 : index
    %c0_226 = arith.constant 0 : index
    %716 = vector.load %arg20[%c0_225, %c0_226] : memref<16x128xf32, #tpu.memory_space<vmem>>, vector<16x128xf32>
    tpu.vector_store %arg20[%c0_225, %c0_226], %715 {strides = array<i32>} : memref<16x128xf32, #tpu.memory_space<vmem>>, vector<16x128xf32>,
    return
  }
  func.func @transform_0(%arg0: i32) -> (i32, i32, i32) {
    %c0_i32 = arith.constant 0 : i32
    %c0_i32_0 = arith.constant 0 : i32
    %c0_i32_1 = arith.constant 0 : i32
    %c0_i32_2 = arith.constant 0 : i32
    return %c0_i32, %c0_i32_0, %c0_i32_1 : i32, i32, i32
  }
  func.func @transform_1(%arg0: i32) -> (i32, i32) {
    %c0_i32 = arith.constant 0 : i32
    %c0_i32_0 = arith.constant 0 : i32
    %c0_i32_1 = arith.constant 0 : i32
    return %c0_i32, %c0_i32_0 : i32, i32
  }
  func.func @transform_2(%arg0: i32) -> (i32, i32) {
    %c0_i32 = arith.constant 0 : i32
    %c0_i32_0 = arith.constant 0 : i32
    %c0_i32_1 = arith.constant 0 : i32
    return %c0_i32, %c0_i32_0 : i32, i32
  }
  func.func @transform_3(%arg0: i32) -> (i32, i32) {
    %c0_i32 = arith.constant 0 : i32
    %c0_i32_0 = arith.constant 0 : i32
    %c0_i32_1 = arith.constant 0 : i32
    return %c0_i32, %c0_i32_0 : i32, i32
  }
  func.func @transform_4(%arg0: i32) -> (i32, i32) {
    %c0_i32 = arith.constant 0 : i32
    %c0_i32_0 = arith.constant 0 : i32
    %c0_i32_1 = arith.constant 0 : i32
    return %c0_i32, %c0_i32_0 : i32, i32
  }
  func.func @transform_5(%arg0: i32) -> (i32, i32) {
    %c0_i32 = arith.constant 0 : i32
    %c0_i32_0 = arith.constant 0 : i32
    %c0_i32_1 = arith.constant 0 : i32
    return %c0_i32, %c0_i32_0 : i32, i32
  }
  func.func @transform_6(%arg0: i32) -> (i32, i32) {
    %c0_i32 = arith.constant 0 : i32
    %c0_i32_0 = arith.constant 0 : i32
    %c0_i32_1 = arith.constant 0 : i32
    return %c0_i32, %c0_i32_0 : i32, i32
  }
  func.func @transform_7(%arg0: i32) -> (i32, i32) {
    %c0_i32 = arith.constant 0 : i32
    %c0_i32_0 = arith.constant 0 : i32
    %c0_i32_1 = arith.constant 0 : i32
    return %c0_i32, %c0_i32_0 : i32, i32
  }
  func.func @transform_8(%arg0: i32) -> (i32, i32) {
    %c0_i32 = arith.constant 0 : i32
    %c0_i32_0 = arith.constant 0 : i32
    %c0_i32_1 = arith.constant 0 : i32
    return %c0_i32, %c0_i32_0 : i32, i32
  }
  func.func @transform_9(%arg0: i32) -> (i32, i32) {
    %c0_i32 = arith.constant 0 : i32
    %c0_i32_0 = arith.constant 0 : i32
    %c0_i32_1 = arith.constant 0 : i32
    return %c0_i32, %c0_i32_0 : i32, i32
  }
  func.func @transform_10(%arg0: i32) -> (i32, i32) {
    %c0_i32 = arith.constant 0 : i32
    %c0_i32_0 = arith.constant 0 : i32
    %c0_i32_1 = arith.constant 0 : i32
    return %c0_i32, %c0_i32_0 : i32, i32
  }
  func.func @transform_11(%arg0: i32) -> (i32, i32) {
    %c0_i32 = arith.constant 0 : i32
    %c0_i32_0 = arith.constant 0 : i32
    %c0_i32_1 = arith.constant 0 : i32
    return %c0_i32, %c0_i32_0 : i32, i32
  }
  func.func @transform_12(%arg0: i32) -> (i32, i32) {
    %c0_i32 = arith.constant 0 : i32
    %c0_i32_0 = arith.constant 0 : i32
    %c0_i32_1 = arith.constant 0 : i32
    return %c0_i32, %c0_i32_0 : i32, i32
  }
  func.func @transform_13(%arg0: i32) -> (i32, i32) {
    %c0_i32 = arith.constant 0 : i32
    %c0_i32_0 = arith.constant 0 : i32
    %c0_i32_1 = arith.constant 0 : i32
    return %c0_i32, %c0_i32_0 : i32, i32
  }
  func.func @transform_14(%arg0: i32) -> (i32, i32) {
    %c0_i32 = arith.constant 0 : i32
    %c0_i32_0 = arith.constant 0 : i32
    %c0_i32_1 = arith.constant 0 : i32
    return %c0_i32, %c0_i32_0 : i32, i32
  }
  func.func @transform_15(%arg0: i32) -> (i32, i32) {
    %c0_i32 = arith.constant 0 : i32
    %c0_i32_0 = arith.constant 0 : i32
    %c0_i32_1 = arith.constant 0 : i32
    return %c0_i32, %c0_i32_0 : i32, i32
  }
  func.func @transform_16(%arg0: i32) -> (i32, i32) {
    %c0_i32 = arith.constant 0 : i32
    %c0_i32_0 = arith.constant 0 : i32
    %c0_i32_1 = arith.constant 0 : i32
    return %c0_i32, %c0_i32_0 : i32, i32
  }
  func.func @transform_17(%arg0: i32) -> (i32, i32) {
    %c0_i32 = arith.constant 0 : i32
    %c0_i32_0 = arith.constant 0 : i32
    %c0_i32_1 = arith.constant 0 : i32
    return %c0_i32, %c0_i32_0 : i32, i32
  }
  func.func @transform_18(%arg0: i32) -> (i32, i32) {
    %c0_i32 = arith.constant 0 : i32
    %c0_i32_0 = arith.constant 0 : i32
    %c0_i32_1 = arith.constant 0 : i32
    return %c0_i32, %c0_i32_0 : i32, i32
  }
  func.func @transform_19(%arg0: i32) -> (i32, i32) {
    %c0_i32 = arith.constant 0 : i32
    %c0_i32_0 = arith.constant 0 : i32
    %c0_i32_1 = arith.constant 0 : i32
    return %c0_i32, %c0_i32_0 : i32, i32
  }
}

</mosaic_0001>

<bundles_post_ra>
// kernel: tpu_custom_call.1
= control target key start
LH: loop header
LB: loop body
LE: loop exit
PB: predicated region body
PF: predicated region fallthrough
CT: control target
= control target key end

     0   :  { %s5614_s0 = inlined_call_operand.hbm [shape: f32[8,16,32], index: 0, kind: input, shape index: {}]   ;;  %s5615_s1 = inlined_call_operand.vmem [shape: f32[32,128], index: 1, kind: input, shape index: {}]   ;;  %s5616_s2 = inlined_call_operand.vmem [shape: f32[1,128], index: 2, kind: input, shape index: {}]   ;;  %s5617_s3 = inlined_call_operand.hbm [shape: bf16[32,256], index: 3, kind: input, shape index: {}]   ;;  %s5618_s4 = inlined_call_operand.vmem [shape: f32[1,128], index: 4, kind: input, shape index: {}]   ;;  %s5619_s5 = inlined_call_operand.hbm [shape: bf16[32,256], index: 5, kind: input, shape index: {}]   ;;  %s5620_s6 = inlined_call_operand.vmem [shape: f32[1,128], index: 6, kind: input, shape index: {}]   ;;  %s5621_s7 = inlined_call_operand.vmem [shape: bf16[32,128], index: 7, kind: input, shape index: {}]   ;;  %s5622_s8 = inlined_call_operand.vmem [shape: f32[1,32], index: 8, kind: input, shape index: {}]   ;;  %s5623_s9 = inlined_call_operand.vmem [shape: f32[1,32], index: 9, kind: input, shape index: {}]   ;;  %s5624_s10 = inlined_call_operand.hbm [shape: f32[32,32], index: 10, kind: input, shape index: {}]   ;;  %s5625_s11 = inlined_call_operand.vmem [shape: f32[1,32], index: 11, kind: input, shape index: {}]   ;;  %s5626_s12 = inlined_call_operand.vmem [shape: f32[1,32], index: 12, kind: input, shape index: {}]   ;;  %s5627_s13 = inlined_call_operand.vmem [shape: f32[1,32], index: 13, kind: input, shape index: {}]   ;;  %s5628_s14 = inlined_call_operand.vmem [shape: f32[32,16], index: 14, kind: input, shape index: {}]   ;;  %s5629_s15 = inlined_call_operand.vmem [shape: f32[1,16], index: 15, kind: input, shape index: {}]   ;;  %s5630_s16 = inlined_call_operand.vmem [shape: f32[1,16], index: 16, kind: input, shape index: {}]   ;;  %s5631_s17 = inlined_call_operand.vmem [shape: f32[1,16], index: 17, kind: input, shape index: {}]   ;;  %s5632_s18 = inlined_call_operand.hbm [shape: f32[16,256], index: 18, kind: output, shape index: {0}]   ;;  %s5633_s19 = inlined_call_operand.hbm [shape: f32[16,128], index: 19, kind: output, shape index: {1}]  }
   0x1   :  { %5638 = sst [smem:[#allocation23_spill]] %s5614_s0 }
   0x2   :  { %5639 = sst [smem:[#allocation24_spill]] %s5615_s1 }
   0x3   :  { %5640 = sst [smem:[#allocation25_spill]] %s5616_s2 }
   0x4   :  { %5641 = sst [smem:[#allocation26_spill]] %s5617_s3 }
   0x5   :  { %25 = vsyncpa [#allocation4], 0 }
   0x6   :  { %26 = vsyncpa [#allocation7], 0 }
   0x7   :  { %27 = vsyncpa [#allocation10], 0 }
   0x8   :  { %28 = vsyncpa [#allocation5], 0 }
   0x9   :  { %29 = vsyncpa [#allocation13], 0  ;;  %s5642_s20 = sld [smem:[#allocation26_spill]]  ;;  %s4282_s1 = smov [#allocation6]  }
   0xa   :  { %s53_s22 = sshll.u32 %s4282_s1, 4  ;;  %s5643_s24 = sld [smem:[#allocation23_spill]]  ;;  %s54_s22 = int_to_ptr.vmem [resolvable:$true] %s53_s22 }
   0xb   :  { %s4283_s3 = smov 128   ;;  %s4284_s26 = smov 8  }
   0xc   :  { %s4285_s27 = smov [#allocation3]   ;;  %s66_s30 = sshll.u32 %s5619_s5, 4  ;;  %s67_s30 = int_to_ptr.hbm [resolvable:$true] %s66_s30 }
   0xd   :  { %s36_s28 = sshll.u32 %s4285_s27, 4  ;;  %s87_s2 = sshll.u32 %s5624_s10, 4  ;;  %s37_s28 = int_to_ptr.vmem [resolvable:$true] %s36_s28  ;;  %s88_s2 = int_to_ptr.hbm [resolvable:$true] %s87_s2 }
   0xe   :  { %s4286_s23 = smov [#allocation8]  }
   0xf   :  { %s51_s21 = sshll.u32 %s5642_s20, 4  ;;  %s52_s21 = int_to_ptr.hbm [resolvable:$true] %s51_s21 }
  0x10   :  { %s34_s25 = sshll.u32 %s5643_s24, 4  ;;  %s68_s24 = sshll.u32 %s4286_s23, 4  ;;  %s35_s25 = int_to_ptr.hbm [resolvable:$true] %s34_s25  ;;  %s69_s24 = int_to_ptr.vmem [resolvable:$true] %s68_s24 }
  0x11   :  { %59 = dma.hbm_to_vmem [thread:$0]  %s52_s21, 512, %s54_s22, [#allocation7], %s4283_s3, %s4283_s3, %s4284_s26  }
  0x12   :  { %42 = dma.hbm_to_vmem [thread:$0]  %s35_s25, 2048, %s37_s28, [#allocation4], %s4283_s3, %s4283_s3, %s4284_s26  }
  0x13   :  { %74 = dma.hbm_to_vmem [thread:$0]  %s67_s30, 512, %s69_s24, [#allocation7], %s4283_s3, %s4283_s3, %s4284_s26  }
  0x14   :  { %s4287_s21 = smov [#allocation9]  }
  0x15   :  { %s89_s5 = sshll.u32 %s4287_s21, 4  ;;  %s90_s5 = int_to_ptr.vmem [resolvable:$true] %s89_s5 }
  0x16   :  { %95 = dma.hbm_to_vmem [thread:$0]  %s88_s2, 512, %s90_s5, [#allocation10], %s4283_s3, %s4283_s3, %s4284_s26  }
  0x17   :  { %4272 = dma.done.wait [#allocation4], 2048  }
  0x18   :  { %4273 = vsyncadd [#allocation4], 4294965248 }
  0x19   :  { %4274 = dma.done.wait [#allocation7], 1024  }
  0x1a   :  { %4275 = vsyncadd [#allocation7], 4294966272 }
  0x1b   :  { %4276 = dma.done.wait [#allocation10], 512  }
  0x1c   :  { %4277 = vsyncadd [#allocation10], 4294966784  ;;  %vm151_vm0 = vcmask 261120   ;;  %s5644_s25 = sld [smem:[#allocation24_spill]]  ;;  %v127_v7 = vld [vmem:[#allocation3] sm:$0xff]  ;;  %v128_v8 = vld [vmem:[#allocation3 + $0x8] sm:$0xff] }
  0x1d   :  { %v153_v10 = vsel %vm151_vm0, %v127_v7, 0  ;;  %v129_v15 = vld [vmem:[#allocation3 + $0x10] sm:$0xff]  ;;  %v156_v17 = vsel %vm151_vm0, %v128_v8, 0  ;;  %v3786_v24 = vld [vmem:[#allocation6 + $0x14] sm:$0xf0]  ;;  %v131_v49 = vld [vmem:[#allocation3 + $0x20] sm:$0xff] }
  0x1e   :  { %v4447_v14 = vand.u32 4294901760, %v153_v10  ;;  %v159_v18 = vsel %vm151_vm0, %v129_v15, 0  ;;  %v3671_v22 = vld [vmem:[#allocation6 + $0x10] sm:$0xf]  ;;  %v4455_v26 = vand.u32 4294901760, %v156_v17  ;;  %v130_v41 = vld [vmem:[#allocation3 + $0x18] sm:$0xff] }
  0x1f   :  { %v4460_v32 = vand.u32 4294901760, %v159_v18  ;;  %v4463_v37 = vor.u32 %v3786_v24, %v3671_v22  ;;  %v162_v45 = vsel %vm151_vm0, %v130_v41, 0  ;;  %v165_v52 = vsel %vm151_vm0, %v131_v49, 0  ;;  %v132_v56 = vld [vmem:[#allocation3 + $0x28] sm:$0xff]  ;;  %v133_v63 = vld [vmem:[#allocation3 + $0x30] sm:$0xff]  ;;  %v138_v41 = vld [vmem:[#allocation3 + $0x58] sm:$0xff] }
  0x20   :  { %v221_v20 = vsub.f32 %v153_v10, %v4447_v14  ;;  %v229_v31 = vsub.f32 %v156_v17, %v4455_v26  ;;  %v4470_v48 = vand.u32 4294901760, %v162_v45  ;;  %v4478_v55 = vand.u32 4294901760, %v165_v52  ;;  %v3784_v10 = vld [vmem:[#allocation6 + $0x4] sm:$0xf0]  ;;  %v135_v17 = vld [vmem:[#allocation3 + $0x40] sm:$0xff]  ;;  %s5645_s23 = sld [smem:[#allocation25_spill]] }
  0x21   :  { %v237_v44 = vsub.f32 %v159_v18, %v4460_v32  ;;  %v168_v59 = vsel %vm151_vm0, %v132_v56, 0  ;;  %v136_v24 = vld [vmem:[#allocation3 + $0x48] sm:$0xff]  ;;  %v139_v49 = vld [vmem:[#allocation3 + $0x60] sm:$0xff]  ;;  %s4289_s24 = smov 64   ;;  %s4290_s21 = smov 32   ;;  %vm2982_vm2 = vcmask 1048320  }
  0x22   :  { %v146_v0 = vld [vmem:[%s5644_s25 + $0x18] sm:$0xff]  ;;  %v145_v1 = vld [vmem:[%s5644_s25 + $0x10] sm:$0xff]  ;;  %v144_v2 = vld [vmem:[%s5644_s25 + $0x8] sm:$0xff]  ;;  %v222_v28 = vand.u32 4294901760, %v221_v20  ;;  %v230_v38 = vand.u32 4294901760, %v229_v31  ;;  %v245_v51 = vsub.f32 %v162_v45, %v4470_v48  ;;  %v253_v58 = vsub.f32 %v165_v52, %v4478_v55  ;;  %s4291_s30 = smov 96  }
  0x23   :  { %v4430_v3 = vand.u32 4294901760, %v146_v0  ;;  %v4432_v4 = vand.u32 4294901760, %v145_v1  ;;  %v4434_v5 = vand.u32 4294901760, %v144_v2  ;;  %v143_v6 = vld [vmem:[%s5644_s25] sm:$0xff]  ;;  %v238_v47 = vand.u32 4294901760, %v237_v44  ;;  %s4294_s29 = smov [#allocation11]  }
  0x24   :  { %v4439_v9 = vand.u32 4294901760, %v143_v6  ;;  %v223_v34 = vsub.f32 %v221_v20, %v222_v28  ;;  %v231_v43 = vsub.f32 %v229_v31, %v230_v38  ;;  %v246_v54 = vand.u32 4294901760, %v245_v51  ;;  %s4295_s0 = smov 256   ;;  %s3645_s2 = sshll.u32 %s5633_s19, 4  ;;  %s3646_s2 = int_to_ptr.hbm [resolvable:$true] %s3645_s2 }
  0x25   :  { %213 = vmatpush.msra.mxu0 %v4430_v3  ;;  %v362_v11 = vsub.f32 %v146_v0, %v4430_v3  ;;  %v368_v12 = vsub.f32 %v145_v1, %v4432_v4  ;;  %v374_v13 = vsub.f32 %v144_v2, %v4434_v5  ;;  %568 = vmatpush.msra.mxu3 %v4430_v3  ;;  %v254_v61 = vand.u32 4294901760, %v253_v58 }
  0x26   :  { %v380_v16 = vsub.f32 %v143_v6, %v4439_v9  ;;  %v224_v39 = vand.u32 4294901760, %v223_v34  ;;  %v232_v46 = vand.u32 4294901760, %v231_v43  ;;  %v239_v50 = vsub.f32 %v237_v44, %v238_v47  ;;  %v134_v6 = vld [vmem:[#allocation3 + $0x38] sm:$0xff] }
  0x27   :  { %464 = vmatpush.msra.mxu2 %v362_v11  ;;  %215 = vmatpush.msra.mxu0 %v4432_v4  ;;  %v363_v19 = vand.u32 4294901760, %v362_v11  ;;  %v369_v21 = vand.u32 4294901760, %v368_v12  ;;  %v375_v23 = vand.u32 4294901760, %v374_v13  ;;  %v247_v57 = vsub.f32 %v245_v51, %v246_v54 }
  0x28   :  { %570 = vmatpush.msra.mxu3 %v4432_v4  ;;  %v381_v25 = vand.u32 4294901760, %v380_v16  ;;  %v240_v53 = vand.u32 4294901760, %v239_v50  ;;  %v4484_v62 = vand.u32 4294901760, %v168_v59  ;;  %v255_v0 = vsub.f32 %v253_v58, %v254_v61 }
  0x29   :  { %467 = vmatpush.msra.mxu2 %v368_v12  ;;  %217 = vmatpush.msra.mxu0 %v4434_v5  ;;  %v364_v27 = vsub.f32 %v362_v11, %v363_v19  ;;  %v370_v29 = vsub.f32 %v368_v12, %v369_v21  ;;  %v376_v30 = vsub.f32 %v374_v13, %v375_v23  ;;  %v248_v60 = vand.u32 4294901760, %v247_v57  ;;  %v140_v57 = vld [vmem:[#allocation3 + $0x68] sm:$0xff] }
  0x2a   :  { %572 = vmatpush.msra.mxu3 %v4434_v5  ;;  %v382_v36 = vsub.f32 %v380_v16, %v381_v25  ;;  %v261_v1 = vsub.f32 %v168_v59, %v4484_v62  ;;  %v171_v2 = vsel %vm151_vm0, %v133_v63, 0  ;;  %v174_v11 = vsel %vm151_vm0, %v134_v6, 0 }
  0x2b   :  { %470 = vmatpush.msra.mxu2 %v374_v13  ;;  %219 = vmatpush.msra.mxu0 %v4439_v9  ;;  %v365_v33 = vand.u32 4294901760, %v364_v27  ;;  %v371_v35 = vand.u32 4294901760, %v370_v29  ;;  %v377_v40 = vand.u32 4294901760, %v376_v30  ;;  %v189_v52 = vsel %vm151_vm0, %v139_v49, 0 }
  0x2c   :  { %574 = vmatpush.msra.mxu3 %v4439_v9  ;;  %225 = vmatmul.f32.vlgmr.msra.gmra.mxu0 %v224_v39  ;;  %v383_v42 = vand.u32 4294901760, %v382_v36  ;;  %v4523_v56 = vand.u32 4294901760, %v189_v52  ;;  %vm2120_vm6 = vcmask 523264   ;;  %vm2123_vm7 = vcmask 785408  }
  0x2d   :  { %687 = vmatpush.msrb.mxu0 %v363_v19  ;;  %366 = vmatpush.msra.mxu1 %v365_v33  ;;  %v137_v33 = vld [vmem:[#allocation3 + $0x50] sm:$0xff]  ;;  %vm3563_vm13 = vcmask 130048  }
  0x2e   :  { %473 = vmatpush.msra.mxu2 %v380_v16  ;;  %578 = vmatmul.f32.vlgmr.msra.gmra.mxu3 %v222_v28  ;;  %v4498_v16 = vand.u32 4294901760, %v174_v11  ;;  %v180_v28 = vsel %vm151_vm0, %v136_v24, 0  ;;  %v183_v36 = vsel %vm151_vm0, %v137_v33, 0  ;;  %v317_v59 = vsub.f32 %v189_v52, %v4523_v56 }
  0x2f   :  { %476 = vmatmul.f32.vlgmr.msra.gmra.mxu2 %v221_v20  ;;  %372 = vmatpush.msra.mxu1 %v371_v35  ;;  %v177_v20 = vsel %vm151_vm0, %v135_v17, 0 }
  0x30   :  { %893 = vmatpush.bf16.msrb.mxu2 %v4463_v37  ;;  %691 = vmatpush.msrb.mxu0 %v369_v21  ;;  %v277_v19 = vsub.f32 %v174_v11, %v4498_v16  ;;  %v318_v63 = vand.u32 4294901760, %v317_v59 }
  0x31   :  { %378 = vmatpush.msra.mxu1 %v377_v40  ;;  %970 = vmatpush.bf16.msrb.mxu3 %v4463_v37  ;;  %v4513_v40 = vand.u32 4294901760, %v183_v36 }
  0x32   :  { %695 = vmatpush.msrb.mxu0 %v375_v23  ;;  %v278_v22 = vand.u32 4294901760, %v277_v19  ;;  %v4503_v23 = vand.u32 4294901760, %v177_v20 }
  0x33   :  { %384 = vmatpush.msra.mxu1 %v383_v42  ;;  %v301_v43 = vsub.f32 %v183_v36, %v4513_v40 }
  0x34   :  { %386 = vmatmul.f32.vlgmr.msra.gmra.mxu1 %v4447_v14  ;;  %699 = vmatpush.msrb.mxu0 %v381_v25  ;;  %v279_v25 = vsub.f32 %v277_v19, %v278_v22  ;;  %v285_v27 = vsub.f32 %v177_v20, %v4503_v23 }
  0x35   :  { %778 = vmatpush.msrb.mxu1 %v4430_v3  ;;  %233 = vmatmul.f32.gmra.mxu0 %v232_v46  ;;  %v256_v3 = vand.u32 4294901760, %v255_v0  ;;  %v302_v46 = vand.u32 4294901760, %v301_v43 }
  0x36   :  { %584 = vmatmul.f32.gmra.mxu3 %v230_v38  ;;  %v280_v29 = vand.u32 4294901760, %v279_v25  ;;  %v286_v30 = vand.u32 4294901760, %v285_v27 }
  0x37   :  { %481 = vmatmul.f32.gmra.mxu2 %v229_v31  ;;  %780 = vmatpush.msrb.mxu1 %v4432_v4  ;;  %v262_v4 = vand.u32 4294901760, %v261_v1  ;;  %v4508_v31 = vand.u32 4294901760, %v180_v28  ;;  %v303_v50 = vsub.f32 %v301_v43, %v302_v46 }
  0x38   :  { %v287_v34 = vsub.f32 %v285_v27, %v286_v30 }
  0x39   :  { %782 = vmatpush.msrb.mxu1 %v4434_v5  ;;  %v4489_v5 = vand.u32 4294901760, %v171_v2  ;;  %v263_v7 = vsub.f32 %v261_v1, %v262_v4  ;;  %v293_v35 = vsub.f32 %v180_v28, %v4508_v31  ;;  %v5636_v28 = vmov 0  }
  0x3a   :  { %v288_v38 = vand.u32 4294901760, %v287_v34 }
  0x3b   :  { %784 = vmatpush.msrb.mxu1 %v4439_v9  ;;  %v269_v8 = vsub.f32 %v171_v2, %v4489_v5  ;;  %v3667_v9 = vld [vmem:[#allocation6] sm:$0xf]  ;;  %v264_v13 = vand.u32 4294901760, %v263_v7  ;;  %v294_v39 = vand.u32 4294901760, %v293_v35  ;;  %v319_v2 = vsub.f32 %v317_v59, %v318_v63 }
  0x3c   :  { %390 = vmatmul.f32.gmra.mxu1 %v4455_v26  ;;  %v4494_v12 = vor.u32 %v3784_v10, %v3667_v9  ;;  %v142_v9 = vld [vmem:[#allocation3 + $0x78] sm:$0xff] }
  0x3d   :  { %241 = vmatmul.f32.gmra.mxu0 %v240_v53  ;;  %v270_v15 = vand.u32 4294901760, %v269_v8  ;;  %v295_v42 = vsub.f32 %v293_v35, %v294_v39  ;;  %v304_v53 = vand.u32 4294901760, %v303_v50  ;;  %v320_v6 = vand.u32 4294901760, %v319_v2 }
  0x3e   :  { %590 = vmatmul.f32.gmra.mxu3 %v238_v47  ;;  %894 = vmatpush.bf16.msrb.mxu2 %v4494_v12 }
  0x3f   :  { %486 = vmatmul.f32.gmra.mxu2 %v237_v44  ;;  %971 = vmatpush.bf16.msrb.mxu3 %v4494_v12  ;;  %v271_v18 = vsub.f32 %v269_v8, %v270_v15  ;;  %v186_v44 = vsel %vm151_vm0, %v138_v41, 0  ;;  %v296_v45 = vand.u32 4294901760, %v295_v42 }
  0x40   :  { %v4518_v47 = vand.u32 4294901760, %v186_v44 }
  0x41   :  { %v272_v21 = vand.u32 4294901760, %v271_v18 }
  0x44   :  { %394 = vmatmul.f32.gmra.mxu1 %v4460_v32 }
  0x45   :  { %249 = vmatmul.f32.gmra.mxu0 %v248_v60  ;;  %v192_v60 = vsel %vm151_vm0, %v140_v57, 0 }
  0x46   :  { %596 = vmatmul.f32.gmra.mxu3 %v246_v54  ;;  %v4528_v0 = vand.u32 4294901760, %v192_v60 }
  0x47   :  { %491 = vmatmul.f32.gmra.mxu2 %v245_v51  ;;  %v309_v51 = vsub.f32 %v186_v44, %v4518_v47 }
  0x49   :  { %v310_v54 = vand.u32 4294901760, %v309_v51 }
  0x4c   :  { %398 = vmatmul.f32.gmra.mxu1 %v4470_v48 }
  0x4d   :  { %257 = vmatmul.f32.gmra.mxu0 %v256_v3  ;;  %v325_v3 = vsub.f32 %v192_v60, %v4528_v0 }
  0x4e   :  { %602 = vmatmul.f32.gmra.mxu3 %v254_v61 }
  0x4f   :  { %496 = vmatmul.f32.gmra.mxu2 %v253_v58  ;;  %v311_v58 = vsub.f32 %v309_v51, %v310_v54  ;;  %v326_v7 = vand.u32 4294901760, %v325_v3 }
  0x51   :  { %v312_v61 = vand.u32 4294901760, %v311_v58  ;;  %v327_v10 = vsub.f32 %v325_v3, %v326_v7 }
  0x54   :  { %402 = vmatmul.f32.gmra.mxu1 %v4478_v55 }
  0x55   :  { %265 = vmatmul.f32.gmra.mxu0 %v264_v13  ;;  %v198_v13 = vsel %vm151_vm0, %v142_v9, 0 }
  0x56   :  { %608 = vmatmul.f32.gmra.mxu3 %v262_v4  ;;  %v4538_v18 = vand.u32 4294901760, %v198_v13 }
  0x57   :  { %501 = vmatmul.f32.gmra.mxu2 %v261_v1  ;;  %v141_v1 = vld [vmem:[#allocation3 + $0x70] sm:$0xff] }
  0x58   :  { %v195_v4 = vsel %vm151_vm0, %v141_v1, 0  ;;  %v341_v20 = vsub.f32 %v198_v13, %v4538_v18 }
  0x5c   :  { %406 = vmatmul.f32.gmra.mxu1 %v4484_v62 }
  0x5d   :  { %273 = vmatmul.f32.gmra.mxu0 %v272_v21 }
  0x5e   :  { %614 = vmatmul.f32.gmra.mxu3 %v270_v15  ;;  %v328_v15 = vand.u32 4294901760, %v327_v10 }
  0x5f   :  { %506 = vmatmul.f32.gmra.mxu2 %v269_v8  ;;  %v4533_v8 = vand.u32 4294901760, %v195_v4 }
  0x61   :  { %v333_v11 = vsub.f32 %v195_v4, %v4533_v8 }
  0x63   :  { %v334_v17 = vand.u32 4294901760, %v333_v11 }
  0x64   :  { %410 = vmatmul.f32.gmra.mxu1 %v4489_v5 }
  0x65   :  { %281 = vmatmul.f32.gmra.mxu0 %v280_v29 }
  0x66   :  { %620 = vmatmul.f32.gmra.mxu3 %v278_v22  ;;  %v342_v22 = vand.u32 4294901760, %v341_v20 }
  0x67   :  { %511 = vmatmul.f32.gmra.mxu2 %v277_v19  ;;  %v335_v19 = vsub.f32 %v333_v11, %v334_v17 }
  0x68   :  { %v343_v24 = vsub.f32 %v341_v20, %v342_v22 }
  0x69   :  { %v336_v21 = vand.u32 4294901760, %v335_v19 }
  0x6a   :  { %v344_v25 = vand.u32 4294901760, %v343_v24 }
  0x6c   :  { %414 = vmatmul.f32.gmra.mxu1 %v4498_v16 }
  0x6d   :  { %289 = vmatmul.f32.gmra.mxu0 %v288_v38 }
  0x6e   :  { %626 = vmatmul.f32.gmra.mxu3 %v286_v30 }
  0x6f   :  { %516 = vmatmul.f32.gmra.mxu2 %v285_v27 }
  0x74   :  { %418 = vmatmul.f32.gmra.mxu1 %v4503_v23 }
  0x75   :  { %297 = vmatmul.f32.gmra.mxu0 %v296_v45 }
  0x76   :  { %632 = vmatmul.f32.gmra.mxu3 %v294_v39  ;;  %v4568_v39 = vld [vmem:[%s5645_s23] ss:$0 sm:$0xff] }
  0x77   :  { %521 = vmatmul.f32.gmra.mxu2 %v293_v35 }
  0x7c   :  { %422 = vmatmul.f32.gmra.mxu1 %v4508_v31 }
  0x7d   :  { %305 = vmatmul.f32.gmra.mxu0 %v304_v53 }
  0x7e   :  { %638 = vmatmul.f32.gmra.mxu3 %v302_v46 }
  0x7f   :  { %526 = vmatmul.f32.gmra.mxu2 %v301_v43 }
  0x84   :  { %426 = vmatmul.f32.gmra.mxu1 %v4513_v40 }
  0x85   :  { %313 = vmatmul.f32.gmra.mxu0 %v312_v61 }
  0x86   :  { %644 = vmatmul.f32.gmra.mxu3 %v310_v54 }
  0x87   :  { %531 = vmatmul.f32.gmra.mxu2 %v309_v51 }
  0x8c   :  { %430 = vmatmul.f32.gmra.mxu1 %v4518_v47 }
  0x8d   :  { %321 = vmatmul.f32.gmra.mxu0 %v320_v6 }
  0x8e   :  { %650 = vmatmul.f32.gmra.mxu3 %v318_v63 }
  0x8f   :  { %536 = vmatmul.f32.gmra.mxu2 %v317_v59 }
  0x94   :  { %434 = vmatmul.f32.gmra.mxu1 %v4523_v56 }
  0x95   :  { %329 = vmatmul.f32.gmra.mxu0 %v328_v15 }
  0x96   :  { %656 = vmatmul.f32.gmra.mxu3 %v326_v7 }
  0x97   :  { %541 = vmatmul.f32.gmra.mxu2 %v325_v3 }
  0x9c   :  { %438 = vmatmul.f32.gmra.mxu1 %v4528_v0 }
  0x9d   :  { %337 = vmatmul.f32.gmra.mxu0 %v336_v21 }
  0x9e   :  { %662 = vmatmul.f32.gmra.mxu3 %v334_v17 }
  0x9f   :  { %546 = vmatmul.f32.gmra.mxu2 %v333_v11 }
  0xa4   :  { %442 = vmatmul.f32.gmra.mxu1 %v4533_v8 }
  0xa5   :  { %345 = vmatmul.f32.gmra.mxu0 %v344_v25 }
  0xa6   :  { %668 = vmatmul.f32.gmra.mxu3 %v342_v22 }
  0xa7   :  { %551 = vmatmul.f32.gmra.mxu2 %v341_v20 }
  0xa9   :  { %v4544_v27 = vpop.f32.mrf.mxu0 }
  0xac   :  { %446 = vmatmul.f32.gmra.mxu1 %v4538_v18 }
  0xad   :  { %701 = vmatmul.f32.vlgmr.msrb.gmra.mxu0 %v4447_v14 }
  0xaf   :  { %895 = vmatmul.bf16.vlgmr.msrb.gmra.mxu2 %v5636_v28 }
  0xb1   :  { %v4549_v29 = vpop.f32.mrf.mxu1  ;;  %v4553_v33 = vpop.f32.mrf.mxu3 }
  0xb2   :  { %v4551_v30 = vpop.f32.mrf.mxu2  ;;  %v4555_v34 = vpop.f32.mrf.mxu0 }
  0xb4   :  { %786 = vmatmul.f32.vlgmr.msrb.gmra.mxu1 %v4447_v14 }
  0xb5   :  { %705 = vmatmul.f32.gmra.mxu0 %v4455_v26 }
  0xb9   :  { %v4559_v35 = vpop.f32.mrf.mxu1  ;;  %v4563_v38 = vpop.f32.mrf.mxu3 }
  0xba   :  { %v4561_v36 = vpop.f32.mrf.mxu2  ;;  %v242_v41 = vpop.f32.mrf.mxu0 }
  0xbb   :  { %v243_v42 = vadd.f32 %v4568_v39, %v242_v41 }
  0xbc   :  { %790 = vmatmul.f32.gmra.mxu1 %v4455_v26 }
  0xbd   :  { %709 = vmatmul.f32.gmra.mxu0 %v4460_v32 }
  0xc1   :  { %v395_v14 = vpop.f32.mrf.mxu1  ;;  %v591_v45 = vpop.f32.mrf.mxu3 }
  0xc2   :  { %v487_v43 = vpop.f32.mrf.mxu2  ;;  %v396_v44 = vadd.f32 %v395_v14, %v243_v42  ;;  %v4573_v49 = vpop.f32.mrf.mxu0 }
  0xc4   :  { %v488_v46 = vadd.f32 %v487_v43, %v396_v44  ;;  %794 = vmatmul.f32.gmra.mxu1 %v4460_v32 }
  0xc5   :  { %713 = vmatmul.f32.gmra.mxu0 %v4470_v48 }
  0xc6   :  { %v4576_v50 = vadd.f32 %v591_v45, %v488_v46 }
  0xc9   :  { %v4579_v51 = vpop.f32.mrf.mxu1  ;;  %v4583_v52 = vpop.f32.mrf.mxu3 }
  0xca   :  { %v4581_v26 = vpop.f32.mrf.mxu2  ;;  %v258_v53 = vpop.f32.mrf.mxu0 }
  0xcb   :  { %v259_v54 = vadd.f32 %v4568_v39, %v258_v53 }
  0xcc   :  { %798 = vmatmul.f32.gmra.mxu1 %v4470_v48 }
  0xcd   :  { %717 = vmatmul.f32.gmra.mxu0 %v4478_v55 }
  0xd1   :  { %v403_v57 = vpop.f32.mrf.mxu1  ;;  %v603_v59 = vpop.f32.mrf.mxu3 }
  0xd2   :  { %v497_v58 = vpop.f32.mrf.mxu2  ;;  %v404_v32 = vadd.f32 %v403_v57, %v259_v54  ;;  %v4588_v61 = vpop.f32.mrf.mxu0 }
  0xd4   :  { %v498_v60 = vadd.f32 %v497_v58, %v404_v32  ;;  %802 = vmatmul.f32.gmra.mxu1 %v4478_v55 }
  0xd5   :  { %721 = vmatmul.f32.gmra.mxu0 %v4484_v62 }
  0xd6   :  { %v4591_v63 = vadd.f32 %v603_v59, %v498_v60 }
  0xd9   :  { %v4594_v1 = vpop.f32.mrf.mxu1  ;;  %v4598_v2 = vpop.f32.mrf.mxu3 }
  0xda   :  { %v4596_v48 = vpop.f32.mrf.mxu2  ;;  %v274_v3 = vpop.f32.mrf.mxu0 }
  0xdb   :  { %v275_v4 = vadd.f32 %v4568_v39, %v274_v3 }
  0xdc   :  { %806 = vmatmul.f32.gmra.mxu1 %v4484_v62 }
  0xdd   :  { %725 = vmatmul.f32.gmra.mxu0 %v4489_v5 }
  0xe1   :  { %v411_v6 = vpop.f32.mrf.mxu1  ;;  %v615_v9 = vpop.f32.mrf.mxu3 }
  0xe2   :  { %v507_v7 = vpop.f32.mrf.mxu2  ;;  %v412_v55 = vadd.f32 %v411_v6, %v275_v4  ;;  %v4603_v11 = vpop.f32.mrf.mxu0 }
  0xe4   :  { %v508_v10 = vadd.f32 %v507_v7, %v412_v55  ;;  %810 = vmatmul.f32.gmra.mxu1 %v4489_v5 }
  0xe5   :  { %729 = vmatmul.f32.gmra.mxu0 %v4498_v16 }
  0xe6   :  { %v4606_v13 = vadd.f32 %v615_v9, %v508_v10 }
  0xe9   :  { %v4609_v15 = vpop.f32.mrf.mxu1  ;;  %v4613_v17 = vpop.f32.mrf.mxu3 }
  0xea   :  { %v4611_v62 = vpop.f32.mrf.mxu2  ;;  %v290_v19 = vpop.f32.mrf.mxu0 }
  0xeb   :  { %v291_v20 = vadd.f32 %v4568_v39, %v290_v19 }
  0xec   :  { %814 = vmatmul.f32.gmra.mxu1 %v4498_v16 }
  0xed   :  { %733 = vmatmul.f32.gmra.mxu0 %v4503_v23 }
  0xf1   :  { %v419_v21 = vpop.f32.mrf.mxu1  ;;  %v627_v24 = vpop.f32.mrf.mxu3 }
  0xf2   :  { %v517_v22 = vpop.f32.mrf.mxu2  ;;  %v420_v5 = vadd.f32 %v419_v21, %v291_v20  ;;  %v4618_v41 = vpop.f32.mrf.mxu0 }
  0xf4   :  { %v518_v25 = vadd.f32 %v517_v22, %v420_v5  ;;  %818 = vmatmul.f32.gmra.mxu1 %v4503_v23 }
  0xf5   :  { %737 = vmatmul.f32.gmra.mxu0 %v4508_v31 }
  0xf6   :  { %v4621_v42 = vadd.f32 %v627_v24, %v518_v25 }
  0xf9   :  { %v4624_v14 = vpop.f32.mrf.mxu1  ;;  %v4628_v43 = vpop.f32.mrf.mxu3 }
  0xfa   :  { %v4626_v16 = vpop.f32.mrf.mxu2  ;;  %v306_v44 = vpop.f32.mrf.mxu0 }
  0xfb   :  { %v307_v45 = vadd.f32 %v4568_v39, %v306_v44 }
  0xfc   :  { %822 = vmatmul.f32.gmra.mxu1 %v4508_v31 }
  0xfd   :  { %741 = vmatmul.f32.gmra.mxu0 %v4513_v40 }
 0x101   :  { %v427_v46 = vpop.f32.mrf.mxu1  ;;  %v639_v54 = vpop.f32.mrf.mxu3 }
 0x102   :  { %v527_v53 = vpop.f32.mrf.mxu2  ;;  %v428_v23 = vadd.f32 %v427_v46, %v307_v45  ;;  %v4633_v58 = vpop.f32.mrf.mxu0 }
 0x104   :  { %v528_v57 = vadd.f32 %v527_v53, %v428_v23  ;;  %826 = vmatmul.f32.gmra.mxu1 %v4513_v40 }
 0x105   :  { %745 = vmatmul.f32.gmra.mxu0 %v4518_v47 }
 0x106   :  { %v4636_v32 = vadd.f32 %v639_v54, %v528_v57 }
 0x109   :  { %v4639_v59 = vpop.f32.mrf.mxu1  ;;  %v4643_v60 = vpop.f32.mrf.mxu3 }
 0x10a   :  { %v4641_v31 = vpop.f32.mrf.mxu2  ;;  %v322_v3 = vpop.f32.mrf.mxu0 }
 0x10b   :  { %v323_v4 = vadd.f32 %v4568_v39, %v322_v3 }
 0x10c   :  { %830 = vmatmul.f32.gmra.mxu1 %v4518_v47 }
 0x10d   :  { %749 = vmatmul.f32.gmra.mxu0 %v4523_v56 }
 0x111   :  { %v435_v6 = vpop.f32.mrf.mxu1  ;;  %v651_v55 = vpop.f32.mrf.mxu3 }
 0x112   :  { %v537_v7 = vpop.f32.mrf.mxu2  ;;  %v436_v40 = vadd.f32 %v435_v6, %v323_v4  ;;  %v4648_v10 = vpop.f32.mrf.mxu0 }
 0x114   :  { %v538_v9 = vadd.f32 %v537_v7, %v436_v40  ;;  %834 = vmatmul.f32.gmra.mxu1 %v4523_v56  ;;  %v227_v56 = vadd.f32 %v4568_v39, %v4544_v27  ;;  %v235_v27 = vadd.f32 %v4568_v39, %v4555_v34 }
 0x115   :  { %753 = vmatmul.f32.gmra.mxu0 %v4528_v0 }
 0x116   :  { %v4651_v19 = vadd.f32 %v651_v55, %v538_v9  ;;  %v388_v23 = vadd.f32 %v4549_v29, %v227_v56  ;;  %v392_v29 = vadd.f32 %v4559_v35, %v235_v27 }
 0x118   :  { %v478_v3 = vadd.f32 %v4551_v30, %v388_v23  ;;  %v483_v55 = vadd.f32 %v4561_v36, %v392_v29 }
 0x119   :  { %v4654_v20 = vpop.f32.mrf.mxu1  ;;  %v4658_v21 = vpop.f32.mrf.mxu3 }
 0x11a   :  { %v4656_v47 = vpop.f32.mrf.mxu2  ;;  %v338_v22 = vpop.f32.mrf.mxu0  ;;  %v586_v30 = vadd.f32 %v4563_v38, %v483_v55 }
 0x11b   :  { %v339_v5 = vadd.f32 %v4568_v39, %v338_v22 }
 0x11c   :  { %838 = vmatmul.f32.gmra.mxu1 %v4528_v0 }
 0x11d   :  { %757 = vmatmul.f32.gmra.mxu0 %v4533_v8 }
 0x121   :  { %v443_v24 = vpop.f32.mrf.mxu1  ;;  %v663_v45 = vpop.f32.mrf.mxu3 }
 0x122   :  { %v547_v25 = vpop.f32.mrf.mxu2  ;;  %v444_v44 = vadd.f32 %v443_v24, %v339_v5  ;;  %v4665_v53 = vpop.f32.mrf.mxu0 }
 0x123   :  { %5646 = vst [vmem:[#allocation19_spill] sm:$0xff] %v4665_v53  ;;  %v331_v53 = vadd.f32 %v4568_v39, %v4648_v10 }
 0x124   :  { %v548_v46 = vadd.f32 %v547_v25, %v444_v44  ;;  %842 = vmatmul.f32.gmra.mxu1 %v4533_v8  ;;  %v580_v8 = vadd.f32 %v4553_v33, %v478_v3 }
 0x125   :  { %761 = vmatmul.f32.gmra.mxu0 %v4538_v18 }
 0x126   :  { %v4669_v54 = vadd.f32 %v663_v45, %v548_v46 }
 0x129   :  { %v4672_v0 = vpop.f32.mrf.mxu1 }
 0x12a   :  { %5647 = vst [vmem:[#allocation20_spill] sm:$0xff] %v4672_v0  ;;  %v4674_v57 = vpop.f32.mrf.mxu2  ;;  %v702_v4 = vpop.f32.mrf.mxu0 }
 0x12b   :  { %5648 = vst [vmem:[#allocation21_spill] sm:$0xff] %v4674_v57  ;;  %v703_v6 = vadd.f32 %v702_v4, %v580_v8 }
 0x12c   :  { %846 = vmatmul.f32.gmra.mxu1 %v4538_v18 }
 0x131   :  { %v787_v7 = vpop.f32.mrf.mxu1 }
 0x132   :  { %v896_v40 = vpop.f32.mrf.mxu2  ;;  %v788_v9 = vadd.f32 %v787_v7, %v703_v6  ;;  %v706_v5 = vpop.f32.mrf.mxu0 }
 0x133   :  { %v707_v24 = vadd.f32 %v706_v5, %v586_v30  ;;  %v315_v5 = vadd.f32 %v4568_v39, %v4633_v58 }
 0x134   :  { %v903_v22 = vadd.f32 %v896_v40, %v788_v9 }
 0x136   :  { %3829 = vtanh.f32 %v903_v22 }
 0x139   :  { %v791_v34 = vpop.f32.mrf.mxu1 }
 0x13a   :  { %v792_v25 = vadd.f32 %v791_v34, %v707_v24  ;;  %v898_v56 = vpop.f32.mrf.mxu2  ;;  %v4684_v33 = vpop.f32.mrf.mxu0  ;;  %v432_v34 = vadd.f32 %v4639_v59, %v315_v5  ;;  %v440_v59 = vadd.f32 %v4654_v20, %v331_v53 }
 0x13c   :  { %v3830_v18 = vpop.eup %3829  ;;  %v904_v44 = vadd.f32 %v898_v56, %v792_v25  ;;  %v533_v56 = vadd.f32 %v4641_v31, %v432_v34  ;;  %v543_v31 = vadd.f32 %v4656_v47, %v440_v59 }
 0x13d   :  { %919 = vrot.lane.b32.xlu0 %v3830_v18, %s4289_s24 }
 0x13e   :  { %3831 = vtanh.f32 %v904_v44  ;;  %v646_v28 = vadd.f32 %v4643_v60, %v533_v56  ;;  %v658_v60 = vadd.f32 %v4658_v21, %v543_v31  ;;  %v906_v20 = vmul.f32 0.5, %v904_v44 }
 0x141   :  { %v4687_v35 = vpop.f32.mrf.mxu1 }
 0x142   :  { %v4689_v45 = vpop.f32.mrf.mxu0 }
 0x144   :  { %v3832_v36 = vpop.eup %3831 }
 0x145   :  { %921 = vrot.lane.b32.xlu0 %v3832_v36, %s4289_s24 }
 0x149   :  { %v4692_v38 = vpop.f32.mrf.mxu1 }
 0x14a   :  { %v4694_v46 = vpop.f32.mrf.mxu0 }
 0x151   :  { %v4696_v23 = vpop.f32.mrf.mxu1 }
 0x152   :  { %v4698_v3 = vpop.f32.mrf.mxu0 }
 0x159   :  { %v4700_v27 = vpop.f32.mrf.mxu1 }
 0x15a   :  { %v4702_v4 = vpop.f32.mrf.mxu0 }
 0x161   :  { %v4704_v8 = vpop.f32.mrf.mxu1 }
 0x162   :  { %v4706_v29 = vpop.f32.mrf.mxu0 }
 0x169   :  { %v4708_v6 = vpop.f32.mrf.mxu1 }
 0x16a   :  { %v4710_v7 = vpop.f32.mrf.mxu0 }
 0x171   :  { %v4712_v40 = vpop.f32.mrf.mxu1 }
 0x172   :  { %v4714_v55 = vpop.f32.mrf.mxu0 }
 0x179   :  { %v4716_v9 = vpop.f32.mrf.mxu1 }
 0x17a   :  { %5649 = vst [vmem:[#allocation22_spill] sm:$0xff] %v4716_v9  ;;  %v742_v30 = vpop.f32.mrf.mxu0 }
 0x17b   :  { %v743_v24 = vadd.f32 %v742_v30, %v4636_v32 }
 0x181   :  { %v827_v25 = vpop.f32.mrf.mxu1 }
 0x182   :  { %v4723_v18 = vadd.f32 %v827_v25, %v743_v24  ;;  %v746_v36 = vpop.f32.mrf.mxu0 }
 0x183   :  { %v747_v57 = vadd.f32 %v746_v36, %v646_v28 }
 0x189   :  { %v831_v0 = vpop.f32.mrf.mxu1 }
 0x18a   :  { %v4728_v9 = vadd.f32 %v831_v0, %v747_v57  ;;  %v750_v58 = vpop.f32.mrf.mxu0  ;;  %v905_v0 = vmul.f32 0.5, %v903_v22 }
 0x18b   :  { %v751_v32 = vadd.f32 %v750_v58, %v4651_v19 }
 0x18c   :  { %3833 = vtanh.f32 %v905_v0 }
 0x18d   :  { %3835 = vtanh.f32 %v906_v20  ;;  %v3783_v20 = vld [vmem:[#allocation6 + $0x4] sm:$0xf] }
 0x191   :  { %v835_v5 = vpop.f32.mrf.mxu1 }
 0x192   :  { %v4733_v30 = vadd.f32 %v835_v5, %v751_v32  ;;  %v754_v24 = vpop.f32.mrf.mxu0  ;;  %v3834_v53 = vpop.eup %3833 }
 0x193   :  { %v755_v28 = vadd.f32 %v754_v24, %v658_v60  ;;  %v909_v47 = vadd.f32 1.0, %v3834_v53  ;;  %v3836_v58 = vpop.eup %3835 }
 0x194   :  { %v910_v59 = vadd.f32 1.0, %v3836_v58 }
 0x195   :  { %v911_v36 = vmul.f32 0.5, %v909_v47  ;;  %v3673_v47 = vld [vmem:[#allocation6 + $0x8] sm:$0xf0] }
 0x196   :  { %v912_v5 = vmul.f32 0.5, %v910_v59  ;;  %v4754_v58 = vor.u32 %v3783_v20, %v3673_v47  ;;  %v711_v47 = vadd.f32 %v4684_v33, %v4576_v50 }
 0x198   :  { %v916_v44 = vmul.f32 0.0, %v912_v5 }
 0x199   :  { %v839_v34 = vpop.f32.mrf.mxu1 }
 0x19a   :  { %v4736_v25 = vadd.f32 %v839_v34, %v755_v28  ;;  %v758_v10 = vpop.f32.mrf.mxu0 }
 0x19b   :  { %v759_v57 = vadd.f32 %v758_v10, %v4669_v54  ;;  %v915_v54 = vmul.f32 0.0, %v911_v36 }
 0x1a1   :  { %v843_v19 = vpop.f32.mrf.mxu1 }
 0x1a2   :  { %v4739_v56 = vadd.f32 %v843_v19, %v759_v57  ;;  %v3785_v57 = vld [vmem:[#allocation6 + $0x14] sm:$0xf]  ;;  %v3677_v19 = vld [vmem:[#allocation6 + $0x18] sm:$0xf0] }
 0x1a3   :  { %v4751_v53 = vor.u32 %v3785_v57, %v3677_v19  ;;  %v251_v57 = vadd.f32 %v4568_v39, %v4573_v49  ;;  %v4779_v19 = vpop.f32.mrf.mxu3 }
 0x1a5   :  { %984 = vmatpush.bf16.msra.mxu2 %v4751_v53  ;;  %v400_v20 = vadd.f32 %v4579_v51, %v251_v57  ;;  %v4793_v51 = vld [vmem:[%s5618_s4] ss:$0 sm:$0xff] }
 0x1a9   :  { %985 = vmatpush.bf16.msra.mxu2 %v4754_v58 }
 0x1ad   :  { %1135 = vmatpush.bf16.msrb.mxu2 %v4463_v37 }
 0x1af   :  { %v920_v32 = vpop.permute.xlu0 %919 }
 0x1b0   :  { %v925_v21 = vmul.f32 %v920_v32, %v911_v36 }
 0x1b1   :  { %1136 = vmatpush.bf16.msrb.mxu2 %v4494_v12 }
 0x1b2   :  { %929 = vrot.lane.b32.xlu1 %v925_v21, %s4290_s21 }
 0x1b7   :  { %v922_v22 = vpop.permute.xlu0 %921 }
 0x1b8   :  { %v926_v31 = vmul.f32 %v922_v22, %v912_v5 }
 0x1ba   :  { %931 = vrot.lane.b32.xlu1 %v926_v31, %s4290_s21 }
 0x224   :  { %v930_v24 = vpop.permute.xlu1 %929 }
 0x225   :  { %v4743_v60 = vadd.f32 %v930_v24, %v915_v54  ;;  %v3689_v54 = vld [vmem:[#allocation8 + $0x10] sm:$0xf]  ;;  %v3790_v24 = vld [vmem:[#allocation8 + $0x14] sm:$0xf0] }
 0x227   :  { %3837 = vtanh.f32 %v4743_v60 }
 0x22c   :  { %v932_v28 = vpop.permute.xlu1 %931 }
 0x22d   :  { %v3838_v34 = vpop.eup %3837  ;;  %v4746_v10 = vadd.f32 %v932_v28, %v916_v44  ;;  %v3685_v44 = vld [vmem:[#allocation8] sm:$0xf]  ;;  %v4760_v28 = vor.u32 %v3790_v24, %v3689_v54 }
 0x22e   :  { %941 = vrot.lane.b32.xlu2 %v3838_v34, %s4289_s24  ;;  %v3788_v34 = vld [vmem:[#allocation8 + $0x4] sm:$0xf0] }
 0x22f   :  { %3839 = vtanh.f32 %v4746_v10  ;;  %1014 = vmatpush.bf16.msra.mxu3 %v4760_v28  ;;  %1666 = vmatpush.bf16.msra.mxu0 %v4760_v28 }
 0x235   :  { %v3840_v0 = vpop.eup %3839 }
 0x236   :  { %943 = vrot.lane.b32.xlu2 %v3840_v0, %s4289_s24  ;;  %v4763_v0 = vor.u32 %v3788_v34, %v3685_v44 }
 0x238   :  { %1015 = vmatpush.bf16.msra.mxu3 %v4763_v0  ;;  %1667 = vmatpush.bf16.msra.mxu0 %v4763_v0 }
 0x23c   :  { %1883 = vmatpush.bf16.msrb.mxu0 %v4751_v53 }
 0x240   :  { %1884 = vmatpush.bf16.msrb.mxu0 %v4754_v58 }
 0x288   :  { %v942_v32 = vpop.permute.xlu2 %941 }
 0x289   :  { %v947_v59 = vmul.f32 %v942_v32, %v911_v36  ;;  %v493_v32 = vadd.f32 %v4581_v26, %v400_v20 }
 0x290   :  { %v944_v21 = vpop.permute.xlu2 %943 }
 0x291   :  { %v948_v22 = vmul.f32 %v944_v21, %v912_v5  ;;  %v5650_v5 = vmov 0   ;;  %v796_v21 = vadd.f32 %v4687_v35, %v711_v47 }
 0x293   :  { %v949_v31 = vpack.c.bf16 %v948_v22, %v947_v59 }
 0x295   :  { %951 = vrot.lane.b32.xlu0 %v949_v31, %s4290_s21  ;;  %v598_v31 = vadd.f32 %v4583_v52, %v493_v32 }
 0x297   :  { %v715_v54 = vadd.f32 %v4689_v45, %v598_v31 }
 0x299   :  { %v800_v49 = vadd.f32 %v4692_v38, %v715_v54 }
 0x307   :  { %v952_v36 = vpop.permute.xlu0 %951 }
 0x308   :  { %3681 = vmatmul.msk.bf16.vlgmr.msrb.gmra.mxu3 %vm151_vm0, %v952_v36  ;;  %3682 = vmatmul.msk.bf16.vlgmr.msra.gmra.mxu2 %vm151_vm0, %v952_v36 }
 0x309   :  { %1149 = vmatpush.bf16.msrb.mxu3 %v4751_v53  ;;  %1178 = vmatpush.bf16.msra.mxu2 %v4760_v28 }
 0x30d   :  { %1150 = vmatpush.bf16.msrb.mxu3 %v4754_v58  ;;  %1179 = vmatpush.bf16.msra.mxu2 %v4763_v0 }
 0x318   :  { %1016 = vmatmul.bf16.vlgmr.msra.gmra.mxu3 %v5650_v5 }
 0x38b   :  { %v973_v59 = vpop.f32.mrf.mxu3  ;;  %v987_v50 = vpop.f32.mrf.mxu2 }
 0x38c   :  { %v1025_v22 = vadd.f32 %v973_v59, %v796_v21 }
 0x38e   :  { %3841 = vtanh.f32 %v1025_v22  ;;  %v1027_v31 = vmul.f32 0.5, %v1025_v22 }
 0x393   :  { %v975_v24 = vpop.f32.mrf.mxu3  ;;  %v989_v45 = vpop.f32.mrf.mxu2 }
 0x394   :  { %v3842_v44 = vpop.eup %3841  ;;  %v1026_v34 = vadd.f32 %v975_v24, %v800_v49 }
 0x395   :  { %1041 = vrot.lane.b32.xlu1 %v3842_v44, %s4289_s24 }
 0x396   :  { %3843 = vtanh.f32 %v1026_v34  ;;  %v1028_v32 = vmul.f32 0.5, %v1026_v34 }
 0x39b   :  { %v1017_v26 = vpop.f32.mrf.mxu3 }
 0x39c   :  { %v3844_v33 = vpop.eup %3843  ;;  %v1071_v52 = vadd.f32 %v1017_v26, %v987_v50 }
 0x39d   :  { %1043 = vrot.lane.b32.xlu2 %v3844_v33, %s4289_s24 }
 0x39e   :  { %v1076_v35 = vadd.f32 %v4793_v51, %v1071_v52 }
 0x3a0   :  { %3845 = vtanh.f32 %v1076_v35  ;;  %v1078_v33 = vmul.f32 0.5, %v1076_v35 }
 0x3a3   :  { %v1019_v38 = vpop.f32.mrf.mxu3 }
 0x3a4   :  { %v1072_v36 = vadd.f32 %v1019_v38, %v989_v45 }
 0x3a6   :  { %v3846_v57 = vpop.eup %3845  ;;  %v1077_v20 = vadd.f32 %v4793_v51, %v1072_v36 }
 0x3a7   :  { %1092 = vrot.lane.b32.xlu0 %v3846_v57, %s4289_s24 }
 0x3a8   :  { %3847 = vtanh.f32 %v1077_v20  ;;  %v1079_v34 = vmul.f32 0.5, %v1077_v20 }
 0x3a9   :  { %3849 = vtanh.f32 %v1028_v32 }
 0x3aa   :  { %3851 = vtanh.f32 %v1027_v31 }
 0x3ab   :  { %3853 = vtanh.f32 %v1078_v33 }
 0x3ac   :  { %3855 = vtanh.f32 %v1079_v34 }
 0x3ae   :  { %v3848_v47 = vpop.eup %3847 }
 0x3af   :  { %1094 = vrot.lane.b32.xlu1 %v3848_v47, %s4289_s24  ;;  %v3850_v21 = vpop.eup %3849 }
 0x3b0   :  { %v1032_v59 = vadd.f32 1.0, %v3850_v21  ;;  %v3852_v44 = vpop.eup %3851 }
 0x3b1   :  { %v1031_v50 = vadd.f32 1.0, %v3852_v44  ;;  %v3854_v38 = vpop.eup %3853 }
 0x3b2   :  { %v1034_v54 = vmul.f32 0.5, %v1032_v59  ;;  %v1082_v36 = vadd.f32 1.0, %v3854_v38  ;;  %v3856_v57 = vpop.eup %3855 }
 0x3b3   :  { %v1033_v26 = vmul.f32 0.5, %v1031_v50  ;;  %v1083_v21 = vadd.f32 1.0, %v3856_v57 }
 0x3b4   :  { %v1084_v22 = vmul.f32 0.5, %v1082_v36  ;;  %v1038_v20 = vmul.f32 %v1034_v54, %v4746_v10 }
 0x3b5   :  { %v1085_v59 = vmul.f32 0.5, %v1083_v21  ;;  %v1037_v35 = vmul.f32 %v1033_v26, %v4743_v60 }
 0x3b6   :  { %v1088_v10 = vmul.f32 0.0, %v1084_v22 }
 0x3b7   :  { %v1089_v34 = vmul.f32 0.0, %v1085_v59 }
 0x3f7   :  { %v1044_v49 = vpop.permute.xlu2 %1043 }
 0x3f8   :  { %v1048_v24 = vmul.f32 %v1044_v49, %v1034_v54 }
 0x3fa   :  { %1053 = vrot.lane.b32.xlu0 %v1048_v24, %s4290_s21 }
 0x407   :  { %v1042_v52 = vpop.permute.xlu1 %1041 }
 0x408   :  { %v1047_v45 = vmul.f32 %v1042_v52, %v1033_v26 }
 0x40a   :  { %1051 = vrot.lane.b32.xlu2 %v1047_v45, %s4290_s21 }
 0x419   :  { %v1093_v47 = vpop.permute.xlu0 %1092 }
 0x41a   :  { %v1098_v32 = vmul.f32 %v1093_v47, %v1084_v22 }
 0x41c   :  { %1102 = vrot.lane.b32.xlu1 %v1098_v32, %s4290_s21 }
 0x421   :  { %v1095_v31 = vpop.permute.xlu1 %1094 }
 0x422   :  { %v1099_v49 = vmul.f32 %v1095_v31, %v1085_v59 }
 0x424   :  { %1104 = vrot.lane.b32.xlu2 %v1099_v49, %s4290_s21 }
 0x464   :  { %v1052_v24 = vpop.permute.xlu2 %1051 }
 0x465   :  { %v4805_v44 = vadd.f32 %v1052_v24, %v1037_v35 }
 0x467   :  { %3857 = vtanh.f32 %v4805_v44 }
 0x46c   :  { %v1054_v50 = vpop.permute.xlu0 %1053 }
 0x46d   :  { %v3858_v33 = vpop.eup %3857  ;;  %v4809_v52 = vadd.f32 %v1054_v50, %v1038_v20 }
 0x46e   :  { %1063 = vrot.lane.b32.xlu0 %v3858_v33, %s4289_s24 }
 0x46f   :  { %3859 = vtanh.f32 %v4809_v52 }
 0x475   :  { %v3860_v45 = vpop.eup %3859 }
 0x476   :  { %1065 = vrot.lane.b32.xlu1 %v3860_v45, %s4289_s24 }
 0x47e   :  { %v1105_v60 = vpop.permute.xlu2 %1104 }
 0x47f   :  { %v4814_v38 = vadd.f32 %v1105_v60, %v1089_v34  ;;  %v3789_v60 = vld [vmem:[#allocation8 + $0x14] sm:$0xf] }
 0x481   :  { %3861 = vtanh.f32 %v4814_v38 }
 0x487   :  { %v3862_v36 = vpop.eup %3861 }
 0x488   :  { %1116 = vrot.lane.b32.xlu0 %v3862_v36, %s4289_s24  ;;  %v3697_v36 = vld [vmem:[#allocation8 + $0x18] sm:$0xf0] }
 0x48e   :  { %v1103_v57 = vpop.permute.xlu1 %1102 }
 0x48f   :  { %v4818_v47 = vadd.f32 %v1103_v57, %v1088_v10  ;;  %v3787_v10 = vld [vmem:[#allocation8 + $0x4] sm:$0xf]  ;;  %v4824_v57 = vor.u32 %v3789_v60, %v3697_v36 }
 0x491   :  { %3863 = vtanh.f32 %v4818_v47  ;;  %1192 = vmatpush.bf16.msra.mxu3 %v4824_v57  ;;  %1680 = vmatpush.bf16.msra.mxu1 %v4824_v57 }
 0x497   :  { %v3864_v32 = vpop.eup %3863 }
 0x498   :  { %1114 = vrot.lane.b32.xlu2 %v3864_v32, %s4289_s24  ;;  %v3693_v32 = vld [vmem:[#allocation8 + $0x8] sm:$0xf0] }
 0x4e0   :  { %v1064_v21 = vpop.permute.xlu0 %1063 }
 0x4e1   :  { %v1069_v49 = vmul.f32 %v1064_v21, %v1033_v26  ;;  %v4827_v26 = vor.u32 %v3787_v10, %v3693_v32  ;;  %v4877_v10 = vld [vmem:[%s5620_s6] ss:$0 sm:$0xff] }
 0x4e3   :  { %1193 = vmatpush.bf16.msra.mxu3 %v4827_v26  ;;  %1681 = vmatpush.bf16.msra.mxu1 %v4827_v26 }
 0x4e7   :  { %1904 = vmatpush.bf16.msrb.mxu1 %v4760_v28 }
 0x4e8   :  { %v1066_v31 = vpop.permute.xlu1 %1065 }
 0x4e9   :  { %v1070_v35 = vmul.f32 %v1066_v31, %v1034_v54  ;;  %v4837_v54 = vld [vmem:[%s5621_s7 + $0x8] sm:$0xff]  ;;  %v267_v31 = vadd.f32 %v4568_v39, %v4588_v61 }
 0x4eb   :  { %v1122_v24 = vpack.c.bf16 %v1070_v35, %v1069_v49  ;;  %1905 = vmatpush.bf16.msrb.mxu1 %v4763_v0  ;;  %v408_v49 = vadd.f32 %v4594_v1, %v267_v31  ;;  %v719_v35 = vadd.f32 %v4694_v46, %v4591_v63 }
 0x4ed   :  { %1124 = vrot.lane.b32.xlu1 %v1122_v24, %s4290_s21  ;;  %v804_v24 = vadd.f32 %v4696_v23, %v719_v35 }
 0x4f2   :  { %v1115_v20 = vpop.permute.xlu2 %1114 }
 0x4f3   :  { %v1120_v33 = vmul.f32 %v1115_v20, %v1084_v22 }
 0x4fa   :  { %v1117_v50 = vpop.permute.xlu0 %1116 }
 0x4fb   :  { %v1121_v45 = vmul.f32 %v1117_v50, %v1085_v59  ;;  %v4845_v59 = vld [vmem:[%s5621_s7] sm:$0xff] }
 0x4fd   :  { %v1157_v34 = vpack.c.bf16 %v1121_v45, %v1120_v33 }
 0x4ff   :  { %1159 = vrot.lane.b32.xlu2 %v1157_v34, %s4290_s21 }
 0x559   :  { %v1160_v21 = vpop.permute.xlu2 %1159 }
 0x55f   :  { %v1125_v22 = vpop.permute.xlu1 %1124 }
 0x560   :  { %3691 = vmatmul.msk.bf16.vlgmr.msrb.gmra.mxu2 %vm151_vm0, %v1125_v22  ;;  %3692 = vmatmul.msk.bf16.vlgmr.msrb.gmra.mxu3 %vm151_vm0, %v1125_v22 }
 0x561   :  { %1222 = vmatpush.bf16.msrb.mxu2 %v4837_v54  ;;  %1393 = vmatpush.bf16.msrb.mxu3 %v4463_v37 }
 0x565   :  { %1223 = vmatpush.bf16.msrb.mxu2 %v4845_v59  ;;  %1394 = vmatpush.bf16.msrb.mxu3 %v4494_v12 }
 0x570   :  { %3701 = vmatmul.msk.bf16.vlgmr.msra.gmra.mxu2 %vm151_vm0, %v1160_v21  ;;  %3702 = vmatmul.msk.bf16.vlgmr.msra.gmra.mxu3 %vm151_vm0, %v1160_v21 }
 0x571   :  { %1407 = vmatpush.bf16.msra.mxu2 %v4751_v53  ;;  %1428 = vmatpush.bf16.msra.mxu3 %v4760_v28  ;;  %v503_v28 = vadd.f32 %v4596_v48, %v408_v49 }
 0x575   :  { %1408 = vmatpush.bf16.msra.mxu2 %v4754_v58  ;;  %1429 = vmatpush.bf16.msra.mxu3 %v4763_v0 }
 0x580   :  { %1224 = vmatmul.bf16.vlgmr.msrb.gmra.mxu2 %v5650_v5  ;;  %v610_v5 = vadd.f32 %v4598_v2, %v503_v28 }
 0x581   :  { %1442 = vmatpush.bf16.msrb.mxu2 %v4824_v57 }
 0x582   :  { %v723_v50 = vadd.f32 %v4698_v3, %v610_v5 }
 0x584   :  { %v808_v33 = vadd.f32 %v4700_v27, %v723_v50 }
 0x585   :  { %1443 = vmatpush.bf16.msrb.mxu2 %v4827_v26 }
 0x5e3   :  { %v1138_v20 = vpop.f32.mrf.mxu2  ;;  %v1152_v1 = vpop.f32.mrf.mxu3 }
 0x5e4   :  { %v1233_v0 = vadd.f32 %v1138_v20, %v804_v24 }
 0x5e6   :  { %3865 = vtanh.f32 %v1233_v0 }
 0x5eb   :  { %v1140_v45 = vpop.f32.mrf.mxu2  ;;  %v1154_v2 = vpop.f32.mrf.mxu3 }
 0x5ec   :  { %v3866_v39 = vpop.eup %3865  ;;  %v1234_v61 = vadd.f32 %v1140_v45, %v808_v33  ;;  %v1235_v33 = vmul.f32 0.5, %v1233_v0 }
 0x5ed   :  { %1249 = vrot.lane.b32.xlu0 %v3866_v39, %s4289_s24 }
 0x5ee   :  { %3867 = vtanh.f32 %v1234_v61 }
 0x5f3   :  { %v1181_v63 = vpop.f32.mrf.mxu2  ;;  %v1195_v36 = vpop.f32.mrf.mxu3 }
 0x5f4   :  { %v3868_v48 = vpop.eup %3867  ;;  %v1279_v46 = vadd.f32 %v1181_v63, %v1152_v1  ;;  %v1236_v1 = vmul.f32 0.5, %v1234_v61 }
 0x5f5   :  { %1251 = vrot.lane.b32.xlu1 %v3868_v48, %s4289_s24 }
 0x5f6   :  { %v1281_v23 = vadd.f32 %v4793_v51, %v1279_v46 }
 0x5f8   :  { %3869 = vtanh.f32 %v1281_v23  ;;  %v1283_v50 = vmul.f32 0.5, %v1281_v23 }
 0x5fb   :  { %v1183_v34 = vpop.f32.mrf.mxu2  ;;  %v1197_v49 = vpop.f32.mrf.mxu3 }
 0x5fc   :  { %v1280_v3 = vadd.f32 %v1183_v34, %v1154_v2 }
 0x5fe   :  { %v3870_v60 = vpop.eup %3869  ;;  %v1282_v27 = vadd.f32 %v4793_v51, %v1280_v3 }
 0x5ff   :  { %1297 = vrot.lane.b32.xlu2 %v3870_v60, %s4289_s24 }
 0x600   :  { %3871 = vtanh.f32 %v1282_v27 }
 0x603   :  { %v1225_v32 = vpop.f32.mrf.mxu2 }
 0x604   :  { %v1327_v22 = vadd.f32 %v1225_v32, %v1195_v36 }
 0x606   :  { %v3872_v21 = vpop.eup %3871  ;;  %v1332_v31 = vadd.f32 %v4877_v10, %v1327_v22  ;;  %v1284_v22 = vmul.f32 0.5, %v1282_v27 }
 0x607   :  { %1299 = vrot.lane.b32.xlu0 %v3872_v21, %s4289_s24 }
 0x608   :  { %3873 = vtanh.f32 %v1332_v31 }
 0x60b   :  { %v1227_v35 = vpop.f32.mrf.mxu2 }
 0x60c   :  { %v1328_v28 = vadd.f32 %v1227_v35, %v1197_v49 }
 0x60e   :  { %v3874_v24 = vpop.eup %3873  ;;  %v1333_v20 = vadd.f32 %v4877_v10, %v1328_v28 }
 0x60f   :  { %1348 = vrot.lane.b32.xlu1 %v3874_v24, %s4289_s24  ;;  %v1334_v24 = vmul.f32 0.5, %v1332_v31 }
 0x610   :  { %3875 = vtanh.f32 %v1333_v20  ;;  %v1335_v23 = vmul.f32 0.5, %v1333_v20 }
 0x611   :  { %3877 = vtanh.f32 %v1283_v50 }
 0x612   :  { %3879 = vtanh.f32 %v1235_v33 }
 0x613   :  { %3881 = vtanh.f32 %v1236_v1 }
 0x614   :  { %3883 = vtanh.f32 %v1335_v23 }
 0x615   :  { %3885 = vtanh.f32 %v1284_v22 }
 0x616   :  { %v3876_v5 = vpop.eup %3875  ;;  %3887 = vtanh.f32 %v1334_v24 }
 0x617   :  { %1350 = vrot.lane.b32.xlu2 %v3876_v5, %s4289_s24  ;;  %v3878_v45 = vpop.eup %3877 }
 0x618   :  { %v1287_v39 = vadd.f32 1.0, %v3878_v45  ;;  %v3880_v63 = vpop.eup %3879 }
 0x619   :  { %v1239_v2 = vadd.f32 1.0, %v3880_v63  ;;  %v3882_v60 = vpop.eup %3881 }
 0x61a   :  { %v4884_v48 = vmul.f32 0.5, %v1287_v39  ;;  %v1240_v32 = vadd.f32 1.0, %v3882_v60  ;;  %v3884_v35 = vpop.eup %3883 }
 0x61b   :  { %v4888_v3 = vmul.f32 0.5, %v1239_v2  ;;  %v1339_v28 = vadd.f32 1.0, %v3884_v35  ;;  %v3886_v5 = vpop.eup %3885 }
 0x61c   :  { %v4892_v61 = vmul.f32 0.5, %v1240_v32  ;;  %v1288_v45 = vadd.f32 1.0, %v3886_v5  ;;  %v3888_v39 = vpop.eup %3887  ;;  %v1293_v60 = vmul.f32 %v4884_v48, %v4818_v47 }
 0x61d   :  { %v4896_v20 = vmul.f32 0.5, %v1339_v28 }
 0x61e   :  { %v1290_v27 = vmul.f32 0.5, %v1288_v45  ;;  %v1246_v24 = vmul.f32 %v4892_v61, %v4809_v52 }
 0x61f   :  { %v1345_v32 = vmul.f32 0.0, %v4896_v20 }
 0x620   :  { %v1294_v45 = vmul.f32 %v1290_v27, %v4814_v38 }
 0x659   :  { %v1298_v46 = vpop.permute.xlu2 %1297 }
 0x65a   :  { %v1303_v34 = vmul.f32 %v1298_v46, %v4884_v48  ;;  %v1338_v46 = vadd.f32 1.0, %v3888_v39 }
 0x65c   :  { %1307 = vrot.lane.b32.xlu2 %v1303_v34, %s4290_s21  ;;  %v1340_v2 = vmul.f32 0.5, %v1338_v46 }
 0x65f   :  { %v1250_v36 = vpop.permute.xlu0 %1249 }
 0x660   :  { %v1255_v0 = vmul.f32 %v1250_v36, %v4888_v3 }
 0x662   :  { %1259 = vrot.lane.b32.xlu0 %v1255_v0, %s4290_s21 }
 0x667   :  { %v1252_v21 = vpop.permute.xlu1 %1251 }
 0x668   :  { %v1256_v49 = vmul.f32 %v1252_v21, %v4892_v61 }
 0x66a   :  { %1261 = vrot.lane.b32.xlu1 %v1256_v49, %s4290_s21  ;;  %v1245_v49 = vmul.f32 %v4888_v3, %v4805_v44 }
 0x671   :  { %v1351_v50 = vpop.permute.xlu2 %1350 }
 0x672   :  { %v1355_v33 = vmul.f32 %v1351_v50, %v4896_v20 }
 0x674   :  { %1360 = vrot.lane.b32.xlu2 %v1355_v33, %s4290_s21 }
 0x679   :  { %v1300_v1 = vpop.permute.xlu0 %1299 }
 0x67a   :  { %v1304_v63 = vmul.f32 %v1300_v1, %v1290_v27 }
 0x67c   :  { %1309 = vrot.lane.b32.xlu0 %v1304_v63, %s4290_s21  ;;  %v1344_v63 = vmul.f32 0.0, %v1340_v2 }
 0x681   :  { %v1349_v34 = vpop.permute.xlu1 %1348 }
 0x682   :  { %v1354_v31 = vmul.f32 %v1349_v34, %v1340_v2 }
 0x684   :  { %1358 = vrot.lane.b32.xlu1 %v1354_v31, %s4290_s21 }
 0x6b6   :  { %v1308_v23 = vpop.permute.xlu2 %1307 }
 0x6b7   :  { %v4904_v36 = vadd.f32 %v1308_v23, %v1293_v60 }
 0x6b9   :  { %3889 = vtanh.f32 %v4904_v36 }
 0x6bf   :  { %v3890_v0 = vpop.eup %3889 }
 0x6c0   :  { %1319 = vrot.lane.b32.xlu2 %v3890_v0, %s4289_s24 }
 0x6ce   :  { %v1361_v22 = vpop.permute.xlu2 %1360 }
 0x6cf   :  { %v4909_v21 = vadd.f32 %v1361_v22, %v1345_v32 }
 0x6d1   :  { %3891 = vtanh.f32 %v4909_v21 }
 0x6d4   :  { %v1260_v35 = vpop.permute.xlu0 %1259 }
 0x6d5   :  { %v4914_v47 = vadd.f32 %v1260_v35, %v1245_v49 }
 0x6d7   :  { %v3892_v28 = vpop.eup %3891  ;;  %3893 = vtanh.f32 %v4914_v47 }
 0x6d8   :  { %1372 = vrot.lane.b32.xlu2 %v3892_v28, %s4289_s24 }
 0x6dc   :  { %v1262_v5 = vpop.permute.xlu1 %1261 }
 0x6dd   :  { %v3894_v50 = vpop.eup %3893  ;;  %v4920_v33 = vadd.f32 %v1262_v5, %v1246_v24 }
 0x6de   :  { %1271 = vrot.lane.b32.xlu0 %v3894_v50, %s4289_s24 }
 0x6df   :  { %3895 = vtanh.f32 %v4920_v33 }
 0x6e5   :  { %v3896_v44 = vpop.eup %3895 }
 0x6e6   :  { %1273 = vrot.lane.b32.xlu1 %v3896_v44, %s4289_s24 }
 0x6ee   :  { %v1310_v39 = vpop.permute.xlu0 %1309 }
 0x6ef   :  { %v4926_v1 = vadd.f32 %v1310_v39, %v1294_v45 }
 0x6f1   :  { %3897 = vtanh.f32 %v4926_v1 }
 0x6f6   :  { %v1359_v52 = vpop.permute.xlu1 %1358 }
 0x6f7   :  { %v3898_v46 = vpop.eup %3897  ;;  %v4929_v34 = vadd.f32 %v1359_v52, %v1344_v63 }
 0x6f8   :  { %1321 = vrot.lane.b32.xlu0 %v3898_v46, %s4289_s24 }
 0x6f9   :  { %3899 = vtanh.f32 %v4929_v34 }
 0x6ff   :  { %v3900_v31 = vpop.eup %3899 }
 0x700   :  { %1370 = vrot.lane.b32.xlu1 %v3900_v31, %s4289_s24 }
 0x71a   :  { %v1320_v22 = vpop.permute.xlu2 %1319 }
 0x71b   :  { %v1325_v35 = vmul.f32 %v1320_v22, %v4884_v48 }
 0x732   :  { %v1373_v5 = vpop.permute.xlu2 %1372 }
 0x733   :  { %v4940_v44 = vmul.f32 %v1373_v5, %v4896_v20 }
 0x750   :  { %v1272_v60 = vpop.permute.xlu0 %1271 }
 0x751   :  { %v1277_v38 = vmul.f32 %v1272_v60, %v4888_v3 }
 0x758   :  { %v1274_v23 = vpop.permute.xlu1 %1273 }
 0x759   :  { %v1278_v0 = vmul.f32 %v1274_v23, %v4892_v61 }
 0x75b   :  { %v1380_v32 = vpack.c.bf16 %v1278_v0, %v1277_v38 }
 0x75d   :  { %1382 = vrot.lane.b32.xlu0 %v1380_v32, %s4290_s21 }
 0x76a   :  { %v1322_v49 = vpop.permute.xlu0 %1321 }
 0x76b   :  { %v1326_v28 = vmul.f32 %v1322_v49, %v1290_v27  ;;  %v4965_v27 = vld [vmem:[%s5645_s23] ss:$0 sm:$0xff] }
 0x76d   :  { %v1415_v24 = vpack.c.bf16 %v1326_v28, %v1325_v35 }
 0x76f   :  { %1417 = vrot.lane.b32.xlu1 %v1415_v24, %s4290_s21 }
 0x772   :  { %v1371_v50 = vpop.permute.xlu1 %1370 }
 0x773   :  { %v4942_v45 = vmul.f32 %v1371_v50, %v1340_v2 }
 0x775   :  { %v1450_v3 = vpack.c.bf16 %v4940_v44, %v4942_v45 }
 0x777   :  { %1452 = vrot.lane.b32.xlu2 %v1450_v3, %s4290_s21 }
 0x7cf   :  { %v1383_v61 = vpop.permute.xlu0 %1382 }
 0x7d0   :  { %3711 = vmatmul.msk.bf16.vlgmr.msrb.gmra.mxu3 %vm151_vm0, %v1383_v61  ;;  %3712 = vmatmul.msk.bf16.vlgmr.msra.gmra.mxu2 %vm151_vm0, %v1383_v61 }
 0x7d1   :  { %1463 = vmatpush.bf16.msrb.mxu3 %v4837_v54  ;;  %1631 = vmatpush.bf16.msra.mxu2 %v4463_v37  ;;  %v1453_v20 = vpop.permute.xlu2 %1452 }
 0x7d5   :  { %1464 = vmatpush.bf16.msrb.mxu3 %v4845_v59  ;;  %1632 = vmatpush.bf16.msra.mxu2 %v4494_v12 }
 0x7e1   :  { %v1418_v48 = vpop.permute.xlu1 %1417 }
 0x7e2   :  { %3713 = vmatmul.msk.bf16.vlgmr.msra.gmra.mxu3 %vm151_vm0, %v1418_v48  ;;  %3714 = vmatmul.msk.bf16.vlgmr.msrb.gmra.mxu2 %vm151_vm0, %v1418_v48 }
 0x7e3   :  { %1645 = vmatpush.bf16.msra.mxu3 %v4751_v53  ;;  %1701 = vmatpush.bf16.msrb.mxu2 %v4837_v54  ;;  %v283_v53 = vadd.f32 %v4965_v27, %v4603_v11 }
 0x7e5   :  { %v416_v2 = vadd.f32 %v4609_v15, %v283_v53 }
 0x7e7   :  { %1646 = vmatpush.bf16.msra.mxu3 %v4754_v58  ;;  %1702 = vmatpush.bf16.msrb.mxu2 %v4845_v59  ;;  %v727_v58 = vadd.f32 %v4702_v4, %v4606_v13  ;;  %v513_v39 = vadd.f32 %v4611_v62, %v416_v2 }
 0x7e9   :  { %v812_v63 = vadd.f32 %v4704_v8, %v727_v58 }
 0x7f2   :  { %3715 = vmatmul.msk.bf16.vlgmr.msrb.gmra.mxu3 %vm151_vm0, %v1453_v20 }
 0x7f3   :  { %1869 = vmatpush.bf16.msrb.mxu3 %v4463_v37 }
 0x7f7   :  { %1870 = vmatpush.bf16.msrb.mxu3 %v4494_v12  ;;  %v622_v12 = vadd.f32 %v4613_v17, %v513_v39 }
 0x7f9   :  { %v731_v46 = vadd.f32 %v4706_v29, %v622_v12 }
 0x7fb   :  { %v816_v31 = vadd.f32 %v4708_v6, %v731_v46 }
 0x853   :  { %v1396_v37 = vpop.f32.mrf.mxu3  ;;  %v1410_v13 = vpop.f32.mrf.mxu2 }
 0x854   :  { %v1474_v52 = vadd.f32 %v1396_v37, %v812_v63 }
 0x856   :  { %3901 = vtanh.f32 %v1474_v52  ;;  %v1476_v53 = vmul.f32 0.5, %v1474_v52 }
 0x85b   :  { %v1398_v60 = vpop.f32.mrf.mxu3  ;;  %v1412_v17 = vpop.f32.mrf.mxu2 }
 0x85c   :  { %v3902_v11 = vpop.eup %3901  ;;  %v1475_v23 = vadd.f32 %v1398_v60, %v816_v31 }
 0x85d   :  { %1490 = vrot.lane.b32.xlu0 %v3902_v11, %s4289_s24 }
 0x85e   :  { %3903 = vtanh.f32 %v1475_v23  ;;  %v1477_v58 = vmul.f32 0.5, %v1475_v23 }
 0x864   :  { %v3904_v15 = vpop.eup %3903 }
 0x865   :  { %1492 = vrot.lane.b32.xlu1 %v3904_v15, %s4289_s24  ;;  %v1431_v62 = vpop.f32.mrf.mxu3  ;;  %v1445_v32 = vpop.f32.mrf.mxu2 }
 0x866   :  { %v1520_v4 = vadd.f32 %v1431_v62, %v1410_v13 }
 0x868   :  { %v1522_v8 = vadd.f32 %v4793_v51, %v1520_v4 }
 0x86a   :  { %3905 = vtanh.f32 %v1522_v8  ;;  %v1524_v20 = vmul.f32 0.5, %v1522_v8 }
 0x86d   :  { %v1433_v38 = vpop.f32.mrf.mxu3  ;;  %v1447_v24 = vpop.f32.mrf.mxu2 }
 0x86e   :  { %v1521_v29 = vadd.f32 %v1433_v38, %v1412_v17 }
 0x870   :  { %v3906_v0 = vpop.eup %3905  ;;  %v1523_v6 = vadd.f32 %v4793_v51, %v1521_v29 }
 0x871   :  { %1538 = vrot.lane.b32.xlu2 %v3906_v0, %s4289_s24 }
 0x872   :  { %3907 = vtanh.f32 %v1523_v6  ;;  %v1525_v17 = vmul.f32 0.5, %v1523_v6 }
 0x875   :  { %v1466_v22 = vpop.f32.mrf.mxu3 }
 0x876   :  { %v1568_v49 = vadd.f32 %v1466_v22, %v1445_v32 }
 0x878   :  { %v3908_v35 = vpop.eup %3907  ;;  %v1570_v28 = vadd.f32 %v4877_v10, %v1568_v49 }
 0x879   :  { %1540 = vrot.lane.b32.xlu0 %v3908_v35, %s4289_s24 }
 0x87a   :  { %3909 = vtanh.f32 %v1570_v28  ;;  %v1572_v0 = vmul.f32 0.5, %v1570_v28 }
 0x87d   :  { %v1468_v5 = vpop.f32.mrf.mxu3 }
 0x87e   :  { %v1569_v50 = vadd.f32 %v1468_v5, %v1447_v24 }
 0x880   :  { %v3910_v3 = vpop.eup %3909  ;;  %v1571_v61 = vadd.f32 %v4877_v10, %v1569_v50 }
 0x881   :  { %1586 = vrot.lane.b32.xlu1 %v3910_v3, %s4289_s24 }
 0x882   :  { %3911 = vtanh.f32 %v1571_v61  ;;  %v1573_v15 = vmul.f32 0.5, %v1571_v61 }
 0x883   :  { %3913 = vtanh.f32 %v1524_v20 }
 0x884   :  { %3915 = vtanh.f32 %v1476_v53 }
 0x885   :  { %3917 = vtanh.f32 %v1477_v58 }
 0x886   :  { %3919 = vtanh.f32 %v1573_v15 }
 0x887   :  { %3921 = vtanh.f32 %v1525_v17 }
 0x888   :  { %v3912_v48 = vpop.eup %3911  ;;  %3923 = vtanh.f32 %v1572_v0 }
 0x889   :  { %1588 = vrot.lane.b32.xlu2 %v3912_v48, %s4289_s24  ;;  %v3914_v2 = vpop.eup %3913 }
 0x88a   :  { %v1528_v39 = vadd.f32 1.0, %v3914_v2  ;;  %v3916_v63 = vpop.eup %3915 }
 0x88b   :  { %v1480_v12 = vadd.f32 1.0, %v3916_v63  ;;  %v3918_v11 = vpop.eup %3917 }
 0x88c   :  { %v4987_v37 = vmul.f32 0.5, %v1528_v39  ;;  %v1481_v23 = vadd.f32 1.0, %v3918_v11  ;;  %v3920_v38 = vpop.eup %3919 }
 0x88d   :  { %v4991_v60 = vmul.f32 0.5, %v1480_v12  ;;  %v1577_v29 = vadd.f32 1.0, %v3920_v38  ;;  %v3922_v22 = vpop.eup %3921 }
 0x88e   :  { %v4995_v62 = vmul.f32 0.5, %v1481_v23  ;;  %v1529_v24 = vadd.f32 1.0, %v3922_v22  ;;  %v3924_v50 = vpop.eup %3923  ;;  %v1534_v53 = vmul.f32 %v4987_v37, %v4904_v36 }
 0x88f   :  { %v4999_v32 = vmul.f32 0.5, %v1577_v29  ;;  %v1576_v61 = vadd.f32 1.0, %v3924_v50 }
 0x890   :  { %v1531_v5 = vmul.f32 0.5, %v1529_v24 }
 0x891   :  { %v1578_v48 = vmul.f32 0.5, %v1576_v61  ;;  %v1583_v63 = vmul.f32 %v4999_v32, %v4909_v21 }
 0x8cb   :  { %v1539_v46 = vpop.permute.xlu2 %1538 }
 0x8cc   :  { %v1544_v31 = vmul.f32 %v1539_v46, %v4987_v37 }
 0x8ce   :  { %1548 = vrot.lane.b32.xlu2 %v1544_v31, %s4290_s21  ;;  %v1486_v31 = vmul.f32 %v4991_v60, %v4914_v47 }
 0x8cf   :  { %v1491_v13 = vpop.permute.xlu0 %1490 }
 0x8d0   :  { %v1496_v52 = vmul.f32 %v1491_v13, %v4991_v60 }
 0x8d2   :  { %1500 = vrot.lane.b32.xlu0 %v1496_v52, %s4290_s21  ;;  %v1487_v52 = vmul.f32 %v4995_v62, %v4920_v33  ;;  %v1582_v33 = vmul.f32 %v1578_v48, %v4929_v34 }
 0x8d7   :  { %v1493_v4 = vpop.permute.xlu1 %1492 }
 0x8d8   :  { %v1497_v8 = vmul.f32 %v1493_v4, %v4995_v62  ;;  %v1535_v4 = vmul.f32 %v1531_v5, %v4926_v1 }
 0x8da   :  { %1502 = vrot.lane.b32.xlu1 %v1497_v8, %s4290_s21 }
 0x8e3   :  { %v1589_v49 = vpop.permute.xlu2 %1588 }
 0x8e4   :  { %v1593_v35 = vmul.f32 %v1589_v49, %v4999_v32 }
 0x8e6   :  { %1598 = vrot.lane.b32.xlu2 %v1593_v35, %s4290_s21 }
 0x8eb   :  { %v1541_v3 = vpop.permute.xlu0 %1540 }
 0x8ec   :  { %v1545_v6 = vmul.f32 %v1541_v3, %v1531_v5 }
 0x8ee   :  { %1550 = vrot.lane.b32.xlu0 %v1545_v6, %s4290_s21 }
 0x8f3   :  { %v1587_v20 = vpop.permute.xlu1 %1586 }
 0x8f4   :  { %v1592_v28 = vmul.f32 %v1587_v20, %v1578_v48 }
 0x8f6   :  { %1596 = vrot.lane.b32.xlu1 %v1592_v28, %s4290_s21 }
 0x928   :  { %v1549_v2 = vpop.permute.xlu2 %1548 }
 0x929   :  { %v5007_v58 = vadd.f32 %v1549_v2, %v1534_v53 }
 0x92b   :  { %3925 = vtanh.f32 %v5007_v58 }
 0x931   :  { %v3926_v39 = vpop.eup %3925 }
 0x932   :  { %1560 = vrot.lane.b32.xlu2 %v3926_v39, %s4289_s24 }
 0x940   :  { %v1599_v12 = vpop.permute.xlu2 %1598 }
 0x941   :  { %v5013_v46 = vadd.f32 %v1599_v12, %v1583_v63 }
 0x943   :  { %3927 = vtanh.f32 %v5013_v46 }
 0x944   :  { %v1501_v36 = vpop.permute.xlu0 %1500 }
 0x945   :  { %v5018_v11 = vadd.f32 %v1501_v36, %v1486_v31  ;;  %v5070_v36 = vpop.f32.mrf.mxu0 }
 0x947   :  { %3929 = vtanh.f32 %v5018_v11 }
 0x949   :  { %v3928_v13 = vpop.eup %3927 }
 0x94a   :  { %1610 = vrot.lane.b32.xlu2 %v3928_v13, %s4289_s24  ;;  %v5072_v13 = vpop.f32.mrf.mxu1 }
 0x94c   :  { %v1503_v21 = vpop.permute.xlu1 %1502 }
 0x94d   :  { %v3930_v15 = vpop.eup %3929  ;;  %v5024_v23 = vadd.f32 %v1503_v21, %v1487_v52 }
 0x94e   :  { %1512 = vrot.lane.b32.xlu0 %v3930_v15, %s4289_s24 }
 0x94f   :  { %3931 = vtanh.f32 %v5024_v23 }
 0x955   :  { %v3932_v47 = vpop.eup %3931 }
 0x956   :  { %1514 = vrot.lane.b32.xlu1 %v3932_v47, %s4289_s24 }
 0x960   :  { %v1551_v8 = vpop.permute.xlu0 %1550 }
 0x961   :  { %v5030_v17 = vadd.f32 %v1551_v8, %v1535_v4 }
 0x963   :  { %3933 = vtanh.f32 %v5030_v17 }
 0x968   :  { %v1597_v38 = vpop.permute.xlu1 %1596 }
 0x969   :  { %v3934_v29 = vpop.eup %3933  ;;  %v5034_v0 = vadd.f32 %v1597_v38, %v1582_v33 }
 0x96a   :  { %1562 = vrot.lane.b32.xlu0 %v3934_v29, %s4289_s24 }
 0x96b   :  { %3935 = vtanh.f32 %v5034_v0 }
 0x971   :  { %v3936_v22 = vpop.eup %3935 }
 0x972   :  { %1608 = vrot.lane.b32.xlu1 %v3936_v22, %s4289_s24 }
 0x98c   :  { %v1561_v34 = vpop.permute.xlu2 %1560 }
 0x98d   :  { %v1566_v6 = vmul.f32 %v1561_v34, %v4987_v37 }
 0x9a4   :  { %v1611_v28 = vpop.permute.xlu2 %1610 }
 0x9a5   :  { %v5045_v2 = vmul.f32 %v1611_v28, %v4999_v32 }
 0x9c0   :  { %v1513_v49 = vpop.permute.xlu0 %1512 }
 0x9c1   :  { %v1518_v35 = vmul.f32 %v1513_v49, %v4991_v60 }
 0x9c8   :  { %v1515_v1 = vpop.permute.xlu1 %1514 }
 0x9c9   :  { %v1519_v24 = vmul.f32 %v1515_v1, %v4995_v62 }
 0x9cb   :  { %v1618_v50 = vpack.c.bf16 %v1519_v24, %v1518_v35 }
 0x9cd   :  { %1620 = vrot.lane.b32.xlu0 %v1618_v50, %s4290_s21 }
 0x9dc   :  { %v1563_v3 = vpop.permute.xlu0 %1562 }
 0x9dd   :  { %v1567_v61 = vmul.f32 %v1563_v3, %v1531_v5  ;;  %v299_v5 = vadd.f32 %v4965_v27, %v4618_v41  ;;  %v5651_v41 = vld [vmem:[#allocation22_spill] sm:$0xff] }
 0x9df   :  { %v1653_v20 = vpack.c.bf16 %v1567_v61, %v1566_v6 }
 0x9e1   :  { %1655 = vrot.lane.b32.xlu1 %v1653_v20, %s4290_s21 }
 0x9e4   :  { %v1609_v53 = vpop.permute.xlu1 %1608 }
 0x9e5   :  { %v5047_v39 = vmul.f32 %v1609_v53, %v1578_v48  ;;  %v424_v48 = vadd.f32 %v4624_v14, %v299_v5 }
 0x9e7   :  { %v1688_v60 = vpack.c.bf16 %v5045_v2, %v5047_v39 }
 0x9e9   :  { %1690 = vrot.lane.b32.xlu2 %v1688_v60, %s4290_s21 }
 0xa3f   :  { %v1621_v62 = vpop.permute.xlu0 %1620 }
 0xa40   :  { %3716 = vmatmul.msk.bf16.vlgmr.msra.gmra.mxu2 %vm151_vm0, %v1621_v62  ;;  %3717 = vmatmul.msk.bf16.vlgmr.msra.gmra.mxu3 %vm151_vm0, %v1621_v62 }
 0xa41   :  { %1918 = vmatpush.bf16.msra.mxu2 %v4824_v57  ;;  %1939 = vmatpush.bf16.msra.mxu3 %v4837_v54  ;;  %v735_v57 = vadd.f32 %v4710_v7, %v4621_v42 }
 0xa43   :  { %v1691_v37 = vpop.permute.xlu2 %1690  ;;  %v820_v54 = vadd.f32 %v4712_v40, %v735_v57 }
 0xa45   :  { %1919 = vmatpush.bf16.msra.mxu2 %v4827_v26  ;;  %1940 = vmatpush.bf16.msra.mxu3 %v4845_v59  ;;  %v523_v26 = vadd.f32 %v4626_v16, %v424_v48 }
 0xa47   :  { %v634_v12 = vadd.f32 %v4628_v43, %v523_v26 }
 0xa49   :  { %v739_v31 = vadd.f32 %v4714_v55, %v634_v12 }
 0xa4b   :  { %v824_v14 = vadd.f32 %v5651_v41, %v739_v31 }
 0xa50   :  { %3720 = vmatmul.msk.bf16.vlgmr.msrb.gmra.mxu2 %vm151_vm0, %v1691_v37 }
 0xa53   :  { %v1656_v32 = vpop.permute.xlu1 %1655 }
 0xa54   :  { %3718 = vmatmul.msk.bf16.vlgmr.msra.gmra.mxu0 %vm151_vm0, %v1656_v32  ;;  %3719 = vmatmul.msk.bf16.vlgmr.msra.gmra.mxu1 %vm151_vm0, %v1656_v32 }
 0xac3   :  { %v1634_v59 = vpop.f32.mrf.mxu2  ;;  %v1648_v16 = vpop.f32.mrf.mxu3 }
 0xac4   :  { %v1712_v63 = vadd.f32 %v1634_v59, %v820_v54 }
 0xac6   :  { %3937 = vtanh.f32 %v1712_v63  ;;  %v1714_v61 = vmul.f32 0.5, %v1712_v63 }
 0xacb   :  { %v1636_v27 = vpop.f32.mrf.mxu2  ;;  %v1650_v8 = vpop.f32.mrf.mxu3 }
 0xacc   :  { %v3938_v52 = vpop.eup %3937  ;;  %v1713_v42 = vadd.f32 %v1636_v27, %v824_v14 }
 0xacd   :  { %1728 = vrot.lane.b32.xlu0 %v3938_v52, %s4289_s24 }
 0xace   :  { %3939 = vtanh.f32 %v1713_v42  ;;  %v1715_v53 = vmul.f32 0.5, %v1713_v42 }
 0xad1   :  { %v1669_v7 = vpop.f32.mrf.mxu0  ;;  %v1683_v40 = vpop.f32.mrf.mxu1 }
 0xad2   :  { %v1758_v21 = vadd.f32 %v1669_v7, %v1648_v16 }
 0xad3   :  { %v1704_v43 = vpop.f32.mrf.mxu2 }
 0xad4   :  { %v3940_v15 = vpop.eup %3939  ;;  %v1760_v55 = vadd.f32 %v4793_v51, %v1758_v21  ;;  %v1806_v47 = vadd.f32 %v1704_v43, %v1683_v40 }
 0xad5   :  { %1730 = vrot.lane.b32.xlu1 %v3940_v15, %s4289_s24 }
 0xad6   :  { %3941 = vtanh.f32 %v1760_v55  ;;  %v1808_v4 = vadd.f32 %v4877_v10, %v1806_v47  ;;  %v1762_v6 = vmul.f32 0.5, %v1760_v55 }
 0xad8   :  { %3943 = vtanh.f32 %v1808_v4  ;;  %v1810_v63 = vmul.f32 0.5, %v1808_v4 }
 0xad9   :  { %v1671_v33 = vpop.f32.mrf.mxu0  ;;  %v1685_v29 = vpop.f32.mrf.mxu1 }
 0xada   :  { %v1759_v38 = vadd.f32 %v1671_v33, %v1650_v8 }
 0xadb   :  { %v1706_v22 = vpop.f32.mrf.mxu2 }
 0xadc   :  { %v3942_v49 = vpop.eup %3941  ;;  %v1761_v1 = vadd.f32 %v4793_v51, %v1759_v38  ;;  %v1807_v35 = vadd.f32 %v1706_v22, %v1685_v29 }
 0xadd   :  { %1776 = vrot.lane.b32.xlu2 %v3942_v49, %s4289_s24 }
 0xade   :  { %3945 = vtanh.f32 %v1761_v1  ;;  %v1809_v24 = vadd.f32 %v4877_v10, %v1807_v35  ;;  %v3944_v50 = vpop.eup %3943  ;;  %v1763_v52 = vmul.f32 0.5, %v1761_v1 }
 0xadf   :  { %1824 = vrot.lane.b32.xlu1 %v3944_v50, %s4289_s24 }
 0xae0   :  { %3947 = vtanh.f32 %v1809_v24  ;;  %v1811_v20 = vmul.f32 0.5, %v1809_v24 }
 0xae1   :  { %3949 = vtanh.f32 %v1762_v6 }
 0xae2   :  { %3951 = vtanh.f32 %v1714_v61 }
 0xae3   :  { %3953 = vtanh.f32 %v1811_v20 }
 0xae4   :  { %v3946_v34 = vpop.eup %3945  ;;  %3955 = vtanh.f32 %v1715_v53 }
 0xae5   :  { %1778 = vrot.lane.b32.xlu0 %v3946_v34, %s4289_s24  ;;  %3957 = vtanh.f32 %v1810_v63 }
 0xae6   :  { %v3948_v3 = vpop.eup %3947  ;;  %3959 = vtanh.f32 %v1763_v52 }
 0xae7   :  { %1826 = vrot.lane.b32.xlu2 %v3948_v3, %s4289_s24  ;;  %v3950_v51 = vpop.eup %3949 }
 0xae8   :  { %v1766_v28 = vadd.f32 1.0, %v3950_v51  ;;  %v3952_v62 = vpop.eup %3951 }
 0xae9   :  { %v3954_v5 = vpop.eup %3953  ;;  %v1718_v48 = vadd.f32 1.0, %v3952_v62 }
 0xaea   :  { %v5085_v60 = vmul.f32 0.5, %v1766_v28  ;;  %v1815_v57 = vadd.f32 1.0, %v3954_v5  ;;  %v3956_v54 = vpop.eup %3955 }
 0xaeb   :  { %v5089_v26 = vmul.f32 0.5, %v1718_v48  ;;  %v1719_v41 = vadd.f32 1.0, %v3956_v54  ;;  %v3958_v40 = vpop.eup %3957 }
 0xaec   :  { %v5092_v31 = vmul.f32 0.5, %v1815_v57  ;;  %v1814_v21 = vadd.f32 1.0, %v3958_v40  ;;  %v3960_v43 = vpop.eup %3959  ;;  %v1772_v29 = vmul.f32 %v5085_v60, %v5007_v58 }
 0xaed   :  { %v1721_v42 = vmul.f32 0.5, %v1719_v41  ;;  %v1767_v47 = vadd.f32 1.0, %v3960_v43  ;;  %v1724_v58 = vmul.f32 %v5089_v26, %v5018_v11 }
 0xaee   :  { %v1816_v15 = vmul.f32 0.5, %v1814_v21  ;;  %v1821_v35 = vmul.f32 %v5092_v31, %v5013_v46 }
 0xaef   :  { %v1769_v8 = vmul.f32 0.5, %v1767_v47  ;;  %v1725_v61 = vmul.f32 %v1721_v42, %v5024_v23 }
 0xaf0   :  { %v1820_v11 = vmul.f32 %v1816_v15, %v5034_v0 }
 0xaf1   :  { %v1773_v23 = vmul.f32 %v1769_v8, %v5030_v17 }
 0xb37   :  { %v1777_v37 = vpop.permute.xlu2 %1776 }
 0xb38   :  { %v1782_v32 = vmul.f32 %v1777_v37, %v5085_v60 }
 0xb3a   :  { %1786 = vrot.lane.b32.xlu2 %v1782_v32, %s4290_s21 }
 0xb3f   :  { %v1729_v59 = vpop.permute.xlu0 %1728 }
 0xb40   :  { %v1734_v12 = vmul.f32 %v1729_v59, %v5089_v26 }
 0xb41   :  { %v1827_v14 = vpop.permute.xlu2 %1826 }
 0xb42   :  { %1738 = vrot.lane.b32.xlu0 %v1734_v12, %s4290_s21  ;;  %v1831_v27 = vmul.f32 %v1827_v14, %v5092_v31 }
 0xb44   :  { %1836 = vrot.lane.b32.xlu2 %v1831_v27, %s4290_s21 }
 0xb47   :  { %v1731_v16 = vpop.permute.xlu1 %1730 }
 0xb48   :  { %v1735_v7 = vmul.f32 %v1731_v16, %v1721_v42 }
 0xb4a   :  { %1740 = vrot.lane.b32.xlu1 %v1735_v7, %s4290_s21 }
 0xb51   :  { %v1825_v55 = vpop.permute.xlu1 %1824 }
 0xb52   :  { %v1830_v4 = vmul.f32 %v1825_v55, %v1816_v15 }
 0xb54   :  { %1834 = vrot.lane.b32.xlu1 %v1830_v4, %s4290_s21 }
 0xb57   :  { %v1779_v33 = vpop.permute.xlu0 %1778 }
 0xb58   :  { %v1783_v38 = vmul.f32 %v1779_v33, %v1769_v8  ;;  %v5155_v33 = vld [vmem:[%s5618_s4] ss:$0 sm:$0xff] }
 0xb5a   :  { %1788 = vrot.lane.b32.xlu0 %v1783_v38, %s4290_s21 }
 0xb94   :  { %v1787_v22 = vpop.permute.xlu2 %1786 }
 0xb95   :  { %v5102_v49 = vadd.f32 %v1787_v22, %v1772_v29 }
 0xb97   :  { %3961 = vtanh.f32 %v5102_v49 }
 0xb9d   :  { %v3962_v1 = vpop.eup %3961 }
 0xb9e   :  { %1798 = vrot.lane.b32.xlu2 %v3962_v1, %s4289_s24  ;;  %v1837_v24 = vpop.permute.xlu2 %1836 }
 0xb9f   :  { %v5108_v50 = vadd.f32 %v1837_v24, %v1821_v35 }
 0xba1   :  { %3963 = vtanh.f32 %v5108_v50 }
 0xba7   :  { %v3964_v34 = vpop.eup %3963 }
 0xba8   :  { %1848 = vrot.lane.b32.xlu2 %v3964_v34, %s4289_s24 }
 0xbb4   :  { %v1739_v3 = vpop.permute.xlu0 %1738 }
 0xbb5   :  { %v5114_v6 = vadd.f32 %v1739_v3, %v1724_v58 }
 0xbb7   :  { %3965 = vtanh.f32 %v5114_v6 }
 0xbbc   :  { %v1741_v51 = vpop.permute.xlu1 %1740 }
 0xbbd   :  { %v3966_v46 = vpop.eup %3965  ;;  %v5118_v20 = vadd.f32 %v1741_v51, %v1725_v61 }
 0xbbe   :  { %1750 = vrot.lane.b32.xlu0 %v3966_v46, %s4289_s24 }
 0xbbf   :  { %3967 = vtanh.f32 %v5118_v20 }
 0xbc5   :  { %v3968_v28 = vpop.eup %3967 }
 0xbc6   :  { %1752 = vrot.lane.b32.xlu1 %v3968_v28, %s4289_s24  ;;  %v1835_v53 = vpop.permute.xlu1 %1834 }
 0xbc7   :  { %v5124_v62 = vadd.f32 %v1835_v53, %v1820_v11 }
 0xbc9   :  { %3969 = vtanh.f32 %v5124_v62 }
 0xbcc   :  { %v1789_v37 = vpop.permute.xlu0 %1788 }
 0xbcd   :  { %v5128_v32 = vadd.f32 %v1789_v37, %v1773_v23 }
 0xbcf   :  { %3971 = vtanh.f32 %v5128_v32  ;;  %v3970_v5 = vpop.eup %3969 }
 0xbd0   :  { %1846 = vrot.lane.b32.xlu1 %v3970_v5, %s4289_s24 }
 0xbd5   :  { %v3972_v48 = vpop.eup %3971 }
 0xbd6   :  { %1800 = vrot.lane.b32.xlu0 %v3972_v48, %s4289_s24 }
 0xbf8   :  { %v1799_v54 = vpop.permute.xlu2 %1798 }
 0xbf9   :  { %v1804_v7 = vmul.f32 %v1799_v54, %v5085_v60 }
 0xc02   :  { %v1849_v17 = vpop.permute.xlu2 %1848 }
 0xc03   :  { %v5136_v14 = vmul.f32 %v1849_v17, %v5092_v31 }
 0xc30   :  { %v1751_v57 = vpop.permute.xlu0 %1750 }
 0xc31   :  { %v1756_v59 = vmul.f32 %v1751_v57, %v5089_v26 }
 0xc38   :  { %v1753_v0 = vpop.permute.xlu1 %1752 }
 0xc39   :  { %v1757_v63 = vmul.f32 %v1753_v0, %v1721_v42 }
 0xc3b   :  { %v1856_v12 = vpack.c.bf16 %v1757_v63, %v1756_v59 }
 0xc3d   :  { %1858 = vrot.lane.b32.xlu0 %v1856_v12, %s4290_s21 }
 0xc42   :  { %v1847_v41 = vpop.permute.xlu1 %1846 }
 0xc43   :  { %v5138_v27 = vmul.f32 %v1847_v41, %v1816_v15 }
 0xc45   :  { %v1926_v52 = vpack.c.bf16 %v5136_v14, %v5138_v27 }
 0xc47   :  { %1928 = vrot.lane.b32.xlu2 %v1926_v52, %s4290_s21 }
 0xc48   :  { %v1801_v16 = vpop.permute.xlu0 %1800 }
 0xc49   :  { %v1805_v26 = vmul.f32 %v1801_v16, %v1769_v8 }
 0xc4b   :  { %v1891_v42 = vpack.c.bf16 %v1805_v26, %v1804_v7 }
 0xc4d   :  { %1893 = vrot.lane.b32.xlu1 %v1891_v42, %s4290_s21 }
 0xca1   :  { %v1929_v21 = vpop.permute.xlu2 %1928 }
 0xcaf   :  { %v1859_v40 = vpop.permute.xlu0 %1858 }
 0xcb0   :  { %3721 = vmatmul.msk.bf16.vlgmr.msrb.gmra.mxu3 %vm151_vm0, %v1859_v40  ;;  %3722 = vmatmul.msk.bf16.vlgmr.msrb.gmra.mxu0 %vm151_vm0, %v1859_v40 }
 0xcbf   :  { %v1894_v31 = vpop.permute.xlu1 %1893 }
 0xcc0   :  { %3723 = vmatmul.msk.bf16.vlgmr.msrb.gmra.mxu1 %vm151_vm0, %v1894_v31  ;;  %3724 = vmatmul.msk.bf16.vlgmr.msra.gmra.mxu2 %vm151_vm0, %v1894_v31 }
 0xcc1   :  { %3725 = vmatmul.msk.bf16.vlgmr.msra.gmra.mxu3 %vm151_vm0, %v1929_v21 }
 0xd2d   :  { %v1886_v15 = vpop.f32.mrf.mxu0 }
 0xd33   :  { %v1872_v43 = vpop.f32.mrf.mxu3 }
 0xd34   :  { %v1950_v60 = vadd.f32 %v1872_v43, %v4723_v18 }
 0xd35   :  { %v1888_v1 = vpop.f32.mrf.mxu0 }
 0xd36   :  { %3973 = vtanh.f32 %v1950_v60  ;;  %v1952_v5 = vmul.f32 0.5, %v1950_v60 }
 0xd3b   :  { %v1874_v55 = vpop.f32.mrf.mxu3 }
 0xd3c   :  { %v3974_v47 = vpop.eup %3973  ;;  %v1951_v18 = vadd.f32 %v1874_v55, %v4728_v9 }
 0xd3d   :  { %v1907_v4 = vpop.f32.mrf.mxu1  ;;  %1966 = vrot.lane.b32.xlu2 %v3974_v47, %s4289_s24 }
 0xd3e   :  { %v1996_v8 = vadd.f32 %v1907_v4, %v1886_v15  ;;  %v1953_v41 = vmul.f32 0.5, %v1951_v18 }
 0xd40   :  { %v1998_v38 = vadd.f32 %v5155_v33, %v1996_v8 }
 0xd42   :  { %3975 = vtanh.f32 %v1998_v38  ;;  %v2000_v63 = vmul.f32 0.5, %v1998_v38 }
 0xd43   :  { %v1921_v29 = vpop.f32.mrf.mxu2  ;;  %3977 = vtanh.f32 %v1951_v18 }
 0xd44   :  { %v1942_v22 = vpop.f32.mrf.mxu3 }
 0xd45   :  { %v1909_v35 = vpop.f32.mrf.mxu1  ;;  %v2044_v3 = vadd.f32 %v1942_v22, %v1921_v29 }
 0xd46   :  { %v1997_v24 = vadd.f32 %v1909_v35, %v1888_v1 }
 0xd47   :  { %v2046_v28 = vadd.f32 %v4877_v10, %v2044_v3 }
 0xd48   :  { %v3976_v34 = vpop.eup %3975  ;;  %v1999_v58 = vadd.f32 %v5155_v33, %v1997_v24 }
 0xd49   :  { %2014 = vrot.lane.b32.xlu0 %v3976_v34, %s4289_s24  ;;  %v3978_v11 = vpop.eup %3977  ;;  %v2048_v31 = vmul.f32 0.5, %v2046_v28 }
 0xd4a   :  { %3979 = vtanh.f32 %v1999_v58  ;;  %v2001_v52 = vmul.f32 0.5, %v1999_v58 }
 0xd4b   :  { %v1923_v61 = vpop.f32.mrf.mxu2 }
 0xd4c   :  { %v1944_v51 = vpop.f32.mrf.mxu3 }
 0xd4d   :  { %v2045_v46 = vadd.f32 %v1944_v51, %v1923_v61 }
 0xd4f   :  { %v2047_v53 = vadd.f32 %v4877_v10, %v2045_v46 }
 0xd50   :  { %v3980_v23 = vpop.eup %3979 }
 0xd51   :  { %3981 = vtanh.f32 %v2047_v53  ;;  %1968 = vrot.lane.b32.xlu0 %v3978_v11, %s4289_s24  ;;  %2016 = vrot.lane.b32.xlu1 %v3980_v23, %s4289_s24  ;;  %v2049_v59 = vmul.f32 0.5, %v2047_v53 }
 0xd52   :  { %3983 = vtanh.f32 %v2046_v28 }
 0xd53   :  { %3985 = vtanh.f32 %v1952_v5 }
 0xd54   :  { %3987 = vtanh.f32 %v2049_v59 }
 0xd55   :  { %3989 = vtanh.f32 %v2000_v63 }
 0xd56   :  { %3991 = vtanh.f32 %v1953_v41 }
 0xd57   :  { %v3982_v9 = vpop.eup %3981  ;;  %3993 = vtanh.f32 %v2001_v52 }
 0xd58   :  { %v3984_v37 = vpop.eup %3983  ;;  %2064 = vrot.lane.b32.xlu2 %v3982_v9, %s4289_s24  ;;  %3995 = vtanh.f32 %v2048_v31 }
 0xd59   :  { %2062 = vrot.lane.b32.xlu1 %v3984_v37, %s4289_s24  ;;  %v3986_v48 = vpop.eup %3985 }
 0xd5a   :  { %v1956_v57 = vadd.f32 1.0, %v3986_v48  ;;  %v3988_v12 = vpop.eup %3987 }
 0xd5b   :  { %v2053_v17 = vadd.f32 1.0, %v3988_v12  ;;  %v3990_v26 = vpop.eup %3989 }
 0xd5c   :  { %v5167_v0 = vmul.f32 0.5, %v1956_v57  ;;  %v2004_v40 = vadd.f32 1.0, %v3990_v26  ;;  %v3992_v21 = vpop.eup %3991 }
 0xd5d   :  { %v5171_v16 = vmul.f32 0.5, %v2053_v17  ;;  %v3994_v60 = vpop.eup %3993  ;;  %v1957_v47 = vadd.f32 1.0, %v3992_v21 }
 0xd5e   :  { %v5175_v43 = vmul.f32 0.5, %v2004_v40  ;;  %v2005_v4 = vadd.f32 1.0, %v3994_v60  ;;  %v3996_v29 = vpop.eup %3995  ;;  %v1962_v61 = vmul.f32 %v5167_v0, %v5114_v6 }
 0xd5f   :  { %v1959_v8 = vmul.f32 0.5, %v1957_v47  ;;  %v2052_v24 = vadd.f32 1.0, %v3996_v29  ;;  %v2059_v11 = vmul.f32 %v5171_v16, %v5108_v50 }
 0xd60   :  { %v2007_v38 = vmul.f32 0.5, %v2005_v4  ;;  %v2010_v6 = vmul.f32 %v5175_v43, %v5102_v49 }
 0xd61   :  { %v2054_v34 = vmul.f32 0.5, %v2052_v24  ;;  %v1963_v48 = vmul.f32 %v1959_v8, %v5118_v20 }
 0xd62   :  { %v2011_v50 = vmul.f32 %v2007_v38, %v5128_v32 }
 0xd63   :  { %v2058_v49 = vmul.f32 %v2054_v34, %v5124_v62 }
 0xd97   :  { %v1967_v10 = vpop.permute.xlu2 %1966 }
 0xd98   :  { %v1972_v54 = vmul.f32 %v1967_v10, %v5167_v0 }
 0xd9a   :  { %1976 = vrot.lane.b32.xlu2 %v1972_v54, %s4290_s21 }
 0xdb2   :  { %v2065_v7 = vpop.permute.xlu2 %2064 }
 0xdb3   :  { %v2069_v42 = vmul.f32 %v2065_v7, %v5171_v16 }
 0xdb5   :  { %2074 = vrot.lane.b32.xlu2 %v2069_v42, %s4290_s21 }
 0xdbb   :  { %v2015_v15 = vpop.permute.xlu0 %2014 }
 0xdbc   :  { %v2020_v55 = vmul.f32 %v2015_v15, %v5175_v43 }
 0xdbe   :  { %2024 = vrot.lane.b32.xlu0 %v2020_v55, %s4290_s21 }
 0xdc3   :  { %v1969_v22 = vpop.permute.xlu0 %1968  ;;  %v2017_v1 = vpop.permute.xlu1 %2016 }
 0xdc4   :  { %v1973_v18 = vmul.f32 %v1969_v22, %v1959_v8  ;;  %v2021_v35 = vmul.f32 %v2017_v1, %v2007_v38  ;;  %v3738_v1 = vld [vmem:[#allocation6 + $0x18] sm:$0xf0] }
 0xdc6   :  { %1978 = vrot.lane.b32.xlu0 %v1973_v18, %s4290_s21  ;;  %2026 = vrot.lane.b32.xlu1 %v2021_v35, %s4290_s21  ;;  %v3736_v18 = vld [vmem:[#allocation6 + $0x10] sm:$0xf]  ;;  %v3796_v35 = vld [vmem:[#allocation6 + $0x14] sm:$0xf0] }
 0xdcb   :  { %v2063_v58 = vpop.permute.xlu1 %2062 }
 0xdcc   :  { %v2068_v3 = vmul.f32 %v2063_v58, %v2054_v34  ;;  %v3737_v58 = vor.u32 %v3796_v35, %v3736_v18 }
 0xdce   :  { %2072 = vrot.lane.b32.xlu1 %v2068_v3, %s4290_s21  ;;  %v3746_v3 = vld [vmem:[#allocation8] sm:$0xf]  ;;  %2165 = vmatpush.bf16.msra.mxu0 %v3737_v58 }
 0xdf4   :  { %v1977_v51 = vpop.permute.xlu2 %1976 }
 0xdf5   :  { %v5184_v46 = vadd.f32 %v1977_v51, %v1962_v61  ;;  %v3798_v61 = vld [vmem:[#allocation8 + $0x4] sm:$0xf0]  ;;  %v3756_v51 = vld [vmem:[#allocation8 + $0x18] sm:$0xf0] }
 0xdf7   :  { %3997 = vtanh.f32 %v5184_v46 }
 0xdfd   :  { %v3998_v28 = vpop.eup %3997 }
 0xdfe   :  { %1988 = vrot.lane.b32.xlu2 %v3998_v28, %s4289_s24  ;;  %v3728_v28 = vld [vmem:[#allocation6] sm:$0xf] }
 0xe0f   :  { %v2075_v53 = vpop.permute.xlu2 %2074 }
 0xe10   :  { %v5190_v23 = vadd.f32 %v2075_v53, %v2059_v11  ;;  %v3794_v11 = vld [vmem:[#allocation6 + $0x4] sm:$0xf0] }
 0xe12   :  { %3999 = vtanh.f32 %v5190_v23 }
 0xe18   :  { %v4000_v9 = vpop.eup %3999 }
 0xe19   :  { %2086 = vrot.lane.b32.xlu2 %v4000_v9, %s4289_s24  ;;  %v3729_v9 = vor.u32 %v3794_v11, %v3728_v28 }
 0xe1b   :  { %2166 = vmatpush.bf16.msra.mxu0 %v3729_v9 }
 0xe30   :  { %v2025_v37 = vpop.permute.xlu0 %2024 }
 0xe31   :  { %v5196_v5 = vadd.f32 %v2025_v37, %v2010_v6  ;;  %v3793_v6 = vld [vmem:[#allocation6 + $0x4] sm:$0xf]  ;;  %v3730_v37 = vld [vmem:[#allocation6 + $0x8] sm:$0xf0] }
 0xe33   :  { %4001 = vtanh.f32 %v5196_v5 }
 0xe38   :  { %v1979_v57 = vpop.permute.xlu0 %1978  ;;  %v2027_v10 = vpop.permute.xlu1 %2026 }
 0xe39   :  { %v4002_v54 = vpop.eup %4001  ;;  %v5201_v59 = vadd.f32 %v1979_v57, %v1963_v48  ;;  %v5203_v63 = vadd.f32 %v2027_v10, %v2011_v50  ;;  %v3797_v48 = vld [vmem:[#allocation8 + $0x4] sm:$0xf]  ;;  %v3733_v50 = vor.u32 %v3793_v6, %v3730_v37  ;;  %v3748_v57 = vld [vmem:[#allocation8 + $0x8] sm:$0xf0] }
 0xe3a   :  { %2036 = vrot.lane.b32.xlu0 %v4002_v54, %s4289_s24  ;;  %v5230_v10 = vor.u32 %v3797_v48, %v3748_v57  ;;  %v5236_v54 = vld [vmem:[%s5621_s7 + $0x8] sm:$0xff] }
 0xe3b   :  { %4003 = vtanh.f32 %v5201_v59  ;;  %2275 = vmatpush.bf16.msrb.mxu0 %v5236_v54 }
 0xe3c   :  { %4005 = vtanh.f32 %v5203_v63 }
 0xe40   :  { %v2073_v12 = vpop.permute.xlu1 %2072 }
 0xe41   :  { %v4004_v17 = vpop.eup %4003  ;;  %v5209_v20 = vadd.f32 %v2073_v12, %v2058_v49  ;;  %v5242_v49 = vld [vmem:[%s5621_s7] sm:$0xff] }
 0xe42   :  { %v4006_v32 = vpop.eup %4005  ;;  %1990 = vrot.lane.b32.xlu0 %v4004_v17, %s4289_s24  ;;  %2276 = vmatpush.bf16.msrb.mxu0 %v5242_v49 }
 0xe43   :  { %4007 = vtanh.f32 %v5209_v20  ;;  %2038 = vrot.lane.b32.xlu1 %v4006_v32, %s4289_s24 }
 0xe49   :  { %v4008_v41 = vpop.eup %4007 }
 0xe4b   :  { %2084 = vrot.lane.b32.xlu1 %v4008_v41, %s4289_s24 }
 0xe58   :  { %v1989_v7 = vpop.permute.xlu2 %1988 }
 0xe59   :  { %v1994_v42 = vmul.f32 %v1989_v7, %v5167_v0 }
 0xe73   :  { %v2087_v55 = vpop.permute.xlu2 %2086 }
 0xe74   :  { %v5220_v4 = vmul.f32 %v2087_v55, %v5171_v16  ;;  %v3799_v16 = vld [vmem:[#allocation8 + $0x14] sm:$0xf] }
 0xe75   :  { %v5227_v53 = vor.u32 %v3799_v16, %v3756_v51 }
 0xe77   :  { %2238 = vmatpush.bf16.msrb.mxu3 %v5227_v53 }
 0xe7b   :  { %2239 = vmatpush.bf16.msrb.mxu3 %v5230_v10 }
 0xeac   :  { %v2037_v52 = vpop.permute.xlu0 %2036 }
 0xead   :  { %v2042_v31 = vmul.f32 %v2037_v52, %v5175_v43  ;;  %v3754_v43 = vld [vmem:[#allocation8 + $0x10] sm:$0xf] }
 0xeb4   :  { %v1991_v26 = vpop.permute.xlu0 %1990 }
 0xeb5   :  { %v1995_v62 = vmul.f32 %v1991_v26, %v1959_v8  ;;  %v2039_v40 = vpop.permute.xlu1 %2038  ;;  %v3800_v8 = vld [vmem:[#allocation8 + $0x14] sm:$0xf0] }
 0xeb6   :  { %v2043_v21 = vmul.f32 %v2039_v40, %v2007_v38  ;;  %v3795_v38 = vld [vmem:[#allocation6 + $0x14] sm:$0xf]  ;;  %v3755_v22 = vor.u32 %v3800_v8, %v3754_v43 }
 0xeb7   :  { %v2132_v60 = vpack.c.bf16 %v1995_v62, %v1994_v42  ;;  %v3741_v24 = vor.u32 %v3795_v38, %v3738_v1 }
 0xeb8   :  { %v2191_v15 = vpack.c.bf16 %v2043_v21, %v2042_v31  ;;  %2224 = vmatpush.bf16.msrb.mxu2 %v3755_v22  ;;  %2478 = vmatpush.bf16.msra.mxu3 %v3755_v22 }
 0xeb9   :  { %2134 = vrot.lane.b32.xlu1 %v2132_v60, %s4290_s21  ;;  %2179 = vmatpush.bf16.msra.mxu1 %v3741_v24 }
 0xeba   :  { %2193 = vrot.lane.b32.xlu0 %v2191_v15, %s4290_s21 }
 0xebd   :  { %v2085_v47 = vpop.permute.xlu1 %2084  ;;  %2180 = vmatpush.bf16.msra.mxu1 %v3733_v50 }
 0xebe   :  { %v5222_v29 = vmul.f32 %v2085_v47, %v2054_v34  ;;  %v3747_v34 = vor.u32 %v3798_v61, %v3746_v3 }
 0xec0   :  { %v2250_v0 = vpack.c.bf16 %v5220_v4, %v5222_v29  ;;  %2225 = vmatpush.bf16.msrb.mxu2 %v3747_v34  ;;  %2479 = vmatpush.bf16.msra.mxu3 %v3747_v34 }
 0xec1   :  { %2443 = vmatpush.bf16.msrb.mxu1 %v3737_v58 }
 0xec2   :  { %2252 = vrot.lane.b32.xlu2 %v2250_v0, %s4290_s21 }
 0xec4   :  { %2457 = vmatpush.bf16.msra.mxu2 %v3741_v24 }
 0xec5   :  { %2444 = vmatpush.bf16.msrb.mxu1 %v3729_v9 }
 0xec8   :  { %2458 = vmatpush.bf16.msra.mxu2 %v3733_v50 }
 0xf1c   :  { %v2253_v32 = vpop.permute.xlu2 %2252 }
 0xf2b   :  { %v2135_v12 = vpop.permute.xlu1 %2134 }
 0xf2c   :  { %v2194_v17 = vpop.permute.xlu0 %2193  ;;  %3742 = vmatmul.msk.bf16.vlgmr.msra.gmra.mxu0 %vm151_vm0, %v2135_v12  ;;  %3743 = vmatmul.msk.bf16.vlgmr.msra.gmra.mxu1 %vm151_vm0, %v2135_v12 }
 0xf2d   :  { %3760 = vmatmul.msk.bf16.vlgmr.msrb.gmra.mxu2 %vm151_vm0, %v2194_v17  ;;  %3761 = vmatmul.msk.bf16.vlgmr.msrb.gmra.mxu3 %vm151_vm0, %v2194_v17 }
 0xf2e   :  { %2492 = vmatpush.bf16.msra.mxu0 %v5227_v53  ;;  %2513 = vmatpush.bf16.msra.mxu1 %v5236_v54 }
 0xf2f   :  { %2681 = vmatpush.bf16.msrb.mxu2 %v3741_v24  ;;  %2702 = vmatpush.bf16.msrb.mxu3 %v3755_v22 }
 0xf32   :  { %2493 = vmatpush.bf16.msra.mxu0 %v5230_v10  ;;  %2514 = vmatpush.bf16.msra.mxu1 %v5242_v49 }
 0xf33   :  { %2682 = vmatpush.bf16.msrb.mxu2 %v3733_v50  ;;  %2703 = vmatpush.bf16.msrb.mxu3 %v3747_v34 }
 0xf3c   :  { %3770 = vmatmul.msk.bf16.vlgmr.msrb.gmra.mxu0 %vm151_vm0, %v2253_v32 }
 0xf3d   :  { %2716 = vmatpush.bf16.msrb.mxu0 %v5227_v53 }
 0xf41   :  { %2717 = vmatpush.bf16.msrb.mxu0 %v5230_v10 }
 0xfa9   :  { %v2168_v41 = vpop.f32.mrf.mxu0  ;;  %v2182_v7 = vpop.f32.mrf.mxu1 }
 0xfaa   :  { %v2286_v52 = vadd.f32 %v2168_v41, %v4733_v30 }
 0xfac   :  { %4009 = vtanh.f32 %v2286_v52  ;;  %v2288_v28 = vmul.f32 0.5, %v2286_v52 }
 0xfb0   :  { %v2227_v26 = vpop.f32.mrf.mxu2  ;;  %v2241_v60 = vpop.f32.mrf.mxu3 }
 0xfb1   :  { %v2332_v42 = vadd.f32 %v2227_v26, %v2182_v7  ;;  %v2170_v62 = vpop.f32.mrf.mxu0  ;;  %v2184_v15 = vpop.f32.mrf.mxu1 }
 0xfb2   :  { %v4010_v40 = vpop.eup %4009  ;;  %v2287_v31 = vadd.f32 %v2170_v62, %v4736_v25  ;;  %v5265_v25 = vld [vmem:[%s5620_s6] ss:$0 sm:$0xff] }
 0xfb3   :  { %v2334_v21 = vadd.f32 %v5155_v33, %v2332_v42  ;;  %2302 = vrot.lane.b32.xlu0 %v4010_v40, %s4289_s24 }
 0xfb4   :  { %4011 = vtanh.f32 %v2287_v31  ;;  %v2289_v48 = vmul.f32 0.5, %v2287_v31 }
 0xfb5   :  { %4013 = vtanh.f32 %v2334_v21  ;;  %v2336_v16 = vmul.f32 0.5, %v2334_v21 }
 0xfb8   :  { %v2229_v55 = vpop.f32.mrf.mxu2  ;;  %v2243_v1 = vpop.f32.mrf.mxu3 }
 0xfb9   :  { %v2333_v47 = vadd.f32 %v2229_v55, %v2184_v15  ;;  %v2278_v0 = vpop.f32.mrf.mxu0 }
 0xfba   :  { %v4012_v30 = vpop.eup %4011  ;;  %v2380_v43 = vadd.f32 %v2278_v0, %v2241_v60 }
 0xfbb   :  { %v4014_v8 = vpop.eup %4013  ;;  %v2335_v38 = vadd.f32 %v5155_v33, %v2333_v47  ;;  %2304 = vrot.lane.b32.xlu1 %v4012_v30, %s4289_s24 }
 0xfbc   :  { %v2382_v22 = vadd.f32 %v5265_v25, %v2380_v43  ;;  %2350 = vrot.lane.b32.xlu2 %v4014_v8, %s4289_s24 }
 0xfbd   :  { %4015 = vtanh.f32 %v2335_v38  ;;  %v2337_v32 = vmul.f32 0.5, %v2335_v38 }
 0xfbe   :  { %4017 = vtanh.f32 %v2382_v22  ;;  %v2384_v7 = vmul.f32 0.5, %v2382_v22 }
 0xfc1   :  { %v2280_v18 = vpop.f32.mrf.mxu0 }
 0xfc2   :  { %v2381_v35 = vadd.f32 %v2280_v18, %v2243_v1 }
 0xfc3   :  { %v4016_v24 = vpop.eup %4015 }
 0xfc4   :  { %v4018_v58 = vpop.eup %4017  ;;  %v2383_v3 = vadd.f32 %v5265_v25, %v2381_v35  ;;  %2352 = vrot.lane.b32.xlu0 %v4016_v24, %s4289_s24 }
 0xfc5   :  { %2398 = vrot.lane.b32.xlu1 %v4018_v58, %s4289_s24 }
 0xfc6   :  { %4019 = vtanh.f32 %v2383_v3  ;;  %v2385_v11 = vmul.f32 0.5, %v2383_v3 }
 0xfc7   :  { %4021 = vtanh.f32 %v2336_v16 }
 0xfc8   :  { %4023 = vtanh.f32 %v2288_v28 }
 0xfc9   :  { %4025 = vtanh.f32 %v2385_v11 }
 0xfca   :  { %4027 = vtanh.f32 %v2289_v48 }
 0xfcb   :  { %4029 = vtanh.f32 %v2337_v32 }
 0xfcc   :  { %v4020_v61 = vpop.eup %4019  ;;  %4031 = vtanh.f32 %v2384_v7 }
 0xfcd   :  { %2400 = vrot.lane.b32.xlu2 %v4020_v61, %s4289_s24  ;;  %v4022_v34 = vpop.eup %4021 }
 0xfce   :  { %v2340_v51 = vadd.f32 1.0, %v4022_v34  ;;  %v4024_v50 = vpop.eup %4023 }
 0xfcf   :  { %v4026_v57 = vpop.eup %4025  ;;  %v2292_v12 = vadd.f32 1.0, %v4024_v50 }
 0xfd0   :  { %v5273_v9 = vmul.f32 0.5, %v2340_v51  ;;  %v2389_v17 = vadd.f32 1.0, %v4026_v57  ;;  %v4028_v52 = vpop.eup %4027 }
 0xfd1   :  { %v5277_v41 = vmul.f32 0.5, %v2292_v12  ;;  %v2293_v21 = vadd.f32 1.0, %v4028_v52  ;;  %v4030_v55 = vpop.eup %4029 }
 0xfd2   :  { %v5280_v62 = vmul.f32 0.5, %v2389_v17  ;;  %v4032_v0 = vpop.eup %4031  ;;  %v2341_v30 = vadd.f32 1.0, %v4030_v55  ;;  %v2346_v24 = vmul.f32 %v5273_v9, %v5196_v5 }
 0xfd3   :  { %v2295_v60 = vmul.f32 0.5, %v2293_v21  ;;  %v2388_v43 = vadd.f32 1.0, %v4032_v0  ;;  %v2298_v5 = vmul.f32 %v5277_v41, %v5184_v46 }
 0xfd4   :  { %v2343_v8 = vmul.f32 0.5, %v2341_v30  ;;  %v2395_v16 = vmul.f32 %v5280_v62, %v5190_v23 }
 0xfd5   :  { %v2390_v22 = vmul.f32 0.5, %v2388_v43 }
 0xfd6   :  { %v2347_v57 = vmul.f32 %v2343_v8, %v5203_v63 }
 0xfd7   :  { %v2394_v46 = vmul.f32 %v2390_v22, %v5209_v20 }
0x1016   :  { %v2351_v6 = vpop.permute.xlu2 %2350 }
0x1017   :  { %v2356_v37 = vmul.f32 %v2351_v6, %v5273_v9 }
0x1019   :  { %2360 = vrot.lane.b32.xlu2 %v2356_v37, %s4290_s21  ;;  %v2299_v37 = vmul.f32 %v2295_v60, %v5201_v59 }
0x1025   :  { %v2303_v26 = vpop.permute.xlu0 %2302 }
0x1026   :  { %v2308_v42 = vmul.f32 %v2303_v26, %v5277_v41 }
0x1027   :  { %v2401_v40 = vpop.permute.xlu2 %2400 }
0x1028   :  { %v2405_v31 = vmul.f32 %v2401_v40, %v5280_v62  ;;  %2312 = vrot.lane.b32.xlu0 %v2308_v42, %s4290_s21 }
0x102a   :  { %2410 = vrot.lane.b32.xlu2 %v2405_v31, %s4290_s21 }
0x102d   :  { %v2305_v15 = vpop.permute.xlu1 %2304 }
0x102e   :  { %v2309_v47 = vmul.f32 %v2305_v15, %v2295_v60 }
0x1030   :  { %2314 = vrot.lane.b32.xlu1 %v2309_v47, %s4290_s21 }
0x1036   :  { %v2353_v38 = vpop.permute.xlu0 %2352 }
0x1037   :  { %v2357_v1 = vmul.f32 %v2353_v38, %v2343_v8  ;;  %v2399_v18 = vpop.permute.xlu1 %2398 }
0x1038   :  { %v2404_v35 = vmul.f32 %v2399_v18, %v2390_v22 }
0x1039   :  { %2362 = vrot.lane.b32.xlu0 %v2357_v1, %s4290_s21 }
0x103a   :  { %2408 = vrot.lane.b32.xlu1 %v2404_v35, %s4290_s21  ;;  %v5654_v35 = vld [vmem:[#allocation21_spill] sm:$0xff] }
0x1073   :  { %v2361_v58 = vpop.permute.xlu2 %2360 }
0x1074   :  { %v5290_v3 = vadd.f32 %v2361_v58, %v2346_v24 }
0x1076   :  { %4033 = vtanh.f32 %v5290_v3 }
0x107c   :  { %v4034_v61 = vpop.eup %4033 }
0x107d   :  { %2372 = vrot.lane.b32.xlu2 %v4034_v61, %s4289_s24 }
0x1084   :  { %v2411_v34 = vpop.permute.xlu2 %2410 }
0x1085   :  { %v5296_v51 = vadd.f32 %v2411_v34, %v2395_v16 }
0x1087   :  { %4035 = vtanh.f32 %v5296_v51 }
0x108d   :  { %v4036_v28 = vpop.eup %4035 }
0x108e   :  { %2422 = vrot.lane.b32.xlu2 %v4036_v28, %s4289_s24 }
0x109a   :  { %v2313_v11 = vpop.permute.xlu0 %2312 }
0x109b   :  { %v5302_v6 = vadd.f32 %v2313_v11, %v2298_v5 }
0x109d   :  { %4037 = vtanh.f32 %v5302_v6 }
0x10a2   :  { %v2315_v48 = vpop.permute.xlu1 %2314 }
0x10a3   :  { %v4038_v23 = vpop.eup %4037  ;;  %v5306_v50 = vadd.f32 %v2315_v48, %v2299_v37 }
0x10a4   :  { %2324 = vrot.lane.b32.xlu0 %v4038_v23, %s4289_s24 }
0x10a5   :  { %4039 = vtanh.f32 %v5306_v50 }
0x10ab   :  { %v4040_v12 = vpop.eup %4039  ;;  %v2363_v17 = vpop.permute.xlu0 %2362 }
0x10ac   :  { %v5312_v32 = vadd.f32 %v2363_v17, %v2347_v57  ;;  %2326 = vrot.lane.b32.xlu1 %v4040_v12, %s4289_s24  ;;  %v2409_v52 = vpop.permute.xlu1 %2408 }
0x10ad   :  { %v5315_v59 = vadd.f32 %v2409_v52, %v2394_v46 }
0x10ae   :  { %4041 = vtanh.f32 %v5312_v32 }
0x10af   :  { %4043 = vtanh.f32 %v5315_v59 }
0x10b4   :  { %v4042_v7 = vpop.eup %4041 }
0x10b5   :  { %v4044_v26 = vpop.eup %4043  ;;  %2374 = vrot.lane.b32.xlu0 %v4042_v7, %s4289_s24 }
0x10b6   :  { %2420 = vrot.lane.b32.xlu1 %v4044_v26, %s4289_s24 }
0x10d7   :  { %v2373_v42 = vpop.permute.xlu2 %2372 }
0x10d8   :  { %v2378_v47 = vmul.f32 %v2373_v42, %v5273_v9 }
0x10e8   :  { %v2423_v15 = vpop.permute.xlu2 %2422 }
0x10e9   :  { %v5325_v43 = vmul.f32 %v2423_v15, %v5280_v62 }
0x1116   :  { %v2325_v63 = vpop.permute.xlu0 %2324 }
0x1117   :  { %v2330_v40 = vmul.f32 %v2325_v63, %v5277_v41 }
0x111e   :  { %v2327_v20 = vpop.permute.xlu1 %2326 }
0x111f   :  { %v2331_v21 = vmul.f32 %v2327_v20, %v2295_v60  ;;  %v5652_v60 = vld [vmem:[#allocation19_spill] sm:$0xff] }
0x1121   :  { %v2430_v31 = vpack.c.bf16 %v2331_v21, %v2330_v40 }
0x1123   :  { %2432 = vrot.lane.b32.xlu0 %v2430_v31, %s4290_s21 }
0x1127   :  { %v2375_v55 = vpop.permute.xlu0 %2374 }
0x1128   :  { %v2379_v0 = vmul.f32 %v2375_v55, %v2343_v8  ;;  %v2421_v30 = vpop.permute.xlu1 %2420 }
0x1129   :  { %v5327_v38 = vmul.f32 %v2421_v30, %v2390_v22  ;;  %v5653_v22 = vld [vmem:[#allocation20_spill] sm:$0xff] }
0x112a   :  { %v2465_v1 = vpack.c.bf16 %v2379_v0, %v2378_v47 }
0x112b   :  { %v2500_v18 = vpack.c.bf16 %v5325_v43, %v5327_v38 }
0x112c   :  { %2467 = vrot.lane.b32.xlu1 %v2465_v1, %s4290_s21 }
0x112d   :  { %2502 = vrot.lane.b32.xlu2 %v2500_v18, %s4290_s21 }
0x1187   :  { %v2503_v62 = vpop.permute.xlu2 %2502 }
0x1195   :  { %v2433_v41 = vpop.permute.xlu0 %2432 }
0x1196   :  { %3771 = vmatmul.msk.bf16.vlgmr.msrb.gmra.mxu1 %vm151_vm0, %v2433_v41  ;;  %3772 = vmatmul.msk.bf16.vlgmr.msra.gmra.mxu2 %vm151_vm0, %v2433_v41 }
0x1197   :  { %2737 = vmatpush.bf16.msrb.mxu1 %v5236_v54  ;;  %2856 = vmatpush.bf16.msra.mxu2 %v5227_v53  ;;  %v4126_v53 = vld [vmem:[%s5645_s23] ss:$0 sm:$0xff]  ;;  %s3632_s23 = sshll.u32 %s5632_s18, 4  ;;  %s3633_s23 = int_to_ptr.hbm [resolvable:$true] %s3632_s23 }
0x1198   :  { %v347_v8 = vadd.f32 %v4126_v53, %v5652_v60 }
0x119b   :  { %2738 = vmatpush.bf16.msrb.mxu1 %v5242_v49  ;;  %2857 = vmatpush.bf16.msra.mxu2 %v5230_v10  ;;  %v448_v10 = vadd.f32 %v5653_v22, %v347_v8 }
0x119d   :  { %v553_v24 = vadd.f32 %v5654_v35, %v448_v10 }
0x119e   :  { %v2468_v9 = vpop.permute.xlu1 %2467 }
0x119f   :  { %3773 = vmatmul.msk.bf16.vlgmr.msra.gmra.mxu3 %vm151_vm0, %v2468_v9  ;;  %3774 = vmatmul.msk.bf16.vlgmr.msra.gmra.mxu0 %vm151_vm0, %v2468_v9 }
0x11a0   :  { %2877 = vmatpush.bf16.msra.mxu3 %v5236_v54  ;;  %v670_v54 = vadd.f32 %v4779_v19, %v553_v24 }
0x11a4   :  { %2878 = vmatpush.bf16.msra.mxu3 %v5242_v49  ;;  %v763_v49 = vadd.f32 %v5070_v36, %v670_v54 }
0x11a6   :  { %3775 = vmatmul.msk.bf16.vlgmr.msra.gmra.mxu1 %vm151_vm0, %v2503_v62  ;;  %v848_v16 = vadd.f32 %v5072_v13, %v763_v49 }
0x1213   :  { %v2446_v58 = vpop.f32.mrf.mxu1 }
0x1214   :  { %v2524_v61 = vadd.f32 %v2446_v58, %v4739_v56 }
0x1216   :  { %4045 = vtanh.f32 %v2524_v61  ;;  %v2526_v55 = vmul.f32 0.5, %v2524_v61 }
0x1219   :  { %v2460_v11 = vpop.f32.mrf.mxu2 }
0x121b   :  { %v2448_v34 = vpop.f32.mrf.mxu1 }
0x121c   :  { %v4046_v28 = vpop.eup %4045  ;;  %v2525_v5 = vadd.f32 %v2448_v34, %v848_v16  ;;  %v2495_v37 = vpop.f32.mrf.mxu0 }
0x121d   :  { %2540 = vrot.lane.b32.xlu0 %v4046_v28, %s4289_s24 }
0x121e   :  { %4047 = vtanh.f32 %v2525_v5  ;;  %v2527_v1 = vmul.f32 0.5, %v2525_v5 }
0x1221   :  { %v2462_v13 = vpop.f32.mrf.mxu2 }
0x1222   :  { %v2481_v48 = vpop.f32.mrf.mxu3 }
0x1223   :  { %v2570_v23 = vadd.f32 %v2481_v48, %v2460_v11  ;;  %v2516_v57 = vpop.f32.mrf.mxu1 }
0x1224   :  { %v4048_v12 = vpop.eup %4047  ;;  %v2618_v56 = vadd.f32 %v2516_v57, %v2495_v37  ;;  %v2497_v46 = vpop.f32.mrf.mxu0 }
0x1225   :  { %v2572_v19 = vadd.f32 %v5155_v33, %v2570_v23  ;;  %2542 = vrot.lane.b32.xlu1 %v4048_v12, %s4289_s24 }
0x1226   :  { %v2620_v36 = vadd.f32 %v5265_v25, %v2618_v56 }
0x1227   :  { %4049 = vtanh.f32 %v2572_v19  ;;  %v2574_v15 = vmul.f32 0.5, %v2572_v19 }
0x1228   :  { %4051 = vtanh.f32 %v2620_v36  ;;  %v2622_v35 = vmul.f32 0.5, %v2620_v36 }
0x122a   :  { %v2483_v17 = vpop.f32.mrf.mxu3 }
0x122b   :  { %v2571_v52 = vadd.f32 %v2483_v17, %v2462_v13  ;;  %v2518_v7 = vpop.f32.mrf.mxu1 }
0x122c   :  { %v2619_v26 = vadd.f32 %v2518_v7, %v2497_v46 }
0x122d   :  { %v4050_v63 = vpop.eup %4049  ;;  %v2573_v42 = vadd.f32 %v5155_v33, %v2571_v52 }
0x122e   :  { %v4052_v20 = vpop.eup %4051  ;;  %v2621_v40 = vadd.f32 %v5265_v25, %v2619_v26  ;;  %2588 = vrot.lane.b32.xlu2 %v4050_v63, %s4289_s24 }
0x122f   :  { %4053 = vtanh.f32 %v2573_v42  ;;  %2636 = vrot.lane.b32.xlu1 %v4052_v20, %s4289_s24  ;;  %v2575_v34 = vmul.f32 0.5, %v2573_v42 }
0x1230   :  { %4055 = vtanh.f32 %v2621_v40  ;;  %v2623_v47 = vmul.f32 0.5, %v2621_v40 }
0x1231   :  { %4057 = vtanh.f32 %v2574_v15 }
0x1232   :  { %4059 = vtanh.f32 %v2526_v55 }
0x1233   :  { %4061 = vtanh.f32 %v2623_v47 }
0x1234   :  { %4063 = vtanh.f32 %v2527_v1 }
0x1235   :  { %v4054_v21 = vpop.eup %4053  ;;  %4065 = vtanh.f32 %v2622_v35 }
0x1236   :  { %v4056_v31 = vpop.eup %4055  ;;  %2590 = vrot.lane.b32.xlu0 %v4054_v21, %s4289_s24  ;;  %4067 = vtanh.f32 %v2575_v34 }
0x1237   :  { %2638 = vrot.lane.b32.xlu2 %v4056_v31, %s4289_s24  ;;  %v4058_v0 = vpop.eup %4057 }
0x1238   :  { %v2578_v30 = vadd.f32 1.0, %v4058_v0  ;;  %v4060_v18 = vpop.eup %4059 }
0x1239   :  { %v4062_v62 = vpop.eup %4061  ;;  %v2530_v60 = vadd.f32 1.0, %v4060_v18 }
0x123a   :  { %v5364_v41 = vmul.f32 0.5, %v2578_v30  ;;  %v2627_v8 = vadd.f32 1.0, %v4062_v62  ;;  %v4064_v10 = vpop.eup %4063 }
0x123b   :  { %v5368_v22 = vmul.f32 0.5, %v2530_v60  ;;  %v2531_v49 = vadd.f32 1.0, %v4064_v10  ;;  %v4066_v37 = vpop.eup %4065 }
0x123c   :  { %v5371_v61 = vmul.f32 0.5, %v2627_v8  ;;  %v2626_v48 = vadd.f32 1.0, %v4066_v37  ;;  %v4068_v23 = vpop.eup %4067  ;;  %v2584_v46 = vmul.f32 %v5364_v41, %v5290_v3 }
0x123d   :  { %v2533_v28 = vmul.f32 0.5, %v2531_v49  ;;  %v2579_v19 = vadd.f32 1.0, %v4068_v23  ;;  %v2536_v3 = vmul.f32 %v5368_v22, %v5302_v6 }
0x123e   :  { %v2628_v57 = vmul.f32 0.5, %v2626_v48  ;;  %v2633_v26 = vmul.f32 %v5371_v61, %v5296_v51 }
0x123f   :  { %v2581_v36 = vmul.f32 0.5, %v2579_v19  ;;  %v2537_v15 = vmul.f32 %v2533_v28, %v5306_v50 }
0x1240   :  { %v2632_v30 = vmul.f32 %v2628_v57, %v5315_v59 }
0x1241   :  { %v2585_v6 = vmul.f32 %v2581_v36, %v5312_v32 }
0x1288   :  { %v2589_v9 = vpop.permute.xlu2 %2588 }
0x1289   :  { %v2594_v53 = vmul.f32 %v2589_v9, %v5364_v41 }
0x128b   :  { %2598 = vrot.lane.b32.xlu2 %v2594_v53, %s4290_s21 }
0x128f   :  { %v2541_v24 = vpop.permute.xlu0 %2540 }
0x1290   :  { %v2546_v58 = vmul.f32 %v2541_v24, %v5368_v22 }
0x1291   :  { %v2639_v54 = vpop.permute.xlu2 %2638 }
0x1292   :  { %v2643_v16 = vmul.f32 %v2639_v54, %v5371_v61  ;;  %2550 = vrot.lane.b32.xlu0 %v2546_v58, %s4290_s21 }
0x1294   :  { %2648 = vrot.lane.b32.xlu2 %v2643_v16, %s4290_s21 }
0x1297   :  { %v2543_v5 = vpop.permute.xlu1 %2542 }
0x1298   :  { %v2547_v11 = vmul.f32 %v2543_v5, %v2533_v28 }
0x129a   :  { %2552 = vrot.lane.b32.xlu1 %v2547_v11, %s4290_s21 }
0x12a1   :  { %v2637_v12 = vpop.permute.xlu1 %2636 }
0x12a2   :  { %v2642_v56 = vmul.f32 %v2637_v12, %v2628_v57 }
0x12a4   :  { %2646 = vrot.lane.b32.xlu1 %v2642_v56, %s4290_s21 }
0x12a8   :  { %v2591_v13 = vpop.permute.xlu0 %2590 }
0x12a9   :  { %v2595_v17 = vmul.f32 %v2591_v13, %v2581_v36 }
0x12ab   :  { %2600 = vrot.lane.b32.xlu0 %v2595_v17, %s4290_s21 }
0x12e5   :  { %v2599_v52 = vpop.permute.xlu2 %2598 }
0x12e6   :  { %v5381_v7 = vadd.f32 %v2599_v52, %v2584_v46 }
0x12e8   :  { %4069 = vtanh.f32 %v5381_v7 }
0x12ee   :  { %v4070_v63 = vpop.eup %4069  ;;  %v2649_v42 = vpop.permute.xlu2 %2648 }
0x12ef   :  { %2610 = vrot.lane.b32.xlu2 %v4070_v63, %s4289_s24  ;;  %v5387_v20 = vadd.f32 %v2649_v42, %v2633_v26 }
0x12f1   :  { %4071 = vtanh.f32 %v5387_v20 }
0x12f7   :  { %v4072_v40 = vpop.eup %4071 }
0x12f8   :  { %2660 = vrot.lane.b32.xlu2 %v4072_v40, %s4289_s24 }
0x1304   :  { %v2551_v21 = vpop.permute.xlu0 %2550 }
0x1305   :  { %v2556_v31 = vadd.f32 %v2551_v21, %v2536_v3  ;;  %v4127_v21 = vld [vmem:[%s5618_s4] ss:$0 sm:$0xff]  ;;  %s3630_s4 = sshll.u32 %s4294_s29, 4  ;;  %s3631_s4 = int_to_ptr.vmem [resolvable:$true] %s3630_s4 }
0x1307   :  { %4073 = vtanh.f32 %v2556_v31 }
0x130c   :  { %v2553_v51 = vpop.permute.xlu1 %2552 }
0x130d   :  { %v4074_v55 = vpop.eup %4073  ;;  %v2557_v47 = vadd.f32 %v2553_v51, %v2537_v15 }
0x130e   :  { %2562 = vrot.lane.b32.xlu0 %v4074_v55, %s4289_s24 }
0x130f   :  { %4075 = vtanh.f32 %v2557_v47 }
0x1315   :  { %v4076_v0 = vpop.eup %4075 }
0x1316   :  { %2564 = vrot.lane.b32.xlu1 %v4076_v0, %s4289_s24  ;;  %v2647_v1 = vpop.permute.xlu1 %2646 }
0x1317   :  { %v5397_v18 = vadd.f32 %v2647_v1, %v2632_v30 }
0x1319   :  { %4077 = vtanh.f32 %v5397_v18 }
0x131d   :  { %v2601_v9 = vpop.permute.xlu0 %2600 }
0x131e   :  { %v5401_v50 = vadd.f32 %v2601_v9, %v2585_v6 }
0x131f   :  { %v4078_v62 = vpop.eup %4077 }
0x1320   :  { %4079 = vtanh.f32 %v5401_v50  ;;  %2658 = vrot.lane.b32.xlu1 %v4078_v62, %s4289_s24 }
0x1326   :  { %v4080_v53 = vpop.eup %4079 }
0x1327   :  { %2612 = vrot.lane.b32.xlu0 %v4080_v53, %s4289_s24 }
0x1349   :  { %v2611_v60 = vpop.permute.xlu2 %2610 }
0x134a   :  { %v2616_v5 = vmul.f32 %v2611_v60, %v5364_v41 }
0x1352   :  { %v2661_v32 = vpop.permute.xlu2 %2660 }
0x1353   :  { %v5409_v54 = vmul.f32 %v2661_v32, %v5371_v61 }
0x1380   :  { %v2563_v59 = vpop.permute.xlu0 %2562 }
0x1381   :  { %v2568_v10 = vmul.f32 %v2563_v59, %v5368_v22 }
0x1388   :  { %v2565_v8 = vpop.permute.xlu1 %2564 }
0x1389   :  { %v2569_v35 = vmul.f32 %v2565_v8, %v2533_v28 }
0x138b   :  { %v2668_v24 = vpack.c.bf16 %v2569_v35, %v2568_v10 }
0x138d   :  { %2670 = vrot.lane.b32.xlu0 %v2668_v24, %s4290_s21 }
0x1392   :  { %v2659_v58 = vpop.permute.xlu1 %2658 }
0x1393   :  { %v5411_v49 = vmul.f32 %v2659_v58, %v2628_v57 }
0x1395   :  { %v2724_v16 = vpack.c.bf16 %v5409_v54, %v5411_v49 }
0x1397   :  { %2726 = vrot.lane.b32.xlu2 %v2724_v16, %s4290_s21 }
0x1399   :  { %v2613_v34 = vpop.permute.xlu0 %2612 }
0x139a   :  { %v2617_v22 = vmul.f32 %v2613_v34, %v2581_v36 }
0x139c   :  { %v2689_v28 = vpack.c.bf16 %v2617_v22, %v2616_v5 }
0x139e   :  { %2691 = vrot.lane.b32.xlu1 %v2689_v28, %s4290_s21 }
0x13f1   :  { %v2727_v11 = vpop.permute.xlu2 %2726 }
0x13f2   :  { %3779 = vmatmul.msk.bf16.vlgmr.msrb.gmra.mxu1 %vm151_vm0, %v2727_v11 }
0x13ff   :  { %v2671_v37 = vpop.permute.xlu0 %2670 }
0x1400   :  { %3776 = vmatmul.msk.bf16.vlgmr.msrb.gmra.mxu2 %vm151_vm0, %v2671_v37 }
0x1410   :  { %v2692_v61 = vpop.permute.xlu1 %2691 }
0x1411   :  { %3777 = vmatmul.msk.bf16.vlgmr.msrb.gmra.mxu3 %vm151_vm0, %v2692_v61  ;;  %3778 = vmatmul.msk.bf16.vlgmr.msrb.gmra.mxu0 %vm151_vm0, %v2692_v61 }
0x146f   :  { %v2740_v48 = vpop.f32.mrf.mxu1 }
0x1477   :  { %v2742_v13 = vpop.f32.mrf.mxu1 }
0x1483   :  { %v2684_v12 = vpop.f32.mrf.mxu2 }
0x148b   :  { %v2686_v26 = vpop.f32.mrf.mxu2 }
0x148e   :  { %v2719_v23 = vpop.f32.mrf.mxu0 }
0x148f   :  { %v2793_v57 = vadd.f32 %v2740_v48, %v2719_v23 }
0x1491   :  { %v2795_v41 = vadd.f32 %v5265_v25, %v2793_v57 }
0x1493   :  { %4081 = vtanh.f32 %v2795_v41  ;;  %v2797_v51 = vmul.f32 0.5, %v2795_v41 }
0x1494   :  { %v2705_v56 = vpop.f32.mrf.mxu3 }
0x1495   :  { %v2745_v19 = vadd.f32 %v2705_v56, %v2684_v12 }
0x1496   :  { %v2721_v36 = vpop.f32.mrf.mxu0 }
0x1497   :  { %v2747_v17 = vadd.f32 %v5155_v33, %v2745_v19  ;;  %v2794_v46 = vadd.f32 %v2742_v13, %v2721_v36 }
0x1499   :  { %v4082_v52 = vpop.eup %4081  ;;  %4083 = vtanh.f32 %v2747_v17  ;;  %v2796_v63 = vadd.f32 %v5265_v25, %v2794_v46  ;;  %v2749_v6 = vmul.f32 0.5, %v2747_v17 }
0x149a   :  { %2811 = vrot.lane.b32.xlu2 %v4082_v52, %s4289_s24 }
0x149b   :  { %4085 = vtanh.f32 %v2796_v63  ;;  %v2798_v9 = vmul.f32 0.5, %v2796_v63 }
0x149c   :  { %v2707_v42 = vpop.f32.mrf.mxu3 }
0x149d   :  { %v2746_v40 = vadd.f32 %v2707_v42, %v2686_v26 }
0x149f   :  { %v4084_v3 = vpop.eup %4083  ;;  %v2748_v31 = vadd.f32 %v4127_v21, %v2746_v40 }
0x14a0   :  { %2763 = vrot.lane.b32.xlu0 %v4084_v3, %s4289_s24 }
0x14a1   :  { %4087 = vtanh.f32 %v2748_v31  ;;  %v4086_v33 = vpop.eup %4085  ;;  %v2750_v62 = vmul.f32 0.5, %v2748_v31 }
0x14a2   :  { %4089 = vtanh.f32 %v2797_v51 }
0x14a3   :  { %4091 = vtanh.f32 %v2749_v6 }
0x14a4   :  { %4093 = vtanh.f32 %v2798_v9 }
0x14a5   :  { %4095 = vtanh.f32 %v2750_v62 }
0x14a7   :  { %v4088_v15 = vpop.eup %4087 }
0x14a8   :  { %2765 = vrot.lane.b32.xlu1 %v4088_v15, %s4289_s24  ;;  %2813 = vrot.lane.b32.xlu0 %v4086_v33, %s4289_s24  ;;  %v4090_v55 = vpop.eup %4089 }
0x14a9   :  { %v2801_v47 = vadd.f32 1.0, %v4090_v55  ;;  %v4092_v53 = vpop.eup %4091 }
0x14aa   :  { %v2753_v59 = vadd.f32 1.0, %v4092_v53  ;;  %v4094_v60 = vpop.eup %4093 }
0x14ab   :  { %v2803_v0 = vmul.f32 0.5, %v2801_v47  ;;  %v4096_v10 = vpop.eup %4095  ;;  %v2802_v58 = vadd.f32 1.0, %v4094_v60 }
0x14ac   :  { %v2755_v8 = vmul.f32 0.5, %v2753_v59  ;;  %v2754_v32 = vadd.f32 1.0, %v4096_v10 }
0x14ad   :  { %v2804_v34 = vmul.f32 0.5, %v2802_v58  ;;  %v2807_v37 = vmul.f32 %v2803_v0, %v5397_v18 }
0x14ae   :  { %v2756_v16 = vmul.f32 0.5, %v2754_v32  ;;  %v2759_v19 = vmul.f32 %v2755_v8, %v5381_v7 }
0x14af   :  { %v2808_v13 = vmul.f32 %v2804_v34, %v5387_v20 }
0x14b0   :  { %v2760_v57 = vmul.f32 %v2756_v16, %v5401_v50 }
0x14f4   :  { %v2812_v30 = vpop.permute.xlu2 %2811 }
0x14f5   :  { %v2817_v1 = vmul.f32 %v2812_v30, %v2803_v0 }
0x14f7   :  { %2821 = vrot.lane.b32.xlu0 %v2817_v1, %s4290_s21 }
0x1512   :  { %v2764_v35 = vpop.permute.xlu0 %2763 }
0x1513   :  { %v2769_v24 = vmul.f32 %v2764_v35, %v2755_v8 }
0x1515   :  { %2773 = vrot.lane.b32.xlu1 %v2769_v24, %s4290_s21 }
0x151a   :  { %v2766_v5 = vpop.permute.xlu1 %2765  ;;  %v2814_v22 = vpop.permute.xlu0 %2813 }
0x151b   :  { %v2770_v28 = vmul.f32 %v2766_v5, %v2756_v16  ;;  %v2818_v11 = vmul.f32 %v2814_v22, %v2804_v34 }
0x151d   :  { %2775 = vrot.lane.b32.xlu2 %v2770_v28, %s4290_s21  ;;  %2823 = vrot.lane.b32.xlu1 %v2818_v11, %s4290_s21 }
0x1569   :  { %v2822_v61 = vpop.permute.xlu0 %2821 }
0x156a   :  { %v5437_v48 = vadd.f32 %v2822_v61, %v2807_v37 }
0x156c   :  { %4097 = vtanh.f32 %v5437_v48 }
0x1572   :  { %v4098_v23 = vpop.eup %4097 }
0x1573   :  { %2833 = vrot.lane.b32.xlu1 %v4098_v23, %s4289_s24 }
0x1577   :  { %v2776_v41 = vpop.permute.xlu2 %2775 }
0x1578   :  { %v2780_v12 = vadd.f32 %v2776_v41, %v2760_v57 }
0x157a   :  { %4099 = vtanh.f32 %v2780_v12  ;;  %v3821_v12 = vld [vmem:[%s5623_s9] ss:$0 sm:$0xff]  ;;  %s4296_s9 = smov [#allocation12]  }
0x1580   :  { %v4100_v56 = vpop.eup %4099 }
0x1581   :  { %2787 = vrot.lane.b32.xlu0 %v4100_v56, %s4289_s24 }
0x1587   :  { %v2774_v36 = vpop.permute.xlu1 %2773 }
0x1588   :  { %v2779_v18 = vadd.f32 %v2774_v36, %v2759_v19  ;;  %v1616_v19 = vadd.f32 %v5047_v39, %v4942_v45 }
0x158a   :  { %4101 = vtanh.f32 %v2779_v18  ;;  %v1854_v36 = vadd.f32 %v5138_v27, %v1616_v19 }
0x158c   :  { %v2092_v18 = vadd.f32 %v5222_v29, %v1854_v36 }
0x158f   :  { %v2824_v17 = vpop.permute.xlu1 %2823 }
0x1590   :  { %v4102_v46 = vpop.eup %4101  ;;  %v2828_v52 = vadd.f32 %v2824_v17, %v2808_v13  ;;  %v1617_v13 = vadd.f32 %v5045_v2, %v4940_v44  ;;  %v2428_v17 = vadd.f32 %v5327_v38, %v2092_v18 }
0x1591   :  { %2785 = vrot.lane.b32.xlu2 %v4102_v46, %s4289_s24  ;;  %v2969_v46 = vlaneseq }
0x1592   :  { %4103 = vtanh.f32 %v2828_v52 }
0x1598   :  { %v4104_v50 = vpop.eup %4103 }
0x1599   :  { %2835 = vrot.lane.b32.xlu2 %v4104_v50, %s4289_s24  ;;  %v1855_v50 = vadd.f32 %v5136_v14, %v1617_v13 }
0x15e5   :  { %v2834_v63 = vpop.permute.xlu1 %2833 }
0x15e6   :  { %v5447_v3 = vmul.f32 %v2834_v63, %v2803_v0 }
0x15eb   :  { %v2786_v26 = vpop.permute.xlu2 %2785 }
0x15ec   :  { %v2791_v7 = vmul.f32 %v2786_v26, %v2755_v8  ;;  %v2666_v26 = vadd.f32 %v5411_v49, %v2428_v17 }
0x15f3   :  { %v2788_v42 = vpop.permute.xlu0 %2787  ;;  %v2836_v40 = vpop.permute.xlu2 %2835 }
0x15f4   :  { %v2792_v21 = vmul.f32 %v2788_v42, %v2756_v16  ;;  %v5449_v31 = vmul.f32 %v2836_v40, %v2804_v34  ;;  %v2093_v42 = vadd.f32 %v5220_v4, %v1855_v50  ;;  %v2970_v40 = vshrl.u32 %v2969_v46, 7 }
0x15f6   :  { %v2843_v20 = vpack.c.bf16 %v2792_v21, %v2791_v7  ;;  %v2864_v33 = vpack.c.bf16 %v5449_v31, %v5447_v3  ;;  %v2429_v7 = vadd.f32 %v5325_v43, %v2093_v42  ;;  %vm2972_vm1 = vcmp.lt.s32.totalorder %v2970_v40, 4 }
0x15f8   :  { %2845 = vrot.lane.b32.xlu0 %v2843_v20, %s4290_s21  ;;  %2866 = vrot.lane.b32.xlu1 %v2864_v33, %s4290_s21 }
0x166a   :  { %v2846_v15 = vpop.permute.xlu0 %2845  ;;  %v2867_v51 = vpop.permute.xlu1 %2866 }
0x166b   :  { %3780 = vmatmul.msk.bf16.vlgmr.msra.gmra.mxu2 %vm151_vm0, %v2846_v15  ;;  %3781 = vmatmul.msk.bf16.vlgmr.msra.gmra.mxu3 %vm151_vm0, %v2867_v51 }
0x16ee   :  { %v2859_v55 = vpop.f32.mrf.mxu2  ;;  %v2880_v47 = vpop.f32.mrf.mxu3 }
0x16ef   :  { %v2885_v0 = vadd.f32 %v2880_v47, %v2859_v55 }
0x16f1   :  { %v2887_v30 = vadd.f32 %v5265_v25, %v2885_v0 }
0x16f3   :  { %4105 = vtanh.f32 %v2887_v30  ;;  %v2889_v60 = vmul.f32 0.5, %v2887_v30 }
0x16f6   :  { %v2861_v1 = vpop.f32.mrf.mxu2  ;;  %v2882_v6 = vpop.f32.mrf.mxu3 }
0x16f7   :  { %v2886_v9 = vadd.f32 %v2882_v6, %v2861_v1 }
0x16f9   :  { %v4106_v62 = vpop.eup %4105  ;;  %v2888_v53 = vadd.f32 %v5265_v25, %v2886_v9 }
0x16fa   :  { %2903 = vrot.lane.b32.xlu2 %v4106_v62, %s4289_s24 }
0x16fb   :  { %4107 = vtanh.f32 %v2888_v53  ;;  %v2890_v58 = vmul.f32 0.5, %v2888_v53 }
0x16fc   :  { %4109 = vtanh.f32 %v2889_v60 }
0x16fd   :  { %4111 = vtanh.f32 %v2890_v58 }
0x1701   :  { %v4108_v59 = vpop.eup %4107 }
0x1702   :  { %2905 = vrot.lane.b32.xlu0 %v4108_v59, %s4289_s24  ;;  %v4110_v8 = vpop.eup %4109 }
0x1703   :  { %v2893_v10 = vadd.f32 1.0, %v4110_v8  ;;  %v4112_v16 = vpop.eup %4111 }
0x1704   :  { %v2894_v34 = vadd.f32 1.0, %v4112_v16 }
0x1705   :  { %v2895_v35 = vmul.f32 0.5, %v2893_v10 }
0x1706   :  { %v2896_v25 = vmul.f32 0.5, %v2894_v34 }
0x1707   :  { %v2899_v28 = vmul.f32 %v2895_v35, %v5437_v48  ;;  %v3822_v48 = vld [vmem:[%s5622_s8] ss:$0 sm:$0xff] }
0x1708   :  { %v2900_v61 = vmul.f32 %v2896_v25, %v2828_v52 }
0x1754   :  { %v2904_v24 = vpop.permute.xlu2 %2903 }
0x1755   :  { %v2909_v32 = vmul.f32 %v2904_v24, %v2895_v35 }
0x1757   :  { %2913 = vrot.lane.b32.xlu1 %v2909_v32, %s4290_s21 }
0x1774   :  { %v2906_v5 = vpop.permute.xlu0 %2905 }
0x1775   :  { %v2910_v22 = vmul.f32 %v2906_v5, %v2896_v25 }
0x1777   :  { %2915 = vrot.lane.b32.xlu2 %v2910_v22, %s4290_s21 }
0x177f   :  { %3024 = vrot.lane.b32.xlu2 %v3822_v48, %s4291_s30 }
0x17c9   :  { %v2914_v11 = vpop.permute.xlu1 %2913 }
0x17ca   :  { %v2919_v37 = vadd.f32 %v2914_v11, %v2899_v28 }
0x17cc   :  { %4113 = vtanh.f32 %v2919_v37 }
0x17d1   :  { %v2916_v23 = vpop.permute.xlu2 %2915 }
0x17d2   :  { %v4114_v57 = vpop.eup %4113  ;;  %v2920_v41 = vadd.f32 %v2916_v23, %v2900_v61 }
0x17d3   :  { %2925 = vrot.lane.b32.xlu0 %v4114_v57, %s4289_s24 }
0x17d4   :  { %4115 = vtanh.f32 %v2920_v41 }
0x17d9   :  { %v3025_v46 = vpop.permute.xlu2 %3024 }
0x17da   :  { %v4116_v56 = vpop.eup %4115 }
0x17db   :  { %3031 = vrot.lane.b32.xlu0 %v3821_v12, %s4291_s30  ;;  %2927 = vrot.lane.b32.xlu1 %v4116_v56, %s4289_s24 }
0x17e3   :  { %2096 = vrot.lane.b32.xlu0 %v4942_v45, %s4290_s21  ;;  %v2841_v45 = vadd.f32 %v5447_v3, %v2666_v26 }
0x17eb   :  { %2106 = vrot.lane.b32.xlu0 %v5045_v2, %s4289_s24  ;;  %v2667_v2 = vadd.f32 %v5409_v54, %v2429_v7 }
0x17f3   :  { %2945 = vrot.lane.b32.xlu0 %v5411_v49, %s4289_s24  ;;  %v4292_v49 = vmov 0.0  }
0x17f4   :  { %v5501_v51 = vsel %vm2972_vm1, 1.0, %v4292_v49  ;;  %vm3621_vm1 = vcmask 392192  }
0x17fb   :  { %2114 = vrot.lane.b32.xlu0 %v5136_v14, %s4291_s30  ;;  %v2842_v14 = vadd.f32 %v5449_v31, %v2667_v2  ;;  %v3038_v2 = vld [vmem:[#allocation9 + $0x10] sm:$0xff] }
0x1845   :  { %v2926_v52 = vpop.permute.xlu0 %2925 }
0x1846   :  { %v5491_v63 = vmul.f32 %v2926_v52, %v2895_v35 }
0x1848   :  { %v2933_v21 = vadd.f32 %v5491_v63, %v2841_v45 }
0x184a   :  { %v2967_v33 = vmul.f32 0.125, %v2933_v21 }
0x184c   :  { %v2980_v47 = vmul.f32 %v5501_v51, %v2967_v33 }
0x184d   :  { %v2928_v20 = vpop.permute.xlu1 %2927  ;;  %v3032_v40 = vpop.permute.xlu0 %3031 }
0x184e   :  { %v5499_v15 = vmul.f32 %v2928_v20, %v2896_v25  ;;  %v2983_v1 = vsel %vm2982_vm2, %v2980_v47, 0.0  ;;  %v3068_v20 = vand.u32 4294901760, %v3038_v2 }
0x1850   :  { %v2934_v55 = vadd.f32 %v5499_v15, %v2842_v14  ;;  %v3110_v14 = vsub.f32 %v3038_v2, %v3068_v20 }
0x1852   :  { %v2968_v0 = vmul.f32 0.125, %v2934_v55 }
0x1854   :  { %v2981_v30 = vmul.f32 0.0, %v2968_v0 }
0x1856   :  { %v2984_v6 = vsel %vm2982_vm2, %v2981_v30, 0.0 }
0x1857   :  { %v2985_v9 = vadd.f32 %v2984_v6, %v2983_v1 }
0x1859   :  { %v2986_v62 = vrot.slane %v2985_v9, 4 }
0x185b   :  { %v2987_v53 = vadd.f32 %v2986_v62, %v2985_v9 }
0x185d   :  { %v2988_v59 = vrot.slane %v2987_v53, 2 }
0x185f   :  { %v2989_v60 = vadd.f32 %v2988_v59, %v2987_v53 }
0x1861   :  { %v2990_v8 = vrot.slane %v2989_v60, 1 }
0x1863   :  { %v2991_v10 = vadd.f32 %v2990_v8, %v2989_v60 }
0x1865   :  { %v2992_v35 = vmul.f32 0.25, %v2991_v10  ;;  %v2097_v10 = vpop.permute.xlu0 %2096 }
0x1867   :  { %v2994_v24 = vsub.f32 %v2968_v0, %v2992_v35  ;;  %v2993_v32 = vsub.f32 %v2967_v33, %v2992_v35 }
0x1869   :  { %v2996_v58 = vmul.f32 %v2994_v24, %v2994_v24  ;;  %v2995_v16 = vmul.f32 %v2993_v32, %v2993_v32 }
0x186b   :  { %v2998_v34 = vmul.f32 0.0, %v2996_v58  ;;  %v2997_v25 = vmul.f32 %v5501_v51, %v2995_v16 }
0x186d   :  { %v3000_v5 = vsel %vm2982_vm2, %v2998_v34, 0.0  ;;  %v2999_v22 = vsel %vm2982_vm2, %v2997_v25, 0.0 }
0x186e   :  { %v3001_v28 = vadd.f32 %v3000_v5, %v2999_v22 }
0x1870   :  { %v3002_v11 = vrot.slane %v3001_v28, 4 }
0x1872   :  { %v3003_v37 = vadd.f32 %v3002_v11, %v3001_v28 }
0x1874   :  { %v3004_v61 = vrot.slane %v3003_v37, 2 }
0x1876   :  { %v3005_v23 = vadd.f32 %v3004_v61, %v3003_v37 }
0x1878   :  { %v3006_v57 = vrot.slane %v3005_v23, 1 }
0x187a   :  { %v3007_v41 = vadd.f32 %v3006_v57, %v3005_v23 }
0x187c   :  { %v3008_v12 = vmul.f32 0.25, %v3007_v41 }
0x187e   :  { %v3009_v56 = vadd.f32 1e-05, %v3008_v12 }
0x1880   :  { %4117 = vrsqrt.f32 %v3009_v56  ;;  %vm3016_vm4 = vweird.f32 %v3009_v56 }
0x1886   :  { %v4118_v48 = vpop.eup %4117 }
0x1887   :  { %v3011_v19 = vmul.f32 %v4118_v48, %v3009_v56  ;;  %vm3017_vm3 = vweird.f32 %v4118_v48 }
0x1888   :  { %vm3018_vm5 = vmor %vm3016_vm4, %vm3017_vm3 }
0x1889   :  { %v3012_v36 = vmul.f32 %v4118_v48, %v3011_v19 }
0x188b   :  { %v3013_v18 = vmul.f32 0.5, %v3012_v36 }
0x188d   :  { %v3014_v13 = vsub.f32 1.5, %v3013_v18 }
0x188f   :  { %v3015_v17 = vmul.f32 %v4118_v48, %v3014_v13 }
0x1891   :  { %v3019_v52 = vsel %vm3018_vm5, %v4118_v48, %v3015_v17 }
0x1892   :  { %v3020_v50 = vmul.f32 %v3019_v52, %v2993_v32  ;;  %v3021_v26 = vmul.f32 %v3019_v52, %v2994_v24  ;;  %v2107_v24 = vpop.permute.xlu0 %2106 }
0x1894   :  { %v3027_v42 = vmul.f32 %v3025_v46, %v3020_v50  ;;  %v3028_v45 = vmul.f32 %v3025_v46, %v3021_v26 }
0x1896   :  { %v3034_v7 = vadd.f32 %v3032_v40, %v3027_v42  ;;  %v3035_v21 = vadd.f32 %v3032_v40, %v3028_v45 }
0x1898   :  { %3048 = vrot.lane.b32.xlu2 %v3035_v21, %s4290_s21  ;;  %3046 = vrot.lane.b32.xlu1 %v3034_v7, %s4290_s21 }
0x189a   :  { %v2946_v58 = vpop.permute.xlu0 %2945 }
0x18a0   :  { %2104 = vrot.lane.b32.xlu2 %v5047_v39, %s4289_s24  ;;  %2098 = vrot.lane.b32.xlu1 %v4940_v44, %s4290_s21  ;;  %v3039_v39 = vld [vmem:[#allocation9 + $0x18] sm:$0xff] }
0x18a1   :  { %v3066_v44 = vand.u32 4294901760, %v3039_v39 }
0x18a2   :  { %v2115_v48 = vpop.permute.xlu0 %2114 }
0x18a3   :  { %3067 = vmatpush.msra.mxu0 %v3066_v44  ;;  %3184 = vmatpush.msrb.mxu3 %v3066_v44 }
0x18a5   :  { %3069 = vmatpush.msra.mxu0 %v3068_v20  ;;  %3186 = vmatpush.msrb.mxu3 %v3068_v20 }
0x18a8   :  { %2939 = vrot.lane.b32.xlu2 %v5325_v43, %s4290_s21  ;;  %2937 = vrot.lane.b32.xlu1 %v5327_v38, %s4290_s21  ;;  %v3104_v43 = vsub.f32 %v3039_v39, %v3066_v44  ;;  %v3037_v38 = vld [vmem:[#allocation9 + $0x8] sm:$0xff] }
0x18aa   :  { %v3105_v33 = vand.u32 4294901760, %v3104_v43  ;;  %3150 = vmatpush.msrb.mxu2 %v3104_v43 }
0x18ac   :  { %v3106_v49 = vsub.f32 %v3104_v43, %v3105_v33  ;;  %3153 = vmatpush.msrb.mxu2 %v3110_v14  ;;  %v3823_v43 = vld [vmem:[%s5625_s11] ss:$0 sm:$0xff]  ;;  %s3643_s11 = sshll.u32 %s4296_s9, 4  ;;  %s3644_s11 = int_to_ptr.vmem [resolvable:$true] %s3643_s11 }
0x18ae   :  { %v3107_v47 = vand.u32 4294901760, %v3106_v49 }
0x18b0   :  { %2112 = vrot.lane.b32.xlu2 %v5138_v27, %s4291_s30  ;;  %2947 = vrot.lane.b32.xlu1 %v5409_v54, %s4289_s24  ;;  %v3070_v27 = vand.u32 4294901760, %v3037_v38  ;;  %v3036_v54 = vld [vmem:[#allocation9] sm:$0xff] }
0x18b1   :  { %v3072_v55 = vand.u32 4294901760, %v3036_v54  ;;  %3108 = vmatpush.msra.mxu1 %v3107_v47 }
0x18b2   :  { %3071 = vmatpush.msra.mxu0 %v3070_v27  ;;  %3188 = vmatpush.msrb.mxu3 %v3070_v27 }
0x18b3   :  { %v3122_v30 = vsub.f32 %v3036_v54, %v3072_v55 }
0x18b4   :  { %3190 = vmatpush.msrb.mxu3 %v3072_v55  ;;  %3073 = vmatpush.msra.mxu0 %v3072_v55 }
0x18b5   :  { %v3123_v9 = vand.u32 4294901760, %v3122_v30 }
0x18b6   :  { %3219 = vmatpush.msrb.mxu0 %v3105_v33 }
0x18b7   :  { %v3124_v53 = vsub.f32 %v3122_v30, %v3123_v9 }
0x18b8   :  { %2955 = vrot.lane.b32.xlu2 %v5449_v31, %s4291_s30  ;;  %2953 = vrot.lane.b32.xlu1 %v5447_v3, %s4291_s30  ;;  %v3111_v31 = vand.u32 4294901760, %v3110_v14  ;;  %v3116_v3 = vsub.f32 %v3037_v38, %v3070_v27 }
0x18b9   :  { %v3125_v60 = vand.u32 4294901760, %v3124_v53 }
0x18ba   :  { %v3112_v0 = vsub.f32 %v3110_v14, %v3111_v31  ;;  %v3117_v1 = vand.u32 4294901760, %v3116_v3  ;;  %3156 = vmatpush.msrb.mxu2 %v3116_v3  ;;  %3223 = vmatpush.msrb.mxu0 %v3111_v31 }
0x18bc   :  { %v3113_v6 = vand.u32 4294901760, %v3112_v0  ;;  %v3118_v62 = vsub.f32 %v3116_v3, %v3117_v1  ;;  %3159 = vmatpush.msrb.mxu2 %v3122_v30  ;;  %3227 = vmatpush.msrb.mxu0 %v3117_v1 }
0x18be   :  { %3114 = vmatpush.msra.mxu1 %v3113_v6  ;;  %v3119_v59 = vand.u32 4294901760, %v3118_v62  ;;  %3231 = vmatpush.msrb.mxu0 %v3123_v9 }
0x18c0   :  { %3120 = vmatpush.msra.mxu1 %v3119_v59 }
0x18c2   :  { %3126 = vmatpush.msra.mxu1 %v3125_v60 }
0x18c4   :  { %3254 = vmatpush.msrb.mxu1 %v3066_v44 }
0x18c6   :  { %3256 = vmatpush.msrb.mxu1 %v3068_v20 }
0x18c8   :  { %3258 = vmatpush.msrb.mxu1 %v3070_v27 }
0x18ca   :  { %3260 = vmatpush.msrb.mxu1 %v3072_v55 }
0x18f2   :  { %v3049_v8 = vpop.permute.xlu2 %3048 }
0x18f3   :  { %v3052_v16 = vsel %vm151_vm0, %v3049_v8, 0 }
0x18f4   :  { %v3082_v11 = vand.u32 4294901760, %v3052_v16 }
0x18f6   :  { %v3083_v57 = vsub.f32 %v3052_v16, %v3082_v11 }
0x18f8   :  { %v3084_v13 = vand.u32 4294901760, %v3083_v57 }
0x18fa   :  { %v2105_v35 = vpop.permute.xlu2 %2104  ;;  %v3085_v17 = vsub.f32 %v3083_v57, %v3084_v13 }
0x18fb   :  { %v2118_v34 = vsel %vm151_vm0, %v2097_v10, %v2105_v35 }
0x18fc   :  { %v3086_v52 = vand.u32 4294901760, %v3085_v17 }
0x1902   :  { %v2940_v32 = vpop.permute.xlu2 %2939 }
0x190a   :  { %v2113_v25 = vpop.permute.xlu2 %2112  ;;  %v3047_v5 = vpop.permute.xlu1 %3046 }
0x190b   :  { %v2121_v22 = vsel %vm2120_vm6, %v2118_v34, %v2113_v25  ;;  %v3050_v28 = vsel %vm151_vm0, %v3047_v5, 0 }
0x190c   :  { %v2124_v37 = vsel %vm2123_vm7, %v2121_v22, %v5222_v29  ;;  %v3074_v61 = vand.u32 4294901760, %v3050_v28 }
0x190d   :  { %2126 = vst [vmem:[#allocation11] sm:$0xff] %v2124_v37 }
0x190e   :  { %v3075_v23 = vsub.f32 %v3050_v28, %v3074_v61  ;;  %3128 = vmatmul.f32.vlgmr.msra.gmra.mxu1 %v3074_v61 }
0x1910   :  { %v3076_v41 = vand.u32 4294901760, %v3075_v23  ;;  %3162 = vmatmul.f32.vlgmr.msrb.gmra.mxu2 %v3075_v23 }
0x1912   :  { %v3077_v12 = vsub.f32 %v3075_v23, %v3076_v41  ;;  %3194 = vmatmul.f32.vlgmr.msrb.gmra.mxu3 %v3076_v41  ;;  %v2099_v56 = vpop.permute.xlu1 %2098  ;;  %v2956_v26 = vpop.permute.xlu2 %2955 }
0x1913   :  { %v2119_v19 = vsel %vm151_vm0, %v2099_v56, %v2107_v24 }
0x1914   :  { %v3078_v36 = vand.u32 4294901760, %v3077_v12  ;;  %v2122_v18 = vsel %vm2120_vm6, %v2119_v19, %v2115_v48  ;;  %v3332_v48 = vld [vmem:[%s5628_s14 + $0x18] sm:$0xff] }
0x1915   :  { %v2125_v29 = vsel %vm2123_vm7, %v2122_v18, %v5220_v4  ;;  %v3331_v18 = vld [vmem:[%s5628_s14 + $0x10] sm:$0xff] }
0x1916   :  { %2127 = vst [vmem:[#allocation11 + $0x10] sm:$0xff] %v2125_v29  ;;  %3079 = vmatmul.f32.vlgmr.msra.gmra.mxu0 %v3078_v36  ;;  %3132 = vmatmul.f32.gmra.mxu1 %v3082_v11  ;;  %v3355_v36 = vand.u32 4294901760, %v3332_v48  ;;  %v3357_v17 = vand.u32 4294901760, %v3331_v18 }
0x1918   :  { %3167 = vmatmul.f32.gmra.mxu2 %v3083_v57  ;;  %v3393_v29 = vsub.f32 %v3332_v48, %v3355_v36  ;;  %3473 = vmatpush.msra.mxu1 %v3355_v36 }
0x1919   :  { %3356 = vmatpush.msra.mxu2 %v3355_v36 }
0x191a   :  { %3200 = vmatmul.f32.gmra.mxu3 %v3084_v13  ;;  %v2938_v46 = vpop.permute.xlu1 %2937  ;;  %3439 = vmatpush.msra.mxu0 %v3393_v29 }
0x191b   :  { %v2959_v4 = vsel %vm151_vm0, %v2938_v46, %v2946_v58  ;;  %v3330_v46 = vld [vmem:[%s5628_s14 + $0x8] sm:$0xff]  ;;  %3358 = vmatpush.msra.mxu2 %v3357_v17  ;;  %3475 = vmatpush.msra.mxu1 %v3357_v17 }
0x191e   :  { %3087 = vmatmul.f32.gmra.mxu0 %v3086_v52  ;;  %3262 = vmatmul.f32.vlgmr.msrb.gmra.mxu1 %v3074_v61 }
0x1922   :  { %v2948_v50 = vpop.permute.xlu1 %2947 }
0x1923   :  { %v2960_v42 = vsel %vm151_vm0, %v2940_v32, %v2948_v50  ;;  %v3394_v50 = vand.u32 4294901760, %v3393_v29 }
0x1924   :  { %v2962_v45 = vsel %vm2120_vm6, %v2960_v42, %v2956_v26  ;;  %v3399_v26 = vsub.f32 %v3331_v18, %v3357_v17  ;;  %v3359_v42 = vand.u32 4294901760, %v3330_v46  ;;  %v3826_v18 = vld [vmem:[%s5629_s15] ss:$0 sm:$0xff] }
0x1925   :  { %v2964_v40 = vsel %vm2123_vm7, %v2962_v45, %v5499_v15  ;;  %v3329_v45 = vld [vmem:[%s5628_s14] sm:$0xff] }
0x1926   :  { %2966 = vst [vmem:[#allocation11 + $0x18] sm:$0xff] %v2964_v40  ;;  %3233 = vmatmul.f32.vlgmr.msrb.gmra.mxu0 %v3074_v61  ;;  %3266 = vmatmul.f32.gmra.mxu1 %v3082_v11 }
0x1927   :  { %3442 = vmatpush.msra.mxu0 %v3399_v26  ;;  %3360 = vmatpush.msra.mxu2 %v3359_v42 }
0x1928   :  { %3477 = vmatpush.msra.mxu1 %v3359_v42 }
0x192a   :  { %v2954_v7 = vpop.permute.xlu1 %2953 }
0x192b   :  { %v2961_v21 = vsel %vm2120_vm6, %v2959_v4, %v2954_v7  ;;  %v3395_v4 = vsub.f32 %v3393_v29, %v3394_v50  ;;  %v3400_v7 = vand.u32 4294901760, %v3399_v26 }
0x192c   :  { %v2963_v39 = vsel %vm2123_vm7, %v2961_v21, %v5491_v63  ;;  %v3405_v21 = vsub.f32 %v3330_v46, %v3359_v42 }
0x192d   :  { %2965 = vst [vmem:[#allocation11 + $0x8] sm:$0xff] %v2963_v39  ;;  %v3361_v39 = vand.u32 4294901760, %v3329_v45 }
0x192e   :  { %3237 = vmatmul.f32.gmra.mxu0 %v3082_v11 }
0x192f   :  { %3445 = vmatpush.msra.mxu0 %v3405_v21  ;;  %3479 = vmatpush.msra.mxu1 %v3361_v39 }
0x1930   :  { %3362 = vmatpush.msra.mxu2 %v3361_v39 }
0x1932   :  { %3508 = vmatpush.msrb.mxu2 %v3394_v50 }
0x1934   :  { %3512 = vmatpush.msrb.mxu2 %v3400_v7 }
0x198b   :  { %v3129_v44 = vpop.f32.mrf.mxu1 }
0x1993   :  { %v3080_v2 = vpop.f32.mrf.mxu0  ;;  %v3133_v20 = vpop.f32.mrf.mxu1 }
0x1994   :  { %v3081_v15 = vadd.f32 %v3823_v43, %v3080_v2  ;;  %v3163_v38 = vpop.f32.mrf.mxu2  ;;  %v3396_v2 = vand.u32 4294901760, %v3395_v4 }
0x1995   :  { %v3195_v54 = vpop.f32.mrf.mxu3 }
0x1996   :  { %v3130_v14 = vadd.f32 %v3129_v44, %v3081_v15  ;;  %v3406_v15 = vand.u32 4294901760, %v3405_v21  ;;  %3397 = vmatpush.msra.mxu3 %v3396_v2 }
0x1998   :  { %v3164_v49 = vadd.f32 %v3163_v38, %v3130_v14  ;;  %v3407_v14 = vsub.f32 %v3405_v21, %v3406_v15  ;;  %3516 = vmatpush.msrb.mxu2 %v3406_v15 }
0x199a   :  { %v3196_v63 = vadd.f32 %v3195_v54, %v3164_v49  ;;  %v3408_v49 = vand.u32 4294901760, %v3407_v14 }
0x199b   :  { %v3088_v33 = vpop.f32.mrf.mxu0  ;;  %v3263_v55 = vpop.f32.mrf.mxu1 }
0x199c   :  { %v3089_v27 = vadd.f32 %v3823_v43, %v3088_v33  ;;  %v3168_v47 = vpop.f32.mrf.mxu2  ;;  %v3401_v43 = vsub.f32 %v3399_v26, %v3400_v7 }
0x199d   :  { %v3201_v1 = vpop.f32.mrf.mxu3 }
0x199e   :  { %v3134_v31 = vadd.f32 %v3133_v20, %v3089_v27  ;;  %v3411_v20 = vsub.f32 %v3329_v45, %v3361_v39  ;;  %v3402_v33 = vand.u32 4294901760, %v3401_v43 }
0x19a0   :  { %v3169_v0 = vadd.f32 %v3168_v47, %v3134_v31  ;;  %v3412_v27 = vand.u32 4294901760, %v3411_v20  ;;  %3448 = vmatpush.msra.mxu0 %v3411_v20  ;;  %3403 = vmatpush.msra.mxu3 %v3402_v33 }
0x19a2   :  { %v3202_v6 = vadd.f32 %v3201_v1, %v3169_v0  ;;  %v3413_v31 = vsub.f32 %v3411_v20, %v3412_v27  ;;  %3409 = vmatpush.msra.mxu3 %v3408_v49  ;;  %3520 = vmatpush.msrb.mxu2 %v3412_v27 }
0x19a3   :  { %v3234_v3 = vpop.f32.mrf.mxu0  ;;  %v3267_v59 = vpop.f32.mrf.mxu1 }
0x19a4   :  { %v3235_v30 = vadd.f32 %v3234_v3, %v3196_v63  ;;  %v3414_v3 = vand.u32 4294901760, %v3413_v31 }
0x19a6   :  { %v3264_v9 = vadd.f32 %v3263_v55, %v3235_v30  ;;  %3415 = vmatpush.msra.mxu3 %v3414_v3 }
0x19a8   :  { %v3272_v60 = vmul.f32 %v5501_v51, %v3264_v9  ;;  %3543 = vmatpush.msrb.mxu3 %v3355_v36 }
0x19aa   :  { %v3274_v35 = vsel %vm151_vm0, %v3272_v60, 0.0  ;;  %3545 = vmatpush.msrb.mxu3 %v3357_v17 }
0x19ab   :  { %v3238_v62 = vpop.f32.mrf.mxu0 }
0x19ac   :  { %v3239_v53 = vadd.f32 %v3238_v62, %v3202_v6  ;;  %3547 = vmatpush.msrb.mxu3 %v3359_v42  ;;  %v3824_v62 = vld [vmem:[%s5626_s12] ss:$0 sm:$0xff]  ;;  %s4293_s12 = smov 16  }
0x19ad   :  { %3638 = dma.vmem_to_hbm [thread:$0]  %s3631_s4, 512, %s3633_s23, [#allocation5], %s4295_s0, %s4295_s0, %s4293_s12  }
0x19ae   :  { %v3268_v8 = vadd.f32 %v3267_v59, %v3239_v53  ;;  %3549 = vmatpush.msrb.mxu3 %v3361_v39 }
0x19b0   :  { %v3273_v10 = vmul.f32 0.0, %v3268_v8 }
0x19b2   :  { %v3275_v24 = vsel %vm151_vm0, %v3273_v10, 0.0 }
0x19b3   :  { %v3276_v32 = vadd.f32 %v3275_v24, %v3274_v35 }
0x19b5   :  { %v3277_v58 = vrot.slane %v3276_v32, 4 }
0x19b7   :  { %v3278_v16 = vadd.f32 %v3277_v58, %v3276_v32 }
0x19b9   :  { %v3279_v34 = vrot.slane %v3278_v16, 2 }
0x19bb   :  { %v3280_v25 = vadd.f32 %v3279_v34, %v3278_v16 }
0x19bd   :  { %v3281_v5 = vrot.slane %v3280_v25, 1 }
0x19bf   :  { %v3282_v22 = vadd.f32 %v3281_v5, %v3280_v25 }
0x19c1   :  { %v3283_v28 = vmul.f32 0.25, %v3282_v22 }
0x19c3   :  { %v5552_v11 = vsub.f32 %v3264_v9, %v3283_v28  ;;  %v5554_v37 = vsub.f32 %v3268_v8, %v3283_v28  ;;  %v3825_v8 = vld [vmem:[%s5627_s13] ss:$0 sm:$0xff] }
0x19c5   :  { %v3286_v61 = vmul.f32 %v5552_v11, %v5552_v11  ;;  %v3287_v23 = vmul.f32 %v5554_v37, %v5554_v37 }
0x19c7   :  { %v3288_v57 = vmul.f32 %v5501_v51, %v3286_v61  ;;  %v3289_v41 = vmul.f32 0.0, %v3287_v23 }
0x19c9   :  { %v3290_v12 = vsel %vm151_vm0, %v3288_v57, 0.0  ;;  %v3291_v56 = vsel %vm151_vm0, %v3289_v41, 0.0 }
0x19ca   :  { %v3292_v19 = vadd.f32 %v3291_v56, %v3290_v12 }
0x19cc   :  { %v3293_v13 = vrot.slane %v3292_v19, 4 }
0x19ce   :  { %v3294_v52 = vadd.f32 %v3293_v13, %v3292_v19 }
0x19d0   :  { %v3295_v40 = vrot.slane %v3294_v52, 2 }
0x19d2   :  { %v3296_v44 = vadd.f32 %v3295_v40, %v3294_v52 }
0x19d4   :  { %v3297_v38 = vrot.slane %v3296_v44, 1 }
0x19d6   :  { %v3298_v54 = vadd.f32 %v3297_v38, %v3296_v44 }
0x19d8   :  { %v3299_v55 = vmul.f32 0.25, %v3298_v54 }
0x19da   :  { %v3300_v63 = vadd.f32 1e-05, %v3299_v55 }
0x19dc   :  { %4119 = vrsqrt.f32 %v3300_v63  ;;  %vm3307_vm9 = vweird.f32 %v3300_v63 }
0x19e2   :  { %v4120_v47 = vpop.eup %4119 }
0x19e3   :  { %v3302_v0 = vmul.f32 %v4120_v47, %v3300_v63  ;;  %vm3308_vm8 = vweird.f32 %v4120_v47 }
0x19e4   :  { %vm3309_vm10 = vmor %vm3307_vm9, %vm3308_vm8 }
0x19e5   :  { %v3303_v30 = vmul.f32 %v4120_v47, %v3302_v0 }
0x19e7   :  { %v3304_v1 = vmul.f32 0.5, %v3303_v30 }
0x19e9   :  { %v3305_v6 = vsub.f32 1.5, %v3304_v1 }
0x19eb   :  { %v3306_v9 = vmul.f32 %v4120_v47, %v3305_v6 }
0x19ed   :  { %v3310_v53 = vsel %vm3309_vm10, %v4120_v47, %v3306_v9 }
0x19ee   :  { %v3311_v59 = vmul.f32 %v3310_v53, %v5552_v11  ;;  %v3312_v60 = vmul.f32 %v3310_v53, %v5554_v37 }
0x19f0   :  { %v3317_v10 = vmul.f32 %v3824_v62, %v3312_v60  ;;  %v3316_v35 = vmul.f32 %v3824_v62, %v3311_v59 }
0x19f2   :  { %v3322_v24 = vadd.f32 %v3825_v8, %v3317_v10  ;;  %v3321_v32 = vadd.f32 %v3825_v8, %v3316_v35 }
0x19f4   :  { %vm3324_vm11 = vcmp.gt.f32.partialorder %v3322_v24, 0.0  ;;  %v3326_v58 = vmul.f32 0.2, %v3322_v24  ;;  %vm3323_vm12 = vcmp.gt.f32.partialorder %v3321_v32, 0.0  ;;  %v3325_v16 = vmul.f32 0.2, %v3321_v32 }
0x19f6   :  { %v3328_v34 = vsel %vm3324_vm11, %v3322_v24, %v3326_v58  ;;  %v3327_v25 = vsel %vm3323_vm12, %v3321_v32, %v3325_v16 }
0x19f7   :  { %3615 = vrot.lane.b32.xlu1 %v3328_v34, %s4293_s12  ;;  %v3341_v5 = vsel %vm151_vm0, %v3328_v34, 0  ;;  %3613 = vrot.lane.b32.xlu0 %v3327_v25, %s4293_s12  ;;  %v3338_v22 = vsel %vm151_vm0, %v3327_v25, 0 }
0x19f8   :  { %v3371_v28 = vand.u32 4294901760, %v3341_v5  ;;  %v3363_v11 = vand.u32 4294901760, %v3338_v22 }
0x19fa   :  { %v3364_v37 = vsub.f32 %v3338_v22, %v3363_v11  ;;  %3417 = vmatmul.f32.vlgmr.msra.gmra.mxu3 %v3363_v11  ;;  %v3372_v23 = vsub.f32 %v3341_v5, %v3371_v28 }
0x19fc   :  { %v3365_v61 = vand.u32 4294901760, %v3364_v37  ;;  %3451 = vmatmul.f32.vlgmr.msra.gmra.mxu0 %v3364_v37  ;;  %v3373_v12 = vand.u32 4294901760, %v3372_v23 }
0x19fe   :  { %v3366_v57 = vsub.f32 %v3364_v37, %v3365_v61  ;;  %3483 = vmatmul.f32.vlgmr.msra.gmra.mxu1 %v3365_v61  ;;  %v3374_v56 = vsub.f32 %v3372_v23, %v3373_v12 }
0x1a00   :  { %v3367_v41 = vand.u32 4294901760, %v3366_v57  ;;  %v3375_v48 = vand.u32 4294901760, %v3374_v56 }
0x1a02   :  { %3368 = vmatmul.f32.vlgmr.msra.gmra.mxu2 %v3367_v41  ;;  %3421 = vmatmul.f32.gmra.mxu3 %v3371_v28  ;;  %v3827_v41 = vld [vmem:[%s5630_s16] ss:$0 sm:$0xff] }
0x1a04   :  { %3456 = vmatmul.f32.gmra.mxu0 %v3372_v23 }
0x1a06   :  { %3489 = vmatmul.f32.gmra.mxu1 %v3373_v12 }
0x1a0a   :  { %3376 = vmatmul.f32.gmra.mxu2 %v3375_v48  ;;  %3551 = vmatmul.f32.vlgmr.msrb.gmra.mxu3 %v3363_v11 }
0x1a12   :  { %3522 = vmatmul.f32.vlgmr.msrb.gmra.mxu2 %v3363_v11  ;;  %3555 = vmatmul.f32.gmra.mxu3 %v3371_v28 }
0x1a1a   :  { %3526 = vmatmul.f32.gmra.mxu2 %v3371_v28 }
0x1a79   :  { %v3452_v17 = vpop.f32.mrf.mxu0 }
0x1a7b   :  { %v3484_v26 = vpop.f32.mrf.mxu1 }
0x1a7d   :  { %v3418_v19 = vpop.f32.mrf.mxu3 }
0x1a81   :  { %v3457_v21 = vpop.f32.mrf.mxu0 }
0x1a83   :  { %v3490_v2 = vpop.f32.mrf.mxu1 }
0x1a85   :  { %v3369_v36 = vpop.f32.mrf.mxu2  ;;  %v3422_v29 = vpop.f32.mrf.mxu3 }
0x1a86   :  { %v3370_v13 = vadd.f32 %v3826_v18, %v3369_v36 }
0x1a88   :  { %v3419_v52 = vadd.f32 %v3418_v19, %v3370_v13  ;;  %v3828_v19 = vld [vmem:[%s5631_s17] ss:$0 sm:$0xff] }
0x1a8a   :  { %v3453_v42 = vadd.f32 %v3452_v17, %v3419_v52  ;;  %v3614_v17 = vpop.permute.xlu0 %3613 }
0x1a8c   :  { %v3485_v7 = vadd.f32 %v3484_v26, %v3453_v42 }
0x1a8d   :  { %v3377_v46 = vpop.f32.mrf.mxu2  ;;  %v3552_v40 = vpop.f32.mrf.mxu3 }
0x1a8e   :  { %v3378_v50 = vadd.f32 %v3826_v18, %v3377_v46  ;;  %v3616_v46 = vpop.permute.xlu1 %3615 }
0x1a90   :  { %v3423_v45 = vadd.f32 %v3422_v29, %v3378_v50 }
0x1a92   :  { %v3458_v44 = vadd.f32 %v3457_v21, %v3423_v45 }
0x1a94   :  { %v3491_v15 = vadd.f32 %v3490_v2, %v3458_v44 }
0x1a95   :  { %v3523_v4 = vpop.f32.mrf.mxu2  ;;  %v3556_v33 = vpop.f32.mrf.mxu3 }
0x1a96   :  { %v3524_v39 = vadd.f32 %v3523_v4, %v3485_v7 }
0x1a98   :  { %v3553_v43 = vadd.f32 %v3552_v40, %v3524_v39 }
0x1a9a   :  { %v3561_v14 = vmul.f32 %v5501_v51, %v3553_v43 }
0x1a9c   :  { %v3564_v49 = vsel %vm3563_vm13, %v3561_v14, 0.0 }
0x1a9d   :  { %v3527_v20 = vpop.f32.mrf.mxu2 }
0x1a9e   :  { %v3528_v38 = vadd.f32 %v3527_v20, %v3491_v15 }
0x1aa0   :  { %v3557_v27 = vadd.f32 %v3556_v33, %v3528_v38 }
0x1aa2   :  { %v3562_v54 = vmul.f32 0.0, %v3557_v27 }
0x1aa4   :  { %v3565_v31 = vsel %vm3563_vm13, %v3562_v54, 0.0 }
0x1aa5   :  { %v3566_v55 = vadd.f32 %v3565_v31, %v3564_v49 }
0x1aa7   :  { %v3567_v3 = vrot.slane %v3566_v55, 4 }
0x1aa9   :  { %v3568_v63 = vadd.f32 %v3567_v3, %v3566_v55 }
0x1aab   :  { %v3569_v47 = vrot.slane %v3568_v63, 2 }
0x1aad   :  { %v3570_v0 = vadd.f32 %v3569_v47, %v3568_v63 }
0x1aaf   :  { %v3571_v30 = vrot.slane %v3570_v0, 1 }
0x1ab1   :  { %v3572_v1 = vadd.f32 %v3571_v30, %v3570_v0 }
0x1ab3   :  { %v3573_v6 = vmul.f32 0.25, %v3572_v1 }
0x1ab5   :  { %v3574_v9 = vsub.f32 %v3553_v43, %v3573_v6  ;;  %v3575_v62 = vsub.f32 %v3557_v27, %v3573_v6 }
0x1ab7   :  { %v3576_v53 = vmul.f32 %v3574_v9, %v3574_v9  ;;  %v3577_v59 = vmul.f32 %v3575_v62, %v3575_v62 }
0x1ab9   :  { %v3578_v60 = vmul.f32 %v5501_v51, %v3576_v53  ;;  %v3579_v8 = vmul.f32 0.0, %v3577_v59 }
0x1abb   :  { %v3580_v10 = vsel %vm3563_vm13, %v3578_v60, 0.0  ;;  %v3581_v35 = vsel %vm3563_vm13, %v3579_v8, 0.0 }
0x1abc   :  { %v3582_v24 = vadd.f32 %v3581_v35, %v3580_v10 }
0x1abe   :  { %v3583_v32 = vrot.slane %v3582_v24, 4 }
0x1ac0   :  { %v3584_v58 = vadd.f32 %v3583_v32, %v3582_v24 }
0x1ac2   :  { %v3585_v16 = vrot.slane %v3584_v58, 2 }
0x1ac4   :  { %v3586_v34 = vadd.f32 %v3585_v16, %v3584_v58 }
0x1ac6   :  { %v3587_v25 = vrot.slane %v3586_v34, 1 }
0x1ac8   :  { %v3588_v5 = vadd.f32 %v3587_v25, %v3586_v34 }
0x1aca   :  { %v3589_v22 = vmul.f32 0.25, %v3588_v5 }
0x1acc   :  { %v3590_v28 = vadd.f32 1e-05, %v3589_v22 }
0x1ace   :  { %4121 = vrsqrt.f32 %v3590_v28  ;;  %vm3597_vm15 = vweird.f32 %v3590_v28 }
0x1ad4   :  { %v4122_v11 = vpop.eup %4121 }
0x1ad5   :  { %v3592_v37 = vmul.f32 %v4122_v11, %v3590_v28  ;;  %vm3598_vm14 = vweird.f32 %v4122_v11 }
0x1ad6   :  { %vm3599_vm0 = vmor %vm3597_vm15, %vm3598_vm14 }
0x1ad7   :  { %v3593_v61 = vmul.f32 %v4122_v11, %v3592_v37 }
0x1ad9   :  { %v3594_v23 = vmul.f32 0.5, %v3593_v61 }
0x1adb   :  { %v3595_v51 = vsub.f32 1.5, %v3594_v23 }
0x1add   :  { %v3596_v57 = vmul.f32 %v4122_v11, %v3595_v51 }
0x1adf   :  { %v3600_v12 = vsel %vm3599_vm0, %v4122_v11, %v3596_v57 }
0x1ae0   :  { %v3601_v56 = vmul.f32 %v3600_v12, %v3574_v9  ;;  %v3602_v48 = vmul.f32 %v3600_v12, %v3575_v62 }
0x1ae2   :  { %v3606_v36 = vmul.f32 %v3827_v41, %v3601_v56  ;;  %v3607_v18 = vmul.f32 %v3827_v41, %v3602_v48 }
0x1ae4   :  { %v3612_v13 = vadd.f32 %v3828_v19, %v3607_v18  ;;  %v3611_v29 = vadd.f32 %v3828_v19, %v3606_v36 }
0x1ae6   :  { %v3619_v52 = vsel %vm3563_vm13, %v3611_v29, %v3614_v17  ;;  %v3620_v50 = vsel %vm3563_vm13, %v3612_v13, %v3616_v46 }
0x1ae7   :  { %v3622_v26 = vsel %vm3621_vm1, %v3619_v52, 0.0  ;;  %v3623_v42 = vsel %vm3621_vm1, %v3620_v50, 0.0 }
0x1ae8   :  { %3624 = vst [vmem:[#allocation12] sm:$0xff] %v3622_v26 }
0x1ae9   :  { %3625 = vst [vmem:[#allocation12 + $0x8] sm:$0xff] %v3623_v42 }
0x1aea   :  { %3651 = dma.vmem_to_hbm [thread:$0]  %s3644_s11, 256, %s3646_s2, [#allocation13], %s4283_s3, %s4283_s3, %s4284_s26  }
0x1aeb   :  { %4278 = dma.done.wait [#allocation5], 512  }
0x1aec   :  { %4279 = vsyncadd [#allocation5], 4294966784 }
0x1aed   :  { %4280 = dma.done.wait [#allocation13], 256  }
0x1aee   :  { %4281 = vsyncadd [#allocation13], 4294967040 }
0x1aef   :  { %3660 = vsyncpa [#allocation4], 1 }
0x1af0   :  { %3661 = vsyncpa [#allocation7], 1 }
0x1af1   :  { %3662 = vsyncpa [#allocation10], 1 }
0x1af2   :  { %3663 = vsyncpa [#allocation5], 1 }
0x1af3   :  { %3664 = vsyncpa [#allocation13], 1 }

</bundles_post_ra>
